<compile_context>
chip_gen: v7x
topology: tpu7x:2x2x1
jax: 0.10.0
libtpu: 0.0.40
codegen_flags: <defaults>
</compile_context>

<pallas_src>
import math
import numpy as np
import jax
import jax.numpy as jnp
from jax.experimental import pallas as pl
from jax.experimental.pallas import tpu as pltpu

# ----------------------------- small config ---------------------------------
B = 2              # batch
CIN = 3            # image channels
H = W = 16         # image spatial
HW = H * W
E = 32             # "in_channel" (1280 in the real model), divisible by 2 heads
NUM_HEADS = 2
D_DECONV = 16      # deconv head width
OUT_CH = 21        # heatmap channels
OUT_PAD = 128      # lane-dense padded heatmap channels
HOUT = 8           # head output spatial (1 -> 2 -> 4 -> 8)
N_SPATIAL = HOUT * HOUT                  # 64 output pixels
GROUP = OUT_PAD // D_DECONV              # 8 pixels per 128-lane feature chunk
N_CHUNKS = N_SPATIAL // GROUP            # 8 chunks of 128 lanes


# -------------------- one-time weight layout preparation --------------------
def _deconv4s2p1_to_dense(w, hin, hout):
    """Fold ConvTranspose2d(k=4, s=2, p=1) into a dense matrix acting on
    HWC-flattened activations: (hin*hin*cin, hout*hout*cout).  Exact."""
    w = np.asarray(w, np.float32)                    # (cin, cout, 4, 4) torch layout
    cin, cout = w.shape[0], w.shape[1]
    dense = np.zeros((hin * hin * cin, hout * hout * cout), np.float32)
    for iy in range(hin):
        for ix in range(hin):
            for ky in range(4):
                for kx in range(4):
                    oy, ox = 2 * iy - 1 + ky, 2 * ix - 1 + kx
                    if 0 <= oy < hout and 0 <= ox < hout:
                        r0 = (iy * hin + ix) * cin
                        c0 = (oy * hout + ox) * cout
                        dense[r0:r0 + cin, c0:c0 + cout] += w[:, :, ky, kx]
    return jnp.asarray(dense)


def _final_conv_blockdiag(wf, bf):
    """Final 1x1 conv as a block-diagonal (GROUP*D_DECONV, GROUP*OUT_PAD) matrix:
    one 128-lane chunk of HWC features -> 8 lane-dense (128-wide) output pixels.
    TODO(synk): at real scale switch to the dense (D_DECONV, OUT_PAD) weight."""
    wf = np.asarray(wf, np.float32)                  # (D_DECONV, OUT_CH)
    bf = np.asarray(bf, np.float32)                  # (OUT_CH,)
    wpad = np.zeros((D_DECONV, OUT_PAD), np.float32)
    wpad[:, :OUT_CH] = wf
    bpad = np.zeros((OUT_PAD,), np.float32)
    bpad[:OUT_CH] = bf
    blk = np.zeros((GROUP * D_DECONV, GROUP * OUT_PAD), np.float32)
    for s in range(GROUP):
        blk[s * D_DECONV:(s + 1) * D_DECONV, s * OUT_PAD:(s + 1) * OUT_PAD] = wpad
    return jnp.asarray(blk), jnp.asarray(np.tile(bpad, GROUP)[None, :])


def prepare_params(p):
    """One-time layout prep (transposes, deconv->dense folds, bias tiling,
    1/sqrt(d_head) folded into Q projection).  Never on the per-forward path."""
    dh = E // NUM_HEADS
    scale = 1.0 / math.sqrt(dh)
    wqkv_t = np.asarray(p['in_proj_w'], np.float32).T.copy()   # (E, 3E)
    bqkv = np.asarray(p['in_proj_b'], np.float32).copy()       # (3E,)
    wqkv_t[:, :E] *= scale                                     # pre-scale Q proj
    bqkv[:E] *= scale
    wf_blk, bf_blk = _final_conv_blockdiag(p['f_w'], p['f_b'])  # built once
    return {
        'wbb':    jnp.asarray(p['bb_w']),                        # (CIN, E)
        'bbb':    jnp.asarray(p['bb_b']).reshape(E, 1),
        'wqkv_t': jnp.asarray(wqkv_t),                           # (E, 3E)
        'bqkv':   jnp.asarray(bqkv).reshape(1, 3 * E),
        'wo_t':   jnp.asarray(p['out_proj_w']).T,                # (E, E)
        'bo':     jnp.asarray(p['out_proj_b']).reshape(1, E),
        'w1':     _deconv4s2p1_to_dense(p['d1_w'], 1, 2),        # (E, 4*D)
        'b1':     jnp.tile(jnp.asarray(p['d1_b']), 4).reshape(1, -1),
        'w2':     _deconv4s2p1_to_dense(p['d2_w'], 2, 4),        # (4*D, 16*D)
        'b2':     jnp.tile(jnp.asarray(p['d2_b']), 16).reshape(1, -1),
        'w3':     _deconv4s2p1_to_dense(p['d3_w'], 4, 8),        # (16*D, 64*D)
        'b3':     jnp.tile(jnp.asarray(p['d3_b']), 64).reshape(1, -1),
        'wf_blk': wf_blk,                                        # (128, 8*128)
        'bf':     bf_blk,                                        # (1, 8*128)
    }


# --------------------------- fused forward kernel ---------------------------
def fused_kernel(x_ref, wbb_ref, bbb_ref, wqkv_ref, bqkv_ref, wo_ref, bo_ref,
                 w1_ref, b1_ref, w2_ref, b2_ref, w3_ref, b3_ref,
                 wf_ref, bf_ref, o_ref):
    f32 = jnp.float32

    # ---- backbone stand-in: 1x1 conv (3 VPU FMAs) + ReLU + global avg pool --
    x = x_ref[...]                                   # (B, CIN*HW), lane-dense
    wbb = wbb_ref[...]                               # (CIN, E)
    y = None
    for c in range(CIN):
        xc = x[:, c * HW:(c + 1) * HW][:, None, :]   # (B, 1, HW) aligned lane slice
        wc = wbb[c:c + 1, :][:, :, None]             # (1, E, 1)
        y = xc * wc if y is None else y + xc * wc    # (B, E, HW)
    y = jnp.maximum(y + bbb_ref[...][None], 0.0)     # bias + ReLU
    bck = jnp.mean(y, axis=-1)                       # (B, E) pooled features

    # ---- MHA (torch unbatched semantics: the (B, E) input makes B the seq axis)
    dh = E // NUM_HEADS
    qkv = jnp.dot(bck, wqkv_ref[...], preferred_element_type=f32) + bqkv_ref[...]
    q, k, v = qkv[:, :E], qkv[:, E:2 * E], qkv[:, 2 * E:]   # q already / sqrt(dh)
    wo = wo_ref[...]                                 # (E, E) pre-transposed
    proj = None
    for hh in range(NUM_HEADS):                      # 2 unrolled iters, contiguous slices
        sl = slice(hh * dh, (hh + 1) * dh)
        s = jax.lax.dot_general(q[:, sl], k[:, sl], (((1,), (1,)), ((), ())),
                                preferred_element_type=f32)          # (B, B)
        s = s - jnp.max(s, axis=-1, keepdims=True)
        p = jnp.exp(s)
        p = p * pl.reciprocal(jnp.sum(p, axis=-1, keepdims=True), approx=True)  # EUP
        oh = jnp.dot(p, v[:, sl], preferred_element_type=f32)        # (B, dh)
        ph = jnp.dot(oh, wo[sl, :], preferred_element_type=f32)      # partial out-proj
        proj = ph if proj is None else proj + ph                     # no head concat
    feat = proj + bo_ref[...] + bck                                  # bias + residual

    # ---- head: deconvs (k=4,s=2,p=1) folded to dense matmuls on HWC rows ----
    h1 = jnp.maximum(jnp.dot(feat, w1_ref[...], preferred_element_type=f32)
                     + b1_ref[...], 0.0)             # (B, 4*D)    1x1 -> 2x2
    h2 = jnp.maximum(jnp.dot(h1, w2_ref[...], preferred_element_type=f32)
                     + b2_ref[...], 0.0)             # (B, 16*D)   2x2 -> 4x4
    h3 = jnp.maximum(jnp.dot(h2, w3_ref[...], preferred_element_type=f32)
                     + b3_ref[...], 0.0)             # (B, 64*D)   4x4 -> 8x8

    # ---- final 1x1 conv: block-diag weight; each chunk result stored directly
    # ---- into its lane-aligned o_ref slice (no concatenate / re-assembly) ----
    wf = wf_ref[...]                                 # (128, GROUP*OUT_PAD)
    bf = bf_ref[...]                                 # (1,   GROUP*OUT_PAD)
    for ck in range(N_CHUNKS):                       # static 8-way unroll
        chunk = h3[:, ck * 128:(ck + 1) * 128]       # 8 pixels x 16 channels
        o_ref[:, ck * GROUP * OUT_PAD:(ck + 1) * GROUP * OUT_PAD] = (
            jnp.dot(chunk, wf, preferred_element_type=f32) + bf)


def _fused_forward(x_r, prep):
    b_ = x_r.shape[0]
    args = (x_r, prep['wbb'], prep['bbb'], prep['wqkv_t'], prep['bqkv'],
            prep['wo_t'], prep['bo'], prep['w1'], prep['b1'],
            prep['w2'], prep['b2'], prep['w3'], prep['b3'],
            prep['wf_blk'], prep['bf'])
    # Gridless single invocation: every operand is a whole-array VMEM block,
    # resident once (no pipelining, no double-buffering, no per-step overhead).
    vmem = lambda: pl.BlockSpec(memory_space=pltpu.MemorySpace.VMEM)
    return pl.pallas_call(
        fused_kernel,
        out_shape=jax.ShapeDtypeStruct((b_, N_SPATIAL * OUT_PAD), jnp.float32),
        in_specs=[vmem() for _ in args],
        out_specs=vmem(),
    )(*args)


def model_forward(x, prep):
    """x: NCHW (B, CIN, H, W) float32 -> heatmaps NCHW (B, OUT_CH, 8, 8)."""
    b_ = x.shape[0]
    x_r = x.reshape(b_, CIN * H * W)                 # free reshape; channel c = lanes [c*HW,(c+1)*HW)
    slab = _fused_forward(x_r, prep)                 # (B, 64*128) lane-dense
    out = slab.reshape(b_, HOUT, HOUT, OUT_PAD)[:, :, :, :OUT_CH]
    return out.transpose(0, 3, 1, 2)                 # -> NCHW


# ------------------------------- parameters ---------------------------------
def init_params(key):
    ks = jax.random.split(key, 14)
    def rnd(k, shape, scale=0.05):
        return scale * jax.random.normal(k, shape, jnp.float32)
    return {
        'bb_w': rnd(ks[0], (CIN, E)),
        'bb_b': rnd(ks[1], (E,)),
        'in_proj_w': rnd(ks[2], (3 * E, E)),
        'in_proj_b': rnd(ks[3], (3 * E,)),
        'out_proj_w': rnd(ks[4], (E, E)),
        'out_proj_b': rnd(ks[5], (E,)),
        'd1_w': rnd(ks[6], (E, D_DECONV, 4, 4)),
        'd1_b': rnd(ks[7], (D_DECONV,)),
        'd2_w': rnd(ks[8], (D_DECONV, D_DECONV, 4, 4)),
        'd2_b': rnd(ks[9], (D_DECONV,)),
        'd3_w': rnd(ks[10], (D_DECONV, D_DECONV, 4, 4)),
        'd3_b': rnd(ks[11], (D_DECONV,)),
        'f_w': rnd(ks[12], (D_DECONV, OUT_CH)),
        'f_b': rnd(ks[13], (OUT_CH,)),
    }


if __name__ == "__main__":
    x = jax.random.normal(jax.random.PRNGKey(0), (B, CIN, H, W), jnp.float32)
    params = init_params(jax.random.PRNGKey(42))
    prep = prepare_params(params)                    # one-time layout prep
    out = jax.jit(model_forward)(x, prep)
    out = jax.block_until_ready(out)
    assert out.shape == (B, OUT_CH, HOUT, HOUT), out.shape
    assert bool(jnp.all(jnp.isfinite(out)))
    print("KERNEL_OK")
</pallas_src>

<mosaic_0001>
module attributes {stable_mosaic.version = 11 : i64} {
  func.func @fused_kernel(%arg0: memref<2x768xf32, #tpu.memory_space<vmem>>, %arg1: memref<3x32xf32, #tpu.memory_space<vmem>>, %arg2: memref<32x1xf32, #tpu.memory_space<vmem>>, %arg3: memref<32x96xf32, #tpu.memory_space<vmem>>, %arg4: memref<1x96xf32, #tpu.memory_space<vmem>>, %arg5: memref<32x32xf32, #tpu.memory_space<vmem>>, %arg6: memref<1x32xf32, #tpu.memory_space<vmem>>, %arg7: memref<32x64xf32, #tpu.memory_space<vmem>>, %arg8: memref<1x64xf32, #tpu.memory_space<vmem>>, %arg9: memref<64x256xf32, #tpu.memory_space<vmem>>, %arg10: memref<1x256xf32, #tpu.memory_space<vmem>>, %arg11: memref<256x1024xf32, #tpu.memory_space<vmem>>, %arg12: memref<1x1024xf32, #tpu.memory_space<vmem>>, %arg13: memref<128x1024xf32, #tpu.memory_space<vmem>>, %arg14: memref<1x1024xf32, #tpu.memory_space<vmem>>, %arg15: memref<2x8192xf32, #tpu.memory_space<vmem>>) attributes {dimension_semantics = [], scalar_prefetch = 0 : i64, scratch_operands = 0 : i64, tpu.core_type = #tpu.core_type<tc>} {
    %c0 = arith.constant 0 : index
    %c0_0 = arith.constant 0 : index
    %0 = vector.load %arg0[%c0, %c0_0] : memref<2x768xf32, #tpu.memory_space<vmem>>, vector<2x768xf32>
    %c0_1 = arith.constant 0 : index
    %c0_2 = arith.constant 0 : index
    %1 = vector.load %arg1[%c0_1, %c0_2] : memref<3x32xf32, #tpu.memory_space<vmem>>, vector<3x32xf32>
    %2 = vector.extract_strided_slice %0 {offsets = [0, 0], sizes = [2, 256], strides = [1, 1]} : vector<2x768xf32> to vector<2x256xf32>
    %3 = vector.shape_cast %2 : vector<2x256xf32> to vector<2x1x256xf32>
    %4 = vector.extract_strided_slice %1 {offsets = [0, 0], sizes = [1, 32], strides = [1, 1]} : vector<3x32xf32> to vector<1x32xf32>
    %5 = vector.shape_cast %4 : vector<1x32xf32> to vector<1x32x1xf32>
    %6 = vector.broadcast %3 : vector<2x1x256xf32> to vector<2x32x256xf32>
    %7 = vector.broadcast %5 : vector<1x32x1xf32> to vector<2x32x256xf32>
    %8 = arith.mulf %6, %7 : vector<2x32x256xf32>
    %9 = vector.extract_strided_slice %0 {offsets = [0, 256], sizes = [2, 256], strides = [1, 1]} : vector<2x768xf32> to vector<2x256xf32>
    %10 = vector.shape_cast %9 : vector<2x256xf32> to vector<2x1x256xf32>
    %11 = vector.extract_strided_slice %1 {offsets = [1, 0], sizes = [1, 32], strides = [1, 1]} : vector<3x32xf32> to vector<1x32xf32>
    %12 = vector.shape_cast %11 : vector<1x32xf32> to vector<1x32x1xf32>
    %13 = vector.broadcast %10 : vector<2x1x256xf32> to vector<2x32x256xf32>
    %14 = vector.broadcast %12 : vector<1x32x1xf32> to vector<2x32x256xf32>
    %15 = arith.mulf %13, %14 : vector<2x32x256xf32>
    %16 = arith.addf %8, %15 : vector<2x32x256xf32>
    %17 = vector.extract_strided_slice %0 {offsets = [0, 512], sizes = [2, 256], strides = [1, 1]} : vector<2x768xf32> to vector<2x256xf32>
    %18 = vector.shape_cast %17 : vector<2x256xf32> to vector<2x1x256xf32>
    %19 = vector.extract_strided_slice %1 {offsets = [2, 0], sizes = [1, 32], strides = [1, 1]} : vector<3x32xf32> to vector<1x32xf32>
    %20 = vector.shape_cast %19 : vector<1x32xf32> to vector<1x32x1xf32>
    %21 = vector.broadcast %18 : vector<2x1x256xf32> to vector<2x32x256xf32>
    %22 = vector.broadcast %20 : vector<1x32x1xf32> to vector<2x32x256xf32>
    %23 = arith.mulf %21, %22 : vector<2x32x256xf32>
    %24 = arith.addf %16, %23 : vector<2x32x256xf32>
    %c0_3 = arith.constant 0 : index
    %c0_4 = arith.constant 0 : index
    %25 = vector.load %arg2[%c0_3, %c0_4] : memref<32x1xf32, #tpu.memory_space<vmem>>, vector<32x1xf32>
    %26 = vector.shape_cast %25 : vector<32x1xf32> to vector<1x32x1xf32>
    %27 = vector.broadcast %26 : vector<1x32x1xf32> to vector<2x32x256xf32>
    %28 = arith.addf %24, %27 : vector<2x32x256xf32>
    %cst = arith.constant 0.000000e+00 : f32
    %29 = vector.broadcast %cst : f32 to vector<2x32x256xf32>
    %30 = arith.maximumf %28, %29 : vector<2x32x256xf32>
    %cst_5 = arith.constant dense<0.000000e+00> : vector<2x32xf32>
    %31 = vector.multi_reduction <add>, %30, %cst_5 [2] : vector<2x32x256xf32> to vector<2x32xf32>
    %cst_6 = arith.constant 2.560000e+02 : f32
    %32 = vector.broadcast %cst_6 : f32 to vector<2x32xf32>
    %33 = arith.divf %31, %32 : vector<2x32xf32>
    %c0_7 = arith.constant 0 : index
    %c0_8 = arith.constant 0 : index
    %34 = vector.load %arg3[%c0_7, %c0_8] : memref<32x96xf32, #tpu.memory_space<vmem>>, vector<32x96xf32>
    %cst_9 = arith.constant dense<0.000000e+00> : vector<2x96xf32>
    %35 = tpu.matmul %33, %34, %cst_9 {dimension_numbers = #tpu.dot_dimension_numbers<[1], [0], [0], [1], [0, 0, 1, 1], [], []>} : vector<2x32xf32>, vector<32x96xf32>, vector<2x96xf32> -> vector<2x96xf32>
    %c0_10 = arith.constant 0 : index
    %c0_11 = arith.constant 0 : index
    %36 = vector.load %arg4[%c0_10, %c0_11] : memref<1x96xf32, #tpu.memory_space<vmem>>, vector<1x96xf32>
    %37 = vector.broadcast %36 : vector<1x96xf32> to vector<2x96xf32>
    %38 = arith.addf %35, %37 : vector<2x96xf32>
    %39 = vector.extract_strided_slice %38 {offsets = [0, 0], sizes = [2, 32], strides = [1, 1]} : vector<2x96xf32> to vector<2x32xf32>
    %40 = vector.extract_strided_slice %38 {offsets = [0, 32], sizes = [2, 32], strides = [1, 1]} : vector<2x96xf32> to vector<2x32xf32>
    %41 = vector.extract_strided_slice %38 {offsets = [0, 64], sizes = [2, 32], strides = [1, 1]} : vector<2x96xf32> to vector<2x32xf32>
    %c0_12 = arith.constant 0 : index
    %c0_13 = arith.constant 0 : index
    %42 = vector.load %arg5[%c0_12, %c0_13] : memref<32x32xf32, #tpu.memory_space<vmem>>, vector<32x32xf32>
    %43 = vector.extract_strided_slice %39 {offsets = [0, 0], sizes = [2, 16], strides = [1, 1]} : vector<2x32xf32> to vector<2x16xf32>
    %44 = vector.extract_strided_slice %40 {offsets = [0, 0], sizes = [2, 16], strides = [1, 1]} : vector<2x32xf32> to vector<2x16xf32>
    %cst_14 = arith.constant dense<0.000000e+00> : vector<2x2xf32>
    %45 = tpu.matmul %43, %44, %cst_14 {dimension_numbers = #tpu.dot_dimension_numbers<[1], [1], [0], [0], [0, 0, 1, 0], [], []>} : vector<2x16xf32>, vector<2x16xf32>, vector<2x2xf32> -> vector<2x2xf32>
    %cst_15 = arith.constant dense<0xFF800000> : vector<2xf32>
    %46 = vector.multi_reduction <maximumf>, %45, %cst_15 [1] : vector<2x2xf32> to vector<2xf32>
    %47 = vector.shape_cast %46 : vector<2xf32> to vector<2x1xf32>
    %48 = vector.broadcast %47 : vector<2x1xf32> to vector<2x2xf32>
    %49 = arith.subf %45, %48 : vector<2x2xf32>
    %50 = math.exp %49 : vector<2x2xf32>
    %cst_16 = arith.constant dense<0.000000e+00> : vector<2xf32>
    %51 = vector.multi_reduction <add>, %50, %cst_16 [1] : vector<2x2xf32> to vector<2xf32>
    %52 = vector.shape_cast %51 : vector<2xf32> to vector<2x1xf32>
    %53 = tpu.reciprocal %52 {approx = true} : vector<2x1xf32> -> vector<2x1xf32>
    %54 = vector.broadcast %53 : vector<2x1xf32> to vector<2x2xf32>
    %55 = arith.mulf %50, %54 : vector<2x2xf32>
    %56 = vector.extract_strided_slice %41 {offsets = [0, 0], sizes = [2, 16], strides = [1, 1]} : vector<2x32xf32> to vector<2x16xf32>
    %cst_17 = arith.constant dense<0.000000e+00> : vector<2x16xf32>
    %57 = tpu.matmul %55, %56, %cst_17 {dimension_numbers = #tpu.dot_dimension_numbers<[1], [0], [0], [1], [0, 0, 1, 1], [], []>} : vector<2x2xf32>, vector<2x16xf32>, vector<2x16xf32> -> vector<2x16xf32>
    %58 = vector.extract_strided_slice %42 {offsets = [0, 0], sizes = [16, 32], strides = [1, 1]} : vector<32x32xf32> to vector<16x32xf32>
    %cst_18 = arith.constant dense<0.000000e+00> : vector<2x32xf32>
    %59 = tpu.matmul %57, %58, %cst_18 {dimension_numbers = #tpu.dot_dimension_numbers<[1], [0], [0], [1], [0, 0, 1, 1], [], []>} : vector<2x16xf32>, vector<16x32xf32>, vector<2x32xf32> -> vector<2x32xf32>
    %60 = vector.extract_strided_slice %39 {offsets = [0, 16], sizes = [2, 16], strides = [1, 1]} : vector<2x32xf32> to vector<2x16xf32>
    %61 = vector.extract_strided_slice %40 {offsets = [0, 16], sizes = [2, 16], strides = [1, 1]} : vector<2x32xf32> to vector<2x16xf32>
    %cst_19 = arith.constant dense<0.000000e+00> : vector<2x2xf32>
    %62 = tpu.matmul %60, %61, %cst_19 {dimension_numbers = #tpu.dot_dimension_numbers<[1], [1], [0], [0], [0, 0, 1, 0], [], []>} : vector<2x16xf32>, vector<2x16xf32>, vector<2x2xf32> -> vector<2x2xf32>
    %cst_20 = arith.constant dense<0xFF800000> : vector<2xf32>
    %63 = vector.multi_reduction <maximumf>, %62, %cst_20 [1] : vector<2x2xf32> to vector<2xf32>
    %64 = vector.shape_cast %63 : vector<2xf32> to vector<2x1xf32>
    %65 = vector.broadcast %64 : vector<2x1xf32> to vector<2x2xf32>
    %66 = arith.subf %62, %65 : vector<2x2xf32>
    %67 = math.exp %66 : vector<2x2xf32>
    %cst_21 = arith.constant dense<0.000000e+00> : vector<2xf32>
    %68 = vector.multi_reduction <add>, %67, %cst_21 [1] : vector<2x2xf32> to vector<2xf32>
    %69 = vector.shape_cast %68 : vector<2xf32> to vector<2x1xf32>
    %70 = tpu.reciprocal %69 {approx = true} : vector<2x1xf32> -> vector<2x1xf32>
    %71 = vector.broadcast %70 : vector<2x1xf32> to vector<2x2xf32>
    %72 = arith.mulf %67, %71 : vector<2x2xf32>
    %73 = vector.extract_strided_slice %41 {offsets = [0, 16], sizes = [2, 16], strides = [1, 1]} : vector<2x32xf32> to vector<2x16xf32>
    %cst_22 = arith.constant dense<0.000000e+00> : vector<2x16xf32>
    %74 = tpu.matmul %72, %73, %cst_22 {dimension_numbers = #tpu.dot_dimension_numbers<[1], [0], [0], [1], [0, 0, 1, 1], [], []>} : vector<2x2xf32>, vector<2x16xf32>, vector<2x16xf32> -> vector<2x16xf32>
    %75 = vector.extract_strided_slice %42 {offsets = [16, 0], sizes = [16, 32], strides = [1, 1]} : vector<32x32xf32> to vector<16x32xf32>
    %cst_23 = arith.constant dense<0.000000e+00> : vector<2x32xf32>
    %76 = tpu.matmul %74, %75, %cst_23 {dimension_numbers = #tpu.dot_dimension_numbers<[1], [0], [0], [1], [0, 0, 1, 1], [], []>} : vector<2x16xf32>, vector<16x32xf32>, vector<2x32xf32> -> vector<2x32xf32>
    %77 = arith.addf %59, %76 : vector<2x32xf32>
    %c0_24 = arith.constant 0 : index
    %c0_25 = arith.constant 0 : index
    %78 = vector.load %arg6[%c0_24, %c0_25] : memref<1x32xf32, #tpu.memory_space<vmem>>, vector<1x32xf32>
    %79 = vector.broadcast %78 : vector<1x32xf32> to vector<2x32xf32>
    %80 = arith.addf %77, %79 : vector<2x32xf32>
    %81 = arith.addf %80, %33 : vector<2x32xf32>
    %c0_26 = arith.constant 0 : index
    %c0_27 = arith.constant 0 : index
    %82 = vector.load %arg7[%c0_26, %c0_27] : memref<32x64xf32, #tpu.memory_space<vmem>>, vector<32x64xf32>
    %cst_28 = arith.constant dense<0.000000e+00> : vector<2x64xf32>
    %83 = tpu.matmul %81, %82, %cst_28 {dimension_numbers = #tpu.dot_dimension_numbers<[1], [0], [0], [1], [0, 0, 1, 1], [], []>} : vector<2x32xf32>, vector<32x64xf32>, vector<2x64xf32> -> vector<2x64xf32>
    %c0_29 = arith.constant 0 : index
    %c0_30 = arith.constant 0 : index
    %84 = vector.load %arg8[%c0_29, %c0_30] : memref<1x64xf32, #tpu.memory_space<vmem>>, vector<1x64xf32>
    %85 = vector.broadcast %84 : vector<1x64xf32> to vector<2x64xf32>
    %86 = arith.addf %83, %85 : vector<2x64xf32>
    %cst_31 = arith.constant 0.000000e+00 : f32
    %87 = vector.broadcast %cst_31 : f32 to vector<2x64xf32>
    %88 = arith.maximumf %86, %87 : vector<2x64xf32>
    %c0_32 = arith.constant 0 : index
    %c0_33 = arith.constant 0 : index
    %89 = vector.load %arg9[%c0_32, %c0_33] : memref<64x256xf32, #tpu.memory_space<vmem>>, vector<64x256xf32>
    %cst_34 = arith.constant dense<0.000000e+00> : vector<2x256xf32>
    %90 = tpu.matmul %88, %89, %cst_34 {dimension_numbers = #tpu.dot_dimension_numbers<[1], [0], [0], [1], [0, 0, 1, 1], [], []>} : vector<2x64xf32>, vector<64x256xf32>, vector<2x256xf32> -> vector<2x256xf32>
    %c0_35 = arith.constant 0 : index
    %c0_36 = arith.constant 0 : index
    %91 = vector.load %arg10[%c0_35, %c0_36] : memref<1x256xf32, #tpu.memory_space<vmem>>, vector<1x256xf32>
    %92 = vector.broadcast %91 : vector<1x256xf32> to vector<2x256xf32>
    %93 = arith.addf %90, %92 : vector<2x256xf32>
    %cst_37 = arith.constant 0.000000e+00 : f32
    %94 = vector.broadcast %cst_37 : f32 to vector<2x256xf32>
    %95 = arith.maximumf %93, %94 : vector<2x256xf32>
    %c0_38 = arith.constant 0 : index
    %c0_39 = arith.constant 0 : index
    %96 = vector.load %arg11[%c0_38, %c0_39] : memref<256x1024xf32, #tpu.memory_space<vmem>>, vector<256x1024xf32>
    %cst_40 = arith.constant dense<0.000000e+00> : vector<2x1024xf32>
    %97 = tpu.matmul %95, %96, %cst_40 {dimension_numbers = #tpu.dot_dimension_numbers<[1], [0], [0], [1], [0, 0, 1, 1], [], []>} : vector<2x256xf32>, vector<256x1024xf32>, vector<2x1024xf32> -> vector<2x1024xf32>
    %c0_41 = arith.constant 0 : index
    %c0_42 = arith.constant 0 : index
    %98 = vector.load %arg12[%c0_41, %c0_42] : memref<1x1024xf32, #tpu.memory_space<vmem>>, vector<1x1024xf32>
    %99 = vector.broadcast %98 : vector<1x1024xf32> to vector<2x1024xf32>
    %100 = arith.addf %97, %99 : vector<2x1024xf32>
    %cst_43 = arith.constant 0.000000e+00 : f32
    %101 = vector.broadcast %cst_43 : f32 to vector<2x1024xf32>
    %102 = arith.maximumf %100, %101 : vector<2x1024xf32>
    %c0_44 = arith.constant 0 : index
    %c0_45 = arith.constant 0 : index
    %103 = vector.load %arg13[%c0_44, %c0_45] : memref<128x1024xf32, #tpu.memory_space<vmem>>, vector<128x1024xf32>
    %c0_46 = arith.constant 0 : index
    %c0_47 = arith.constant 0 : index
    %104 = vector.load %arg14[%c0_46, %c0_47] : memref<1x1024xf32, #tpu.memory_space<vmem>>, vector<1x1024xf32>
    %105 = vector.extract_strided_slice %102 {offsets = [0, 0], sizes = [2, 128], strides = [1, 1]} : vector<2x1024xf32> to vector<2x128xf32>
    %cst_48 = arith.constant dense<0.000000e+00> : vector<2x1024xf32>
    %106 = tpu.matmul %105, %103, %cst_48 {dimension_numbers = #tpu.dot_dimension_numbers<[1], [0], [0], [1], [0, 0, 1, 1], [], []>} : vector<2x128xf32>, vector<128x1024xf32>, vector<2x1024xf32> -> vector<2x1024xf32>
    %107 = vector.broadcast %104 : vector<1x1024xf32> to vector<2x1024xf32>
    %108 = arith.addf %106, %107 : vector<2x1024xf32>
    %c0_49 = arith.constant 0 : index
    %c0_50 = arith.constant 0 : index
    %109 = vector.load %arg15[%c0_49, %c0_50] : memref<2x8192xf32, #tpu.memory_space<vmem>>, vector<2x1024xf32>
    tpu.vector_store %arg15[%c0_49, %c0_50], %108 {strides = array<i32>} : memref<2x8192xf32, #tpu.memory_space<vmem>>, vector<2x1024xf32>,
    %110 = vector.extract_strided_slice %102 {offsets = [0, 128], sizes = [2, 128], strides = [1, 1]} : vector<2x1024xf32> to vector<2x128xf32>
    %cst_51 = arith.constant dense<0.000000e+00> : vector<2x1024xf32>
    %111 = tpu.matmul %110, %103, %cst_51 {dimension_numbers = #tpu.dot_dimension_numbers<[1], [0], [0], [1], [0, 0, 1, 1], [], []>} : vector<2x128xf32>, vector<128x1024xf32>, vector<2x1024xf32> -> vector<2x1024xf32>
    %112 = vector.broadcast %104 : vector<1x1024xf32> to vector<2x1024xf32>
    %113 = arith.addf %111, %112 : vector<2x1024xf32>
    %c0_52 = arith.constant 0 : index
    %c1024 = arith.constant 1024 : index
    %114 = vector.load %arg15[%c0_52, %c1024] : memref<2x8192xf32, #tpu.memory_space<vmem>>, vector<2x1024xf32>
    tpu.vector_store %arg15[%c0_52, %c1024], %113 {strides = array<i32>} : memref<2x8192xf32, #tpu.memory_space<vmem>>, vector<2x1024xf32>,
    %115 = vector.extract_strided_slice %102 {offsets = [0, 256], sizes = [2, 128], strides = [1, 1]} : vector<2x1024xf32> to vector<2x128xf32>
    %cst_53 = arith.constant dense<0.000000e+00> : vector<2x1024xf32>
    %116 = tpu.matmul %115, %103, %cst_53 {dimension_numbers = #tpu.dot_dimension_numbers<[1], [0], [0], [1], [0, 0, 1, 1], [], []>} : vector<2x128xf32>, vector<128x1024xf32>, vector<2x1024xf32> -> vector<2x1024xf32>
    %117 = vector.broadcast %104 : vector<1x1024xf32> to vector<2x1024xf32>
    %118 = arith.addf %116, %117 : vector<2x1024xf32>
    %c0_54 = arith.constant 0 : index
    %c2048 = arith.constant 2048 : index
    %119 = vector.load %arg15[%c0_54, %c2048] : memref<2x8192xf32, #tpu.memory_space<vmem>>, vector<2x1024xf32>
    tpu.vector_store %arg15[%c0_54, %c2048], %118 {strides = array<i32>} : memref<2x8192xf32, #tpu.memory_space<vmem>>, vector<2x1024xf32>,
    %120 = vector.extract_strided_slice %102 {offsets = [0, 384], sizes = [2, 128], strides = [1, 1]} : vector<2x1024xf32> to vector<2x128xf32>
    %cst_55 = arith.constant dense<0.000000e+00> : vector<2x1024xf32>
    %121 = tpu.matmul %120, %103, %cst_55 {dimension_numbers = #tpu.dot_dimension_numbers<[1], [0], [0], [1], [0, 0, 1, 1], [], []>} : vector<2x128xf32>, vector<128x1024xf32>, vector<2x1024xf32> -> vector<2x1024xf32>
    %122 = vector.broadcast %104 : vector<1x1024xf32> to vector<2x1024xf32>
    %123 = arith.addf %121, %122 : vector<2x1024xf32>
    %c0_56 = arith.constant 0 : index
    %c3072 = arith.constant 3072 : index
    %124 = vector.load %arg15[%c0_56, %c3072] : memref<2x8192xf32, #tpu.memory_space<vmem>>, vector<2x1024xf32>
    tpu.vector_store %arg15[%c0_56, %c3072], %123 {strides = array<i32>} : memref<2x8192xf32, #tpu.memory_space<vmem>>, vector<2x1024xf32>,
    %125 = vector.extract_strided_slice %102 {offsets = [0, 512], sizes = [2, 128], strides = [1, 1]} : vector<2x1024xf32> to vector<2x128xf32>
    %cst_57 = arith.constant dense<0.000000e+00> : vector<2x1024xf32>
    %126 = tpu.matmul %125, %103, %cst_57 {dimension_numbers = #tpu.dot_dimension_numbers<[1], [0], [0], [1], [0, 0, 1, 1], [], []>} : vector<2x128xf32>, vector<128x1024xf32>, vector<2x1024xf32> -> vector<2x1024xf32>
    %127 = vector.broadcast %104 : vector<1x1024xf32> to vector<2x1024xf32>
    %128 = arith.addf %126, %127 : vector<2x1024xf32>
    %c0_58 = arith.constant 0 : index
    %c4096 = arith.constant 4096 : index
    %129 = vector.load %arg15[%c0_58, %c4096] : memref<2x8192xf32, #tpu.memory_space<vmem>>, vector<2x1024xf32>
    tpu.vector_store %arg15[%c0_58, %c4096], %128 {strides = array<i32>} : memref<2x8192xf32, #tpu.memory_space<vmem>>, vector<2x1024xf32>,
    %130 = vector.extract_strided_slice %102 {offsets = [0, 640], sizes = [2, 128], strides = [1, 1]} : vector<2x1024xf32> to vector<2x128xf32>
    %cst_59 = arith.constant dense<0.000000e+00> : vector<2x1024xf32>
    %131 = tpu.matmul %130, %103, %cst_59 {dimension_numbers = #tpu.dot_dimension_numbers<[1], [0], [0], [1], [0, 0, 1, 1], [], []>} : vector<2x128xf32>, vector<128x1024xf32>, vector<2x1024xf32> -> vector<2x1024xf32>
    %132 = vector.broadcast %104 : vector<1x1024xf32> to vector<2x1024xf32>
    %133 = arith.addf %131, %132 : vector<2x1024xf32>
    %c0_60 = arith.constant 0 : index
    %c5120 = arith.constant 5120 : index
    %134 = vector.load %arg15[%c0_60, %c5120] : memref<2x8192xf32, #tpu.memory_space<vmem>>, vector<2x1024xf32>
    tpu.vector_store %arg15[%c0_60, %c5120], %133 {strides = array<i32>} : memref<2x8192xf32, #tpu.memory_space<vmem>>, vector<2x1024xf32>,
    %135 = vector.extract_strided_slice %102 {offsets = [0, 768], sizes = [2, 128], strides = [1, 1]} : vector<2x1024xf32> to vector<2x128xf32>
    %cst_61 = arith.constant dense<0.000000e+00> : vector<2x1024xf32>
    %136 = tpu.matmul %135, %103, %cst_61 {dimension_numbers = #tpu.dot_dimension_numbers<[1], [0], [0], [1], [0, 0, 1, 1], [], []>} : vector<2x128xf32>, vector<128x1024xf32>, vector<2x1024xf32> -> vector<2x1024xf32>
    %137 = vector.broadcast %104 : vector<1x1024xf32> to vector<2x1024xf32>
    %138 = arith.addf %136, %137 : vector<2x1024xf32>
    %c0_62 = arith.constant 0 : index
    %c6144 = arith.constant 6144 : index
    %139 = vector.load %arg15[%c0_62, %c6144] : memref<2x8192xf32, #tpu.memory_space<vmem>>, vector<2x1024xf32>
    tpu.vector_store %arg15[%c0_62, %c6144], %138 {strides = array<i32>} : memref<2x8192xf32, #tpu.memory_space<vmem>>, vector<2x1024xf32>,
    %140 = vector.extract_strided_slice %102 {offsets = [0, 896], sizes = [2, 128], strides = [1, 1]} : vector<2x1024xf32> to vector<2x128xf32>
    %cst_63 = arith.constant dense<0.000000e+00> : vector<2x1024xf32>
    %141 = tpu.matmul %140, %103, %cst_63 {dimension_numbers = #tpu.dot_dimension_numbers<[1], [0], [0], [1], [0, 0, 1, 1], [], []>} : vector<2x128xf32>, vector<128x1024xf32>, vector<2x1024xf32> -> vector<2x1024xf32>
    %142 = vector.broadcast %104 : vector<1x1024xf32> to vector<2x1024xf32>
    %143 = arith.addf %141, %142 : vector<2x1024xf32>
    %c0_64 = arith.constant 0 : index
    %c7168 = arith.constant 7168 : index
    %144 = vector.load %arg15[%c0_64, %c7168] : memref<2x8192xf32, #tpu.memory_space<vmem>>, vector<2x1024xf32>
    tpu.vector_store %arg15[%c0_64, %c7168], %143 {strides = array<i32>} : memref<2x8192xf32, #tpu.memory_space<vmem>>, vector<2x1024xf32>,
    return
  }
}

</mosaic_0001>

<bundles_post_ra>
// kernel: model_forward.1
= control target key start
LH: loop header
LB: loop body
LE: loop exit
PB: predicated region body
PF: predicated region fallthrough
CT: control target
= control target key end

     0   :  { %20 = vsyncpa [#allocation3], 0  ;;  %s7631_s0 = inlined_call_operand.vmem [shape: f32[2,768], index: 0, kind: input, shape index: {}]   ;;  %s7632_s1 = inlined_call_operand.vmem [shape: f32[3,32], index: 1, kind: input, shape index: {}]   ;;  %s7633_s2 = inlined_call_operand.vmem [shape: f32[32,1], index: 2, kind: input, shape index: {}]   ;;  %s7634_s3 = inlined_call_operand.vmem [shape: f32[32,96], index: 3, kind: input, shape index: {}]   ;;  %s7635_s4 = inlined_call_operand.vmem [shape: f32[1,96], index: 4, kind: input, shape index: {}]   ;;  %s7636_s5 = inlined_call_operand.hbm [shape: f32[32,32], index: 5, kind: input, shape index: {}]   ;;  %s7637_s6 = inlined_call_operand.hbm [shape: f32[1,32], index: 6, kind: input, shape index: {}]   ;;  %s7638_s7 = inlined_call_operand.hbm [shape: f32[32,64], index: 7, kind: input, shape index: {}]   ;;  %s7639_s8 = inlined_call_operand.hbm [shape: f32[1,64], index: 8, kind: input, shape index: {}]   ;;  %s7640_s9 = inlined_call_operand.vmem [shape: f32[64,256], index: 9, kind: input, shape index: {}]   ;;  %s7641_s10 = inlined_call_operand.vmem [shape: f32[1,256], index: 10, kind: input, shape index: {}]   ;;  %s7642_s11 = inlined_call_operand.hbm [shape: f32[256,1024], index: 11, kind: input, shape index: {}]   ;;  %s7643_s12 = inlined_call_operand.vmem [shape: f32[1,1024], index: 12, kind: input, shape index: {}]   ;;  %s7644_s13 = inlined_call_operand.hbm [shape: f32[128,1024], index: 13, kind: input, shape index: {}]   ;;  %s7645_s14 = inlined_call_operand.hbm [shape: f32[1,1024], index: 14, kind: input, shape index: {}]   ;;  %s7646_s15 = inlined_call_operand.vmem [shape: f32[2,8192], index: 15, kind: output, shape index: {}]  }
   0x1   :  { %21 = vsyncpa [#allocation5], 0 }
   0x2   :  { %22 = vsyncpa [#allocation8], 0 }
   0x3   :  { %23 = vsyncpa [#allocation11], 0  ;;  %s6285_s18 = smov [#allocation4]   ;;  %s6286_s20 = smov [#allocation7]  }
   0x4   :  { %s52_s19 = sshll.u32 %s6285_s18, 4  ;;  %s74_s21 = sshll.u32 %s6286_s20, 4  ;;  %s53_s19 = int_to_ptr.vmem [resolvable:$true] %s52_s19  ;;  %s75_s21 = int_to_ptr.vmem [resolvable:$true] %s74_s21 }
   0x5   :  { %s6123_s24 = scalar_lea.hbm %s7637_s6, 16 }
   0x6   :  { %p6124_p0 = scmp.ne.s32.totalorder %s7637_s6, %s6123_s24  ;;  %p6127_p1 = scmp.lt.u32.totalorder %s6123_s24, %s7637_s6 }
   0x8   :  { %p6129_p2 = pnand %p6127_p1, %p6124_p0 }
   0xa   :  { %6132 = shalt.err (!%p6129_p2)
}
   0xb   :  { %s6133_s29 = scalar_lea.vmem %s53_s19, 16  ;;  %s6137_s30 = scalar_lea.vmem %s53_s19, 32 }
   0xc   :  { %p6134_p3 = scmp.ne.s32.totalorder %s53_s19, %s6133_s29  ;;  %p6138_p4 = scmp.lt.s32.totalorder %s53_s19, %s53_s19 }
   0xd   :  { %p6139_p5 = scmp.lt.s32.totalorder %s6137_s30, %s6133_s29 }
   0xf   :  { %p6140_p6 = por %p6139_p5, %p6138_p4 }
  0x11   :  { %p6141_p7 = pnand %p6140_p6, %p6134_p3 }
  0x13   :  { %6144 = shalt.err (!%p6141_p7)
}
  0x14   :  { %55 = dma.hbm_to_vmem [thread:$0]  %s7637_s6, 16, %s53_s19, [#allocation5]  }
  0x15   :  { %s6145_s22 = scalar_lea.hbm %s7639_s8, 16 }
  0x16   :  { %p6146_p8 = scmp.ne.s32.totalorder %s7639_s8, %s6145_s22  ;;  %p6149_p9 = scmp.lt.u32.totalorder %s6145_s22, %s7639_s8 }
  0x18   :  { %p6151_p10 = pnand %p6149_p9, %p6146_p8 }
  0x1a   :  { %6154 = shalt.err (!%p6151_p10)
}
  0x1b   :  { %s6155_s27 = scalar_lea.vmem %s75_s21, 16  ;;  %s6159_s28 = scalar_lea.vmem %s75_s21, 32 }
  0x1c   :  { %p6156_p11 = scmp.ne.s32.totalorder %s75_s21, %s6155_s27  ;;  %p6160_p12 = scmp.lt.s32.totalorder %s75_s21, %s75_s21 }
  0x1d   :  { %p6161_p13 = scmp.lt.s32.totalorder %s6159_s28, %s6155_s27 }
  0x1f   :  { %p6162_p0 = por %p6161_p13, %p6160_p12 }
  0x21   :  { %p6163_p1 = pnand %p6162_p0, %p6156_p11 }
  0x23   :  { %6166 = shalt.err (!%p6163_p1)
}
  0x24   :  { %77 = dma.hbm_to_vmem [thread:$0]  %s7639_s8, 16, %s75_s21, [#allocation8]  }
  0x25   :  { %s6287_s29 = smov [#allocation10]   ;;  %s6288_s16 = smov [#allocation2]  }
  0x26   :  { %s101_s30 = sshll.u32 %s6287_s29, 4  ;;  %s39_s17 = sshll.u32 %s6288_s16, 4  ;;  %s102_s30 = int_to_ptr.vmem [resolvable:$true] %s101_s30  ;;  %s6409_s17 = int_to_ptr.vmem [resolvable:$true] %s39_s17 }
  0x27   :  { %s6167_s22 = scalar_lea.hbm %s7644_s13, 16384 }
  0x28   :  { %p6168_p2 = scmp.ne.s32.totalorder %s7644_s13, %s6167_s22  ;;  %p6171_p3 = scmp.lt.u32.totalorder %s6167_s22, %s7644_s13 }
  0x2a   :  { %p6173_p4 = pnand %p6171_p3, %p6168_p2 }
  0x2c   :  { %6176 = shalt.err (!%p6173_p4)
}
  0x2d   :  { %s6177_s8 = scalar_lea.vmem %s102_s30, 16384  ;;  %p6182_p6 = scmp.lt.s32.totalorder %s102_s30, %s102_s30 }
  0x2e   :  { %p6178_p5 = scmp.ne.s32.totalorder %s102_s30, %s6177_s8  ;;  %p6183_p7 = scmp.lt.s32.totalorder %s6177_s8, %s6177_s8 }
  0x30   :  { %p6184_p8 = por %p6183_p7, %p6182_p6 }
  0x32   :  { %p6185_p9 = pnand %p6184_p8, %p6178_p5 }
  0x34   :  { %6188 = shalt.err (!%p6185_p9)
}
  0x35   :  { %s6289_s21 = smov 1024   ;;  %s6290_s27 = smov 64  }
  0x36   :  { %107 = dma.hbm_to_vmem [thread:$0]  %s7644_s13, 16384, %s102_s30, [#allocation11], %s6289_s21, %s6289_s21, %s6290_s27  }
  0x37   :  { %s6189_s16 = scalar_lea.hbm %s7636_s5, 512 }
  0x38   :  { %p6190_p10 = scmp.ne.s32.totalorder %s7636_s5, %s6189_s16  ;;  %p6193_p11 = scmp.lt.u32.totalorder %s6189_s16, %s7636_s5 }
  0x3a   :  { %p6195_p12 = pnand %p6193_p11, %p6190_p10 }
  0x3c   :  { %6198 = shalt.err (!%p6195_p12)
}
  0x3d   :  { %s6199_s24 = scalar_lea.vmem %s6409_s17, 512  ;;  %p6204_p0 = scmp.lt.s32.totalorder %s6409_s17, %s6409_s17 }
  0x3e   :  { %p6200_p13 = scmp.ne.s32.totalorder %s6409_s17, %s6199_s24  ;;  %p6205_p1 = scmp.lt.s32.totalorder %s6199_s24, %s6199_s24 }
  0x40   :  { %p6206_p2 = por %p6205_p1, %p6204_p0 }
  0x42   :  { %p6207_p3 = pnand %p6206_p2, %p6200_p13 }
  0x44   :  { %6210 = shalt.err (!%p6207_p3)
}
  0x45   :  { %s6291_s13 = smov 128   ;;  %s6292_s30 = smov 8  }
  0x46   :  { %45 = dma.hbm_to_vmem [thread:$0]  %s7636_s5, 512, %s6409_s17, [#allocation3], %s6291_s13, %s6291_s13, %s6292_s30  }
  0x47   :  { %s6293_s8 = smov [#allocation6]   ;;  %s6294_s6 = smov [#allocation9]  }
  0x48   :  { %s61_s28 = sshll.u32 %s6293_s8, 4  ;;  %s87_s19 = sshll.u32 %s6294_s6, 4  ;;  %s62_s28 = int_to_ptr.vmem [resolvable:$true] %s61_s28  ;;  %s6443_s19 = int_to_ptr.vmem [resolvable:$true] %s87_s19 }
  0x49   :  { %s6211_s18 = scalar_lea.hbm %s7638_s7, 512 }
  0x4a   :  { %p6212_p4 = scmp.ne.s32.totalorder %s7638_s7, %s6211_s18  ;;  %p6215_p5 = scmp.lt.u32.totalorder %s6211_s18, %s7638_s7 }
  0x4c   :  { %p6217_p6 = pnand %p6215_p5, %p6212_p4 }
  0x4e   :  { %6220 = shalt.err (!%p6217_p6)
}
  0x4f   :  { %s6221_s5 = scalar_lea.vmem %s62_s28, 512  ;;  %p6226_p8 = scmp.lt.s32.totalorder %s62_s28, %s62_s28 }
  0x50   :  { %p6222_p7 = scmp.ne.s32.totalorder %s62_s28, %s6221_s5  ;;  %p6227_p9 = scmp.lt.s32.totalorder %s6221_s5, %s6221_s5 }
  0x52   :  { %p6228_p10 = por %p6227_p9, %p6226_p8 }
  0x54   :  { %p6229_p11 = pnand %p6228_p10, %p6222_p7 }
  0x56   :  { %6232 = shalt.err (!%p6229_p11)
}
  0x57   :  { %67 = dma.hbm_to_vmem [thread:$0]  %s7638_s7, 512, %s62_s28, [#allocation5], %s6291_s13, %s6291_s13, %s6292_s30  }
  0x58   :  { %s6233_s6 = scalar_lea.hbm %s7642_s11, 32768 }
  0x59   :  { %p6234_p12 = scmp.ne.s32.totalorder %s7642_s11, %s6233_s6  ;;  %p6237_p13 = scmp.lt.u32.totalorder %s6233_s6, %s7642_s11 }
  0x5b   :  { %p6239_p0 = pnand %p6237_p13, %p6234_p12 }
  0x5d   :  { %6242 = shalt.err (!%p6239_p0)
}
  0x5e   :  { %s6243_s22 = scalar_lea.vmem %s6443_s19, 32768  ;;  %p6248_p2 = scmp.lt.s32.totalorder %s6443_s19, %s6443_s19 }
  0x5f   :  { %p6244_p1 = scmp.ne.s32.totalorder %s6443_s19, %s6243_s22  ;;  %p6249_p3 = scmp.lt.s32.totalorder %s6243_s22, %s6243_s22 }
  0x61   :  { %p6250_p4 = por %p6249_p3, %p6248_p2 }
  0x63   :  { %p6251_p5 = pnand %p6250_p4, %p6244_p1 }
  0x65   :  { %6254 = shalt.err (!%p6251_p5)
}
  0x66   :  { %93 = dma.hbm_to_vmem [thread:$0]  %s7642_s11, 32768, %s6443_s19, [#allocation8], %s6289_s21, %s6289_s21, %s6290_s27  }
  0x67   :  { %s6295_s30 = smov [#allocation12]   ;;  %s6255_s5 = scalar_lea.hbm %s7645_s14, 128 }
  0x68   :  { %s114_s28 = sshll.u32 %s6295_s30, 4  ;;  %p6256_p6 = scmp.ne.s32.totalorder %s7645_s14, %s6255_s5  ;;  %s115_s28 = int_to_ptr.vmem [resolvable:$true] %s114_s28 }
  0x69   :  { %p6259_p7 = scmp.lt.u32.totalorder %s6255_s5, %s7645_s14 }
  0x6b   :  { %p6261_p8 = pnand %p6259_p7, %p6256_p6 }
  0x6d   :  { %6264 = shalt.err (!%p6261_p8)
}
  0x6e   :  { %s6265_s6 = scalar_lea.vmem %s115_s28, 128  ;;  %p6270_p10 = scmp.lt.s32.totalorder %s115_s28, %s115_s28 }
  0x6f   :  { %p6266_p9 = scmp.ne.s32.totalorder %s115_s28, %s6265_s6  ;;  %p6271_p11 = scmp.lt.s32.totalorder %s6265_s6, %s6265_s6 }
  0x71   :  { %p6272_p12 = por %p6271_p11, %p6270_p10 }
  0x73   :  { %p6273_p13 = pnand %p6272_p12, %p6266_p9 }
  0x75   :  { %6276 = shalt.err (!%p6273_p13)
}
  0x76   :  { %117 = dma.hbm_to_vmem [thread:$0]  %s7645_s14, 128, %s115_s28, [#allocation11]  }
  0x77   :  { %6277 = dma.done.wait [#allocation3], 512  }
  0x78   :  { %6278 = vsyncadd [#allocation3], 4294966784 }
  0x79   :  { %6279 = dma.done.wait [#allocation5], 528  }
  0x7a   :  { %6280 = vsyncadd [#allocation5], 4294966768 }
  0x7b   :  { %6281 = dma.done.wait [#allocation8], 32784  }
  0x7c   :  { %6282 = vsyncadd [#allocation8], 4294934512 }
  0x7d   :  { %6283 = dma.done.wait [#allocation11], 16512  }
  0x7e   :  { %6284 = vsyncadd [#allocation11], 4294950784  ;;  %v151_v0 = vlaneseq  ;;  %v6296_v1 = vmov 0   ;;  %v359_v4 = vld [vmem:[%s7633_s2] sm:$0xff]  ;;  %v360_v8 = vld [vmem:[%s7633_s2 + $0x8] sm:$0xff]  ;;  %vm6298_vm0 = vmmov 0  }
  0x7f   :  { %6113 = vset.pattern.permute.xlu0 %v6296_v1  ;;  %6114 = vset.pattern.permute.xlu1 %v6296_v1  ;;  %v141_v5 = vld [vmem:[%s7632_s1] sm:$0x7]  ;;  %v361_v10 = vld [vmem:[%s7633_s2 + $0x10] sm:$0xff]  ;;  %v362_v11 = vld [vmem:[%s7633_s2 + $0x18] sm:$0xff]  ;;  %vm478_vm1 = vcmask 130112   ;;  %vm485_vm2 = vcmask 195712  }
  0x80   :  { %v6490_v2 = vshrl.u32 %v151_v0, 7  ;;  %365 = vperm.xlu0 %6113, %v359_v4   ;;  %v4681_v16 = vld.sshfl [vmem:[%s7631_s0] sm:$0xff pattern:$0x75316420]  ;;  %vm492_vm3 = vcmask 261312   ;;  %vm513_vm4 = vcmask 1041409  }
  0x81   :  { %v150_v17 = vcombine.high %v4681_v16, %v4681_v16  ;;  %v206_v20 = vrot.slane %v4681_v16, 2  ;;  %v4682_v23 = vld.sshfl [vmem:[%s7631_s0 + $0x8] sm:$0x33 pattern:$0x75316420]  ;;  %vm515_vm5 = vcmask 261120  }
  0x82   :  { %7747 = vst [vmem:[#allocation17_spill] sm:$0xff] %v6490_v2  ;;  %v6493_v3 = vsub.s32 0, %v6490_v2  ;;  %v6503_v7 = vsub.s32 1, %v6490_v2  ;;  %v6516_v12 = vsub.s32 2, %v6490_v2  ;;  %v287_v33 = vcombine.high %v4682_v23, %v4682_v23  ;;  %s6300_s21 = smov 80   ;;  %s6301_s19 = smov 96  }
  0x83   :  { %v207_v21 = vrot.slane %v150_v17, 2  ;;  %s6302_s14 = smov 112   ;;  %vm595_vm6 = vcmask 130048   ;;  %vm670_vm7 = vcmask 9216   ;;  %vm688_vm8 = vcmask 1041408  }
  0x84   :  { %7748 = vst [vmem:[#allocation18_spill] sm:$0xff] %v6493_v3  ;;  %v154_v6 = vrot.slane %v141_v5, %v6493_v3  ;;  %7749 = vst [vmem:[#allocation19_spill] sm:$0xff] %v6503_v7  ;;  %370 = vperm.xlu0 %6113, %v360_v8   ;;  %v211_v9 = vrot.slane %v141_v5, %v6503_v7  ;;  %v291_v13 = vrot.slane %v141_v5, %v6516_v12  ;;  %vm684_vm9 = vcmask 15360  }
  0x85   :  { %7750 = vst [vmem:[#allocation20_spill] sm:$0xff] %v6516_v12  ;;  %v173_v24 = vrot.slane %v4681_v16, %v6493_v3  ;;  %v230_v26 = vrot.slane %v206_v20, %v6493_v3  ;;  %v234_v27 = vrot.slane %v206_v20, %v6503_v7  ;;  %v238_v28 = vrot.slane %v207_v21, %v6493_v3  ;;  %v1925_v12 = vld [vmem:[#allocation10 + $0x1f0] sm:$0xff] }
  0x86   :  { %156 = vbcast.lane.b32.xlu1 %v154_v6, 256  ;;  %v242_v29 = vrot.slane %v207_v21, %v6503_v7  ;;  %v177_v30 = vrot.slane %v4681_v16, %v6503_v7  ;;  %v181_v31 = vrot.slane %v150_v17, %v6493_v3  ;;  %v185_v32 = vrot.slane %v150_v17, %v6503_v7 }
  0x87   :  { %v6540_v44 = vrot.slane %v4682_v23, %v6493_v3  ;;  %v6543_v45 = vrot.slane %v4682_v23, %v6503_v7  ;;  %v6546_v46 = vrot.slane %v287_v33, %v6493_v3  ;;  %v6549_v47 = vrot.slane %v287_v33, %v6503_v7 }
  0x88   :  { %213 = vbcast.lane.b32.xlu0 %v211_v9, 256  ;;  %vm1196_vm10 = vcmask 523264  }
  0x8a   :  { %160 = vbcast.lane.b32.xlu1 %v154_v6, 264 }
  0x8c   :  { %375 = vperm.xlu0 %6113, %v361_v10  }
  0x8e   :  { %217 = vbcast.lane.b32.xlu1 %v211_v9, 264 }
  0x90   :  { %221 = vbcast.lane.b32.xlu0 %v211_v9, 272 }
  0x92   :  { %164 = vbcast.lane.b32.xlu1 %v154_v6, 272 }
  0x94   :  { %168 = vbcast.lane.b32.xlu0 %v154_v6, 280 }
  0x96   :  { %380 = vperm.xlu1 %6114, %v362_v11  }
  0x98   :  { %293 = vbcast.lane.b32.xlu0 %v291_v13, 256 }
  0x9a   :  { %225 = vbcast.lane.b32.xlu1 %v211_v9, 280 }
  0x9c   :  { %301 = vbcast.lane.b32.xlu0 %v291_v13, 272 }
  0x9e   :  { %297 = vbcast.lane.b32.xlu1 %v291_v13, 264 }
  0xa2   :  { %305 = vbcast.lane.b32.xlu1 %v291_v13, 280 }
  0xf8   :  { %v157_v14 = vpop.permute.xlu1 %156 }
  0xf9   :  { %v190_v48 = vmul.f32 %v173_v24, %v157_v14  ;;  %v191_v49 = vmul.f32 %v177_v30, %v157_v14  ;;  %v198_v50 = vmul.f32 %v181_v31, %v157_v14  ;;  %v199_v51 = vmul.f32 %v185_v32, %v157_v14 }
  0xfc   :  { %v161_v18 = vpop.permute.xlu1 %160 }
  0xfd   :  { %v192_v35 = vmul.f32 %v173_v24, %v161_v18  ;;  %v193_v36 = vmul.f32 %v177_v30, %v161_v18  ;;  %v200_v37 = vmul.f32 %v181_v31, %v161_v18  ;;  %v201_v38 = vmul.f32 %v185_v32, %v161_v18 }
  0xff   :  { %v6519_v15 = vpop.permute.xlu0 %365 }
 0x100   :  { %v218_v25 = vpop.permute.xlu1 %217 }
 0x101   :  { %v249_v39 = vmul.f32 %v230_v26, %v218_v25  ;;  %v250_v40 = vmul.f32 %v234_v27, %v218_v25  ;;  %v257_v41 = vmul.f32 %v238_v28, %v218_v25  ;;  %v258_v42 = vmul.f32 %v242_v29, %v218_v25 }
 0x103   :  { %v6524_v19 = vpop.permute.xlu0 %370  ;;  %v265_v57 = vadd.f32 %v249_v39, %v192_v35  ;;  %v266_v58 = vadd.f32 %v250_v40, %v193_v36  ;;  %v6551_v59 = vadd.f32 %v257_v41, %v200_v37  ;;  %v6553_v60 = vadd.f32 %v258_v42, %v201_v38 }
 0x104   :  { %v165_v43 = vpop.permute.xlu1 %164 }
 0x105   :  { %v194_v62 = vmul.f32 %v173_v24, %v165_v43  ;;  %v195_v63 = vmul.f32 %v177_v30, %v165_v43  ;;  %v202_v1 = vmul.f32 %v181_v31, %v165_v43  ;;  %v203_v4 = vmul.f32 %v185_v32, %v165_v43 }
 0x107   :  { %v214_v22 = vpop.permute.xlu0 %213 }
 0x108   :  { %v247_v53 = vmul.f32 %v230_v26, %v214_v22  ;;  %v248_v54 = vmul.f32 %v234_v27, %v214_v22  ;;  %v255_v55 = vmul.f32 %v238_v28, %v214_v22  ;;  %v256_v56 = vmul.f32 %v242_v29, %v214_v22 }
 0x10a   :  { %v263_v11 = vadd.f32 %v247_v53, %v190_v48  ;;  %v264_v13 = vadd.f32 %v248_v54, %v191_v49  ;;  %v271_v14 = vadd.f32 %v255_v55, %v198_v50  ;;  %v272_v16 = vadd.f32 %v256_v56, %v199_v51 }
 0x10b   :  { %v6537_v34 = vpop.permute.xlu0 %375 }
 0x10f   :  { %v222_v52 = vpop.permute.xlu0 %221 }
 0x110   :  { %v251_v5 = vmul.f32 %v230_v26, %v222_v52  ;;  %v252_v6 = vmul.f32 %v234_v27, %v222_v52  ;;  %v259_v8 = vmul.f32 %v238_v28, %v222_v52  ;;  %v260_v9 = vmul.f32 %v242_v29, %v222_v52 }
 0x112   :  { %v267_v36 = vadd.f32 %v251_v5, %v194_v62  ;;  %v268_v37 = vadd.f32 %v252_v6, %v195_v63  ;;  %v6557_v38 = vadd.f32 %v259_v8, %v202_v1  ;;  %v6559_v39 = vadd.f32 %v260_v9, %v203_v4 }
 0x113   :  { %v169_v10 = vpop.permute.xlu0 %168 }
 0x114   :  { %v196_v17 = vmul.f32 %v173_v24, %v169_v10  ;;  %v197_v18 = vmul.f32 %v177_v30, %v169_v10  ;;  %v204_v20 = vmul.f32 %v181_v31, %v169_v10  ;;  %v205_v21 = vmul.f32 %v185_v32, %v169_v10 }
 0x115   :  { %v6555_v61 = vpop.permute.xlu1 %380 }
 0x117   :  { %v294_v40 = vpop.permute.xlu0 %293 }
 0x118   :  { %v327_v24 = vmul.f32 %v6540_v44, %v294_v40  ;;  %v328_v30 = vmul.f32 %v6543_v45, %v294_v40 }
 0x119   :  { %v226_v22 = vpop.permute.xlu1 %225 }
 0x11a   :  { %v253_v23 = vmul.f32 %v230_v26, %v226_v22  ;;  %v254_v25 = vmul.f32 %v234_v27, %v226_v22  ;;  %v261_v33 = vmul.f32 %v238_v28, %v226_v22  ;;  %v262_v35 = vmul.f32 %v242_v29, %v226_v22 }
 0x11b   :  { %v335_v26 = vmul.f32 %v6546_v46, %v294_v40  ;;  %v336_v27 = vmul.f32 %v6549_v47, %v294_v40  ;;  %v302_v50 = vpop.permute.xlu0 %301  ;;  %v343_v51 = vadd.f32 %v327_v24, %v263_v11  ;;  %v344_v52 = vadd.f32 %v328_v30, %v264_v13 }
 0x11c   :  { %v269_v41 = vadd.f32 %v253_v23, %v196_v17  ;;  %v270_v42 = vadd.f32 %v254_v25, %v197_v18  ;;  %v277_v43 = vadd.f32 %v261_v33, %v204_v20  ;;  %v6561_v48 = vadd.f32 %v262_v35, %v205_v21 }
 0x11d   :  { %v298_v28 = vpop.permute.xlu1 %297  ;;  %v351_v53 = vadd.f32 %v335_v26, %v271_v14  ;;  %v352_v54 = vadd.f32 %v336_v27, %v272_v16  ;;  %v331_v55 = vmul.f32 %v6540_v44, %v302_v50  ;;  %v332_v56 = vmul.f32 %v6543_v45, %v302_v50 }
 0x11e   :  { %v329_v29 = vmul.f32 %v6540_v44, %v298_v28  ;;  %v330_v31 = vmul.f32 %v6543_v45, %v298_v28  ;;  %v337_v32 = vmul.f32 %v6546_v46, %v298_v28  ;;  %v338_v49 = vmul.f32 %v6549_v47, %v298_v28 }
 0x11f   :  { %v339_v62 = vmul.f32 %v6546_v46, %v302_v50  ;;  %v340_v63 = vmul.f32 %v6549_v47, %v302_v50  ;;  %v383_v4 = vadd.f32 %v6519_v15, %v343_v51  ;;  %v384_v5 = vadd.f32 %v6519_v15, %v344_v52 }
 0x120   :  { %v345_v6 = vadd.f32 %v329_v29, %v265_v57  ;;  %v346_v8 = vadd.f32 %v330_v31, %v266_v58  ;;  %v391_v20 = vadd.f32 %v6519_v15, %v351_v53  ;;  %v392_v21 = vadd.f32 %v6519_v15, %v352_v54 }
 0x121   :  { %v306_v1 = vpop.permute.xlu1 %305  ;;  %v399_v14 = vmax.f32 %v383_v4, 0.0  ;;  %v400_v16 = vmax.f32 %v384_v5, 0.0  ;;  %v347_v57 = vadd.f32 %v331_v55, %v267_v36  ;;  %v348_v58 = vadd.f32 %v332_v56, %v268_v37  ;;  %v450_v5 = vld [vmem:[%s7634_s3 + $0x10] sm:$0xff] }
 0x122   :  { %v333_v9 = vmul.f32 %v6540_v44, %v306_v1  ;;  %v334_v10 = vmul.f32 %v6543_v45, %v306_v1  ;;  %v341_v11 = vmul.f32 %v6546_v46, %v306_v1  ;;  %v342_v13 = vmul.f32 %v6549_v47, %v306_v1 }
 0x123   :  { %v385_v17 = vadd.f32 %v6524_v19, %v345_v6  ;;  %v386_v18 = vadd.f32 %v6524_v19, %v346_v8  ;;  %v415_v22 = vadd.f32 %v400_v16, %v399_v14  ;;  %v353_v45 = vadd.f32 %v337_v32, %v6551_v59  ;;  %v451_v6 = vld [vmem:[%s7634_s3 + $0x18] sm:$0xff] }
 0x124   :  { %v407_v46 = vmax.f32 %v391_v20, 0.0  ;;  %v408_v25 = vmax.f32 %v392_v21, 0.0  ;;  %v387_v47 = vadd.f32 %v6537_v34, %v347_v57  ;;  %v388_v33 = vadd.f32 %v6537_v34, %v348_v58 }
 0x125   :  { %v401_v44 = vmax.f32 %v385_v17, 0.0  ;;  %v402_v23 = vmax.f32 %v386_v18, 0.0  ;;  %416 = vadd.xlane.f32.xlu0 %v415_v22  ;;  %v354_v40 = vadd.f32 %v338_v49, %v6553_v60  ;;  %v393_v24 = vadd.f32 %v6524_v19, %v353_v45 }
 0x126   :  { %v349_v15 = vadd.f32 %v333_v9, %v269_v41  ;;  %v427_v36 = vadd.f32 %v408_v25, %v407_v46  ;;  %v403_v37 = vmax.f32 %v387_v47, 0.0  ;;  %v404_v30 = vmax.f32 %v388_v33, 0.0 }
 0x127   :  { %v418_v35 = vadd.f32 %v402_v23, %v401_v44  ;;  %v350_v26 = vadd.f32 %v334_v10, %v270_v42  ;;  %v394_v59 = vadd.f32 %v6524_v19, %v354_v40  ;;  %v409_v27 = vmax.f32 %v393_v24, 0.0 }
 0x128   :  { %v389_v28 = vadd.f32 %v6555_v61, %v349_v15  ;;  %v355_v29 = vadd.f32 %v339_v62, %v6557_v38  ;;  %v421_v31 = vadd.f32 %v404_v30, %v403_v37  ;;  %v356_v60 = vadd.f32 %v340_v63, %v6559_v39 }
 0x129   :  { %419 = vadd.xlane.f32.xlu1 %v418_v35  ;;  %v390_v32 = vadd.f32 %v6555_v61, %v350_v26  ;;  %v357_v49 = vadd.f32 %v341_v11, %v277_v43  ;;  %428 = vadd.xlane.f32.xlu0 %v427_v36  ;;  %v410_v41 = vmax.f32 %v394_v59, 0.0  ;;  %v358_v42 = vadd.f32 %v342_v13, %v6561_v48  ;;  %v449_v48 = vld [vmem:[%s7634_s3 + $0x8] sm:$0xff] }
 0x12a   :  { %v405_v50 = vmax.f32 %v389_v28, 0.0  ;;  %v395_v51 = vadd.f32 %v6537_v34, %v355_v29  ;;  %v396_v19 = vadd.f32 %v6537_v34, %v356_v60  ;;  %v448_v34 = vld [vmem:[%s7634_s3] sm:$0xff]  ;;  %v6297_v4 = vmov 0.0|0.0  }
 0x12b   :  { %v406_v52 = vmax.f32 %v390_v32, 0.0  ;;  %v430_v53 = vadd.f32 %v410_v41, %v409_v27  ;;  %v397_v38 = vadd.f32 %v6555_v61, %v357_v49  ;;  %v398_v55 = vadd.f32 %v6555_v61, %v358_v42  ;;  %4779 = vmatprep.subr.bf16.mxu0 %v6297_v4  ;;  %v4683_v42 = vld [vmem:[%s7635_s4] ss:$0 sm:$0xff]  ;;  %s6303_s4 = smov 48  }
 0x12c   :  { %v411_v54 = vmax.f32 %v395_v51, 0.0  ;;  %v412_v56 = vmax.f32 %v396_v19, 0.0  ;;  %v4780_v61 = vpack.c.bf16 %v449_v48, %v448_v34  ;;  %v4783_v8 = vpack.c.bf16 %v451_v6, %v450_v5 }
 0x12d   :  { %422 = vadd.xlane.f32.xlu1 %v421_v31  ;;  %431 = vadd.xlane.f32.xlu0 %v430_v53  ;;  %v424_v39 = vadd.f32 %v406_v52, %v405_v50  ;;  %v413_v62 = vmax.f32 %v397_v38, 0.0  ;;  %v414_v63 = vmax.f32 %v398_v55, 0.0  ;;  %v7647_v9 = vmov 0.0  }
 0x12e   :  { %v433_v43 = vadd.f32 %v412_v56, %v411_v54  ;;  %4781 = vmatpush3.bf16.msra.mxu0 %v4780_v61  ;;  %4731 = vmatprep.mubr.msk.f32.mxu0 %vm6298_vm0, %v7647_v9  ;;  %v468_v13 = vand.u32 127, %v151_v0 }
 0x12f   :  { %v436_v1 = vadd.f32 %v414_v63, %v413_v62  ;;  %4782 = vmatprep.subr.bf16.mxu0 %v6297_v4  ;;  %4739 = vmatprep.subr.mxu1 %v7647_v9 }
 0x130   :  { %4741 = vmatprep.mubr.msk.f32.mxu1 %vm6298_vm0, %v7647_v9  ;;  %v473_v17 = vadd.s32 4294967288, %v468_v13  ;;  %v480_v18 = vadd.s32 4294967280, %v468_v13  ;;  %v487_v21 = vadd.s32 4294967272, %v468_v13  ;;  %v471_v23 = vsub.s32 %v468_v13, %v6490_v2 }
 0x131   :  { %425 = vadd.xlane.f32.xlu1 %v424_v39  ;;  %434 = vadd.xlane.f32.xlu0 %v433_v43 }
 0x132   :  { %4784 = vmatpush3.bf16.msra.mxu0 %v4783_v8  ;;  %v476_v58 = vsub.s32 %v473_v17, %v6490_v2  ;;  %v483_v45 = vsub.s32 %v480_v18, %v6490_v2  ;;  %v490_v25 = vsub.s32 %v487_v21, %v6490_v2 }
 0x133   :  { %4734 = vmatprep.subr.mxu0 %v7647_v9 }
 0x135   :  { %437 = vadd.xlane.f32.xlu0 %v436_v1 }
 0x1b2   :  { %v417_v10 = vpop.xlane.xlu0 %416 }
 0x1b3   :  { %v440_v0 = vmul.f32 0.00390625, %v417_v10 }
 0x1b5   :  { %v472_v26 = vrot.slane %v440_v0, %v471_v23 }
 0x1b6   :  { %v420_v11 = vpop.xlane.xlu1 %419  ;;  %v429_v14 = vpop.xlane.xlu0 %428 }
 0x1b7   :  { %v441_v22 = vmul.f32 0.00390625, %v420_v11  ;;  %v444_v33 = vmul.f32 0.00390625, %v429_v14 }
 0x1b9   :  { %v477_v24 = vrot.slane %v441_v22, %v476_v58  ;;  %v497_v59 = vrot.slane %v444_v33, %v471_v23 }
 0x1ba   :  { %v423_v16 = vpop.xlane.xlu1 %422  ;;  %v432_v20 = vpop.xlane.xlu0 %431 }
 0x1bb   :  { %v445_v44 = vmul.f32 0.00390625, %v432_v20  ;;  %v442_v46 = vmul.f32 0.00390625, %v423_v16  ;;  %v479_v29 = vsel %vm478_vm1, %v477_v24, %v472_v26  ;;  %v1083_v24 = vld [vmem:[#allocation6] sm:$0xff] }
 0x1bd   :  { %v501_v15 = vrot.slane %v445_v44, %v476_v58  ;;  %v484_v36 = vrot.slane %v442_v46, %v483_v45  ;;  %v589_v58 = vld [vmem:[#allocation2 + $0x8] sm:$0xff]  ;;  %v590_v46 = vld [vmem:[#allocation2 + $0x10] sm:$0xff] }
 0x1be   :  { %v426_v57 = vpop.xlane.xlu1 %425  ;;  %v435_v47 = vpop.xlane.xlu0 %434 }
 0x1bf   :  { %v443_v35 = vmul.f32 0.00390625, %v426_v57  ;;  %v446_v40 = vmul.f32 0.00390625, %v435_v47  ;;  %v502_v31 = vsel %vm478_vm1, %v501_v15, %v497_v59  ;;  %v486_v60 = vsel %vm485_vm2, %v484_v36, %v479_v29  ;;  %v588_v57 = vld [vmem:[#allocation2] sm:$0xff]  ;;  %v1084_v15 = vld [vmem:[#allocation6 + $0x8] sm:$0xff] }
 0x1c0   :  { %v4789_v23 = vpack.c.bf16 %v589_v58, %v588_v57  ;;  %v4792_v36 = vpack.c.bf16 %v1084_v15, %v1083_v24  ;;  %v1169_v59 = vld [vmem:[%s7640_s9 + $0x8] sm:$0xff] }
 0x1c1   :  { %v506_v37 = vrot.slane %v446_v40, %v483_v45  ;;  %v491_v27 = vrot.slane %v443_v35, %v490_v25  ;;  %v1290_v58 = vld [vmem:[#allocation9 + $0x88] sm:$0xff] }
 0x1c2   :  { %v438_v30 = vpop.xlane.xlu0 %437  ;;  %v1322_v24 = vld [vmem:[#allocation9 + $0x188] sm:$0xff] }
 0x1c3   :  { %v447_v28 = vmul.f32 0.00390625, %v438_v30  ;;  %v507_v49 = vsel %vm485_vm2, %v506_v37, %v502_v31  ;;  %v493_v41 = vsel %vm492_vm3, %v491_v27, %v486_v60  ;;  %v1085_v37 = vld [vmem:[#allocation6 + $0x10] sm:$0xff]  ;;  %v1086_v30 = vld [vmem:[#allocation6 + $0x18] sm:$0xff] }
 0x1c4   :  { %v4795_v26 = vpack.c.bf16 %v1086_v30, %v1085_v37  ;;  %v1171_v27 = vld [vmem:[%s7640_s9 + $0x18] sm:$0xff]  ;;  %v1170_v31 = vld [vmem:[%s7640_s9 + $0x10] sm:$0xff]  ;;  %v1321_v37 = vld [vmem:[#allocation9 + $0x180] sm:$0xff] }
 0x1c5   :  { %v511_v32 = vrot.slane %v447_v28, %v490_v25  ;;  %v591_v25 = vld [vmem:[#allocation2 + $0x18] sm:$0xff]  ;;  %v1168_v28 = vld [vmem:[%s7640_s9] sm:$0xff]  ;;  %v4797_v29 = vpack.c.bf16 %v1171_v27, %v1169_v59  ;;  %v1330_v15 = vld [vmem:[#allocation9 + $0x1c8] sm:$0xff] }
 0x1c6   :  { %v4786_v47 = vpack.c.bf16 %v591_v25, %v590_v46  ;;  %v1175_v60 = vld [vmem:[%s7640_s9 + $0x38] sm:$0xff]  ;;  %v1306_v25 = vld [vmem:[#allocation9 + $0x108] sm:$0xff]  ;;  %v1329_v30 = vld [vmem:[#allocation9 + $0x1c0] sm:$0xff] }
 0x1c7   :  { %v512_v50 = vsel %vm492_vm3, %v511_v32, %v507_v49  ;;  %v1173_v32 = vld [vmem:[%s7640_s9 + $0x28] sm:$0xff]  ;;  %v4799_v49 = vpack.c.bf16 %v1170_v31, %v1168_v28 }
 0x1c8   :  { %v6625_v51 = vsel %vm513_vm4, %v512_v50, %v493_v41  ;;  %v4801_v41 = vpack.c.bf16 %v1175_v60, %v1173_v32  ;;  %v1172_v50 = vld [vmem:[%s7640_s9 + $0x20] sm:$0xff]  ;;  %v1338_v59 = vld [vmem:[#allocation9 + $0x208] sm:$0xff] }
 0x1c9   :  { %4732 = vmatmul.mubr.msk.f32.vlgmr.msra.gmra.mrb[0].mxu0 %vm515_vm5, %v6625_v51  ;;  %v1346_v27 = vld [vmem:[#allocation9 + $0x248] sm:$0xff]  ;;  %v1345_v31 = vld [vmem:[#allocation9 + $0x240] sm:$0xff] }
 0x1ca   :  { %4736 = vmatprep.mubr.msk.f32.mxu0 %vm6298_vm0, %v7647_v9  ;;  %v4829_v28 = vpack.c.bf16 %v1346_v27, %v1338_v59  ;;  %v1354_v60 = vld [vmem:[#allocation9 + $0x288] sm:$0xff] }
 0x1cb   :  { %v1498_v27 = vld [vmem:[#allocation9 + $0x708] sm:$0xff] }
 0x29c   :  { %v584_v52 = vpop.f32.mrb[0].mxu0 }
 0x29d   :  { %v585_v19 = vadd.f32 %v4683_v42, %v584_v52  ;;  %v4733_v53 = vpop.f32.mrb[1].mxu0  ;;  %v1177_v42 = vld [vmem:[%s7640_s9 + $0x48] sm:$0xff]  ;;  %v1179_v52 = vld [vmem:[%s7640_s9 + $0x58] sm:$0xff] }
 0x29e   :  { %v4805_v53 = vpack.c.bf16 %v1179_v52, %v1177_v42  ;;  %v1370_v52 = vld [vmem:[#allocation9 + $0x308] sm:$0xff] }
 0x29f   :  { %763 = vrot.lane.b32.xlu0 %v585_v19, %s6300_s21  ;;  %593 = vrot.lane.b32.xlu1 %v585_v19, %s6301_s19 }
 0x2a3   :  { %761 = vrot.lane.b32.xlu1 %v585_v19, %s6302_s14 }
 0x311   :  { %v594_v54 = vpop.permute.xlu1 %593  ;;  %v764_v38 = vpop.permute.xlu0 %763 }
 0x312   :  { %4735 = vmatpush3.xpose.msk.msra.mxu0 %vm595_vm6, %v594_v54  ;;  %v1176_v54 = vld [vmem:[%s7640_s9 + $0x40] sm:$0xff] }
 0x313   :  { %4744 = vmatprep.subr.mxu0 %v7647_v9 }
 0x315   :  { %4737 = vmatmul.mubr.msk.f32.vlgmr.msra.gmra.mrb[2].mxu0 %vm595_vm6, %v585_v19  ;;  %v762_v55 = vpop.permute.xlu1 %761 }
 0x316   :  { %4745 = vmatpush3.xpose.msk.msra.mxu0 %vm595_vm6, %v764_v38  ;;  %4746 = vmatprep.mubr.msk.f32.mxu0 %vm6298_vm0, %v7647_v9  ;;  %v1178_v38 = vld [vmem:[%s7640_s9 + $0x50] sm:$0xff] }
 0x317   :  { %4785 = vmatprep.subr.bf16.mxu0 %v6297_v4 }
 0x319   :  { %4747 = vmatmul.mubr.msk.f32.vlgmr.msra.gmra.mrb[4].mxu0 %vm595_vm6, %v762_v55  ;;  %v4807_v55 = vpack.c.bf16 %v1178_v38, %v1176_v54  ;;  %v1369_v54 = vld [vmem:[#allocation9 + $0x300] sm:$0xff] }
 0x31a   :  { %4758 = vmatprep.mubr.msk.f32.mxu0 %vm6298_vm0, %v7647_v9  ;;  %4787 = vmatpush3.bf16.msra.mxu0 %v4786_v47  ;;  %v1314_v47 = vld [vmem:[#allocation9 + $0x148] sm:$0xff]  ;;  %v1377_v38 = vld [vmem:[#allocation9 + $0x340] sm:$0xff] }
 0x31b   :  { %4791 = vmatprep.subr.bf16.mxu0 %v6297_v4 }
 0x3e8   :  { %v666_v56 = vpop.f32.mrb[2].mxu0 }
 0x3e9   :  { %v4738_v39 = vpop.f32.mrb[3].mxu0  ;;  %v671_v43 = vsel %vm670_vm7, %v666_v56, -inf }
 0x3ea   :  { %672 = vmax.xlane.f32.xlu1 %v671_v43 }
 0x3ec   :  { %v835_v62 = vpop.f32.mrb[4].mxu0 }
 0x3ed   :  { %v4748_v63 = vpop.f32.mrb[5].mxu0  ;;  %v839_v1 = vsel %vm670_vm7, %v835_v62, -inf }
 0x3ee   :  { %840 = vmax.xlane.f32.xlu0 %v839_v1 }
 0x477   :  { %v673_v34 = vpop.xlane.xlu1 %672 }
 0x478   :  { %v674_v48 = vsub.f32 %v666_v56, %v673_v34 }
 0x47a   :  { %v675_v61 = vmul.f32 1.442695, %v674_v48 }
 0x47b   :  { %v841_v5 = vpop.xlane.xlu0 %840 }
 0x47c   :  { %6115 = vpow2.f32 %v675_v61  ;;  %v842_v6 = vsub.f32 %v835_v62, %v841_v5  ;;  %v4695_v62 = vld [vmem:[#allocation4] ss:$0 sm:$0xff]  ;;  %v1181_v61 = vld [vmem:[%s7640_s9 + $0x68] sm:$0xff]  ;;  %v1183_v5 = vld [vmem:[%s7640_s9 + $0x78] sm:$0xff] }
 0x47e   :  { %v843_v8 = vmul.f32 1.442695, %v842_v6  ;;  %v1180_v6 = vld [vmem:[%s7640_s9 + $0x60] sm:$0xff] }
 0x480   :  { %6117 = vpow2.f32 %v843_v8  ;;  %v4809_v8 = vpack.c.bf16 %v1183_v5, %v1181_v61  ;;  %v1401_v5 = vld [vmem:[#allocation9 + $0x400] sm:$0xff] }
 0x486   :  { %v6116_v10 = vpop.eup %6115 }
 0x487   :  { %v677_v11 = vsel %vm670_vm7, %v6116_v10, 0.0 }
 0x488   :  { %678 = vadd.xlane.f32.xlu0 %v677_v11  ;;  %v1274_v11 = vld [vmem:[#allocation9 + $0x8] sm:$0xff] }
 0x48a   :  { %v6118_v13 = vpop.eup %6117 }
 0x48b   :  { %v845_v14 = vsel %vm670_vm7, %v6118_v13, 0.0 }
 0x48c   :  { %846 = vadd.xlane.f32.xlu1 %v845_v14  ;;  %v1276_v14 = vld [vmem:[#allocation9 + $0x18] sm:$0xff] }
 0x49d   :  { %850 = vrot.lane.b32.xlu1 %v585_v19, %s6303_s4 }
 0x49e   :  { %682 = vrot.lane.b32.xlu0 %v585_v19, %s6290_s27 }
 0x515   :  { %v679_v16 = vpop.xlane.xlu0 %678 }
 0x516   :  { %6119 = vrcp.f32 %v679_v16 }
 0x519   :  { %v847_v17 = vpop.xlane.xlu1 %846  ;;  %v683_v18 = vpop.permute.xlu0 %682 }
 0x51a   :  { %6121 = vrcp.f32 %v847_v17  ;;  %4740 = vmatpush3.msk.msra.mxu1 %vm688_vm8, %v683_v18  ;;  %v1284_v17 = vld [vmem:[#allocation9 + $0x58] sm:$0xff]  ;;  %v1273_v18 = vld [vmem:[#allocation9] sm:$0xff] }
 0x51b   :  { %4749 = vmatprep.subr.mxu1 %v7647_v9 }
 0x51d   :  { %v851_v22 = vpop.permute.xlu1 %850 }
 0x520   :  { %v6120_v20 = vpop.eup %6119 }
 0x521   :  { %v681_v21 = vmul.f32 %v6120_v20, %v6116_v10  ;;  %v1182_v10 = vld [vmem:[%s7640_s9 + $0x70] sm:$0xff]  ;;  %v1281_v20 = vld [vmem:[#allocation9 + $0x40] sm:$0xff] }
 0x522   :  { %v4815_v57 = vpack.c.bf16 %v1281_v20, %v1273_v18  ;;  %v1442_v18 = vld [vmem:[#allocation9 + $0x548] sm:$0xff] }
 0x523   :  { %4742 = vmatmul.mubr.msk.f32.vlgmr.msra.gmra.mrb[0].mxu1 %vm684_vm9, %v681_v21  ;;  %v4877_v21 = vpack.c.bf16 %v1284_v17, %v1276_v14  ;;  %v1425_v14 = vld [vmem:[#allocation9 + $0x4c0] sm:$0xff]  ;;  %v1434_v17 = vld [vmem:[#allocation9 + $0x508] sm:$0xff] }
 0x524   :  { %v6122_v44 = vpop.eup %6121  ;;  %4750 = vmatpush3.msk.msra.mxu1 %vm688_vm8, %v851_v22  ;;  %4751 = vmatprep.mubr.msk.f32.mxu1 %vm6298_vm0, %v7647_v9  ;;  %v1298_v22 = vld [vmem:[#allocation9 + $0xc8] sm:$0xff]  ;;  %v4853_v20 = vpack.c.bf16 %v1442_v18, %v1434_v17  ;;  %v1339_v17 = vld [vmem:[#allocation9 + $0x210] sm:$0xff] }
 0x525   :  { %v849_v45 = vmul.f32 %v6122_v44, %v6118_v13  ;;  %4788 = vmatprep.subr.bf16.mxu1 %v6297_v4  ;;  %v1282_v13 = vld [vmem:[#allocation9 + $0x48] sm:$0xff]  ;;  %v4817_v44 = vpack.c.bf16 %v1298_v22, %v1290_v58  ;;  %v1347_v18 = vld [vmem:[#allocation9 + $0x250] sm:$0xff] }
 0x526   :  { %v4813_v16 = vpack.c.bf16 %v1282_v13, %v1274_v11  ;;  %v1417_v13 = vld [vmem:[#allocation9 + $0x480] sm:$0xff]  ;;  %v1450_v22 = vld [vmem:[#allocation9 + $0x588] sm:$0xff] }
 0x527   :  { %4752 = vmatmul.mubr.msk.f32.vlgmr.msra.gmra.mrb[2].mxu1 %vm684_vm9, %v849_v45  ;;  %v1297_v45 = vld [vmem:[#allocation9 + $0xc0] sm:$0xff] }
 0x528   :  { %4790 = vmatpush3.bf16.msra.mxu1 %v4789_v23  ;;  %4765 = vmatprep.mubr.msk.f32.mxu1 %vm6298_vm0, %v7647_v9  ;;  %v1289_v23 = vld [vmem:[#allocation9 + $0x80] sm:$0xff] }
 0x529   :  { %4798 = vmatprep.subr.bf16.mxu1 %v4797_v29  ;;  %v4819_v46 = vpack.c.bf16 %v1297_v45, %v1289_v23  ;;  %v1337_v29 = vld [vmem:[#allocation9 + $0x200] sm:$0xff] }
 0x52a   :  { %v4831_v32 = vpack.c.bf16 %v1345_v31, %v1337_v29  ;;  %v1449_v45 = vld [vmem:[#allocation9 + $0x580] sm:$0xff] }
 0x52b   :  { %v1497_v31 = vld [vmem:[#allocation9 + $0x700] sm:$0xff] }
 0x5f6   :  { %v757_v0 = vpop.f32.mrb[0].mxu1 }
 0x5f7   :  { %v4743_v33 = vpop.f32.mrb[1].mxu1  ;;  %4766 = vmatmul.mubr.msk.f32.vlgmr.msra.gmra.mrb[4].mxu1 %vm595_vm6, %v757_v0  ;;  %v4821_v0 = vpack.c.bf16 %v1314_v47, %v1306_v25  ;;  %v1466_v47 = vld [vmem:[#allocation9 + $0x608] sm:$0xff] }
 0x5f8   :  { %1264 = vmatprep.mubr.f32.mxu1 %v7647_v9  ;;  %4800 = vmatpush1.bf16.msra.mxu1 %v4799_v49  ;;  %v1305_v33 = vld [vmem:[#allocation9 + $0x100] sm:$0xff]  ;;  %v1362_v49 = vld [vmem:[#allocation9 + $0x2c8] sm:$0xff] }
 0x5f9   :  { %4802 = vmatprep.subr.bf16.mxu1 %v4801_v41  ;;  %v4833_v41 = vpack.c.bf16 %v1362_v49, %v1354_v60  ;;  %v4696_v49 = vld [vmem:[#allocation7] ss:$0 sm:$0xff] }
 0x5fa   :  { %v923_v35 = vpop.f32.mrb[2].mxu1 }
 0x5fb   :  { %v4753_v40 = vpop.f32.mrb[3].mxu1  ;;  %4759 = vmatmul.mubr.msk.f32.vlgmr.msra.gmra.mrb[6].mxu0 %vm595_vm6, %v923_v35  ;;  %v1313_v35 = vld [vmem:[#allocation9 + $0x140] sm:$0xff] }
 0x5fc   :  { %4776 = vmatprep.mubr.msk.f32.mxu0 %vm6298_vm0, %v7647_v9  ;;  %4793 = vmatpush3.bf16.msra.mxu0 %v4792_v36  ;;  %v4823_v40 = vpack.c.bf16 %v1313_v35, %v1305_v33  ;;  %v4825_v36 = vpack.c.bf16 %v1330_v15, %v1322_v24  ;;  %v1465_v35 = vld [vmem:[#allocation9 + $0x600] sm:$0xff]  ;;  %v1482_v15 = vld [vmem:[#allocation9 + $0x688] sm:$0xff] }
 0x5fd   :  { %4794 = vmatprep.subr.bf16.mxu0 %v6297_v4  ;;  %v1174_v4 = vld [vmem:[%s7640_s9 + $0x30] sm:$0xff] }
 0x5fe   :  { %v4803_v19 = vpack.c.bf16 %v1174_v4, %v1172_v50  ;;  %v1353_v50 = vld [vmem:[#allocation9 + $0x280] sm:$0xff] }
 0x5ff   :  { %v1361_v4 = vld [vmem:[#allocation9 + $0x2c0] sm:$0xff] }
 0x600   :  { %4796 = vmatpush3.bf16.msra.mxu0 %v4795_v26  ;;  %4804 = vmatpush1.bf16.msra.mxu1 %v4803_v19  ;;  %v4827_v26 = vpack.c.bf16 %v1329_v30, %v1321_v37  ;;  %v4835_v42 = vpack.c.bf16 %v1361_v4, %v1353_v50  ;;  %v1378_v19 = vld [vmem:[#allocation9 + $0x348] sm:$0xff]  ;;  %v1481_v30 = vld [vmem:[#allocation9 + $0x680] sm:$0xff]  ;;  %v1283_v50 = vld [vmem:[#allocation9 + $0x50] sm:$0xff] }
 0x601   :  { %4806 = vmatprep.subr.bf16.mxu1 %v4805_v53  ;;  %4814 = vmatprep.subr.bf16.mxu0 %v4813_v16  ;;  %v4837_v53 = vpack.c.bf16 %v1378_v19, %v1370_v52  ;;  %v4851_v16 = vpack.c.bf16 %v1425_v14, %v1417_v13  ;;  %v1300_v52 = vld [vmem:[#allocation9 + $0xd8] sm:$0xff] }
 0x602   :  { %v1348_v13 = vld [vmem:[#allocation9 + $0x258] sm:$0xff] }
 0x604   :  { %4808 = vmatpush1.bf16.msra.mxu1 %v4807_v55  ;;  %v4839_v55 = vpack.c.bf16 %v1377_v38, %v1369_v54 }
 0x605   :  { %4810 = vmatprep.subr.bf16.mxu1 %v4809_v8 }
 0x6ca   :  { %v1069_v56 = vpop.f32.mrb[4].mxu1 }
 0x6cb   :  { %v4767_v39 = vpop.f32.mrb[5].mxu1 }
 0x6cc   :  { %v1394_v39 = vld [vmem:[#allocation9 + $0x3c8] sm:$0xff] }
 0x6ce   :  { %v996_v43 = vpop.f32.mrb[6].mxu0 }
 0x6cf   :  { %v1070_v63 = vadd.f32 %v1069_v56, %v996_v43  ;;  %v4760_v1 = vpop.f32.mrb[7].mxu0  ;;  %v1386_v56 = vld [vmem:[#allocation9 + $0x388] sm:$0xff] }
 0x6d0   :  { %v4841_v43 = vpack.c.bf16 %v1394_v39, %v1386_v56  ;;  %v1291_v56 = vld [vmem:[#allocation9 + $0x90] sm:$0xff] }
 0x6d1   :  { %v1080_v34 = vadd.f32 %v4695_v62, %v1070_v63  ;;  %v1385_v62 = vld [vmem:[#allocation9 + $0x380] sm:$0xff]  ;;  %v1299_v39 = vld [vmem:[#allocation9 + $0xd0] sm:$0xff] }
 0x6d2   :  { %v1393_v63 = vld [vmem:[#allocation9 + $0x3c0] sm:$0xff] }
 0x6d3   :  { %v1082_v48 = vadd.f32 %v1080_v34, %v6625_v51  ;;  %v4811_v51 = vpack.c.bf16 %v1182_v10, %v1180_v6  ;;  %v4843_v1 = vpack.c.bf16 %v1393_v63, %v1385_v62  ;;  %v1402_v34 = vld [vmem:[#allocation9 + $0x408] sm:$0xff]  ;;  %v1409_v6 = vld [vmem:[#allocation9 + $0x440] sm:$0xff]  ;;  %v1316_v62 = vld [vmem:[#allocation9 + $0x158] sm:$0xff]  ;;  %v4883_v63 = vpack.c.bf16 %v1299_v39, %v1291_v56 }
 0x6d4   :  { %v4847_v8 = vpack.c.bf16 %v1409_v6, %v1401_v5  ;;  %v1418_v10 = vld [vmem:[#allocation9 + $0x488] sm:$0xff]  ;;  %v1332_v5 = vld [vmem:[#allocation9 + $0x1d8] sm:$0xff]  ;;  %v1451_v39 = vld [vmem:[#allocation9 + $0x590] sm:$0xff] }
 0x6d5   :  { %4777 = vmatmul.mubr.msk.f32.vlgmr.msra.gmra.mrb[8].mxu0 %vm515_vm5, %v1082_v48  ;;  %4812 = vmatpush1.bf16.msra.mxu1 %v4811_v51  ;;  %v1410_v48 = vld [vmem:[#allocation9 + $0x448] sm:$0xff] }
 0x6d6   :  { %4878 = vmatprep.subr.bf16.mxu1 %v4877_v21  ;;  %4816 = vmatpush1.bf16.msra.mxu0 %v4815_v57  ;;  %v4845_v61 = vpack.c.bf16 %v1410_v48, %v1402_v34  ;;  %v1426_v51 = vld [vmem:[#allocation9 + $0x4c8] sm:$0xff]  ;;  %v1433_v21 = vld [vmem:[#allocation9 + $0x500] sm:$0xff]  ;;  %v1307_v34 = vld [vmem:[#allocation9 + $0x110] sm:$0xff] }
 0x6d7   :  { %4818 = vmatprep.subr.bf16.mxu0 %v4817_v44  ;;  %v4849_v11 = vpack.c.bf16 %v1426_v51, %v1418_v10  ;;  %v1441_v57 = vld [vmem:[#allocation9 + $0x540] sm:$0xff]  ;;  %v1458_v44 = vld [vmem:[#allocation9 + $0x5c8] sm:$0xff]  ;;  %v1315_v48 = vld [vmem:[#allocation9 + $0x150] sm:$0xff] }
 0x6d8   :  { %v4855_v58 = vpack.c.bf16 %v1441_v57, %v1433_v21  ;;  %v4857_v23 = vpack.c.bf16 %v1458_v44, %v1450_v22  ;;  %v4887_v6 = vpack.c.bf16 %v1315_v48, %v1307_v34  ;;  %v1323_v10 = vld [vmem:[#allocation9 + $0x190] sm:$0xff]  ;;  %v1364_v21 = vld [vmem:[#allocation9 + $0x2d8] sm:$0xff]  ;;  %v4895_v57 = vpack.c.bf16 %v1347_v18, %v1339_v17 }
 0x6d9   :  { %v1331_v51 = vld [vmem:[#allocation9 + $0x1d0] sm:$0xff] }
 0x6da   :  { %4820 = vmatpush1.bf16.msra.mxu0 %v4819_v46  ;;  %v1457_v46 = vld [vmem:[#allocation9 + $0x5c0] sm:$0xff]  ;;  %v4891_v14 = vpack.c.bf16 %v1331_v51, %v1323_v10  ;;  %v1355_v22 = vld [vmem:[#allocation9 + $0x290] sm:$0xff] }
 0x6db   :  { %4822 = vmatprep.subr.bf16.mxu0 %v4821_v0  ;;  %v4859_v25 = vpack.c.bf16 %v1457_v46, %v1449_v45  ;;  %v1474_v0 = vld [vmem:[#allocation9 + $0x648] sm:$0xff]  ;;  %v1363_v44 = vld [vmem:[#allocation9 + $0x2d0] sm:$0xff]  ;;  %v1380_v45 = vld [vmem:[#allocation9 + $0x358] sm:$0xff] }
 0x6dc   :  { %v4861_v33 = vpack.c.bf16 %v1474_v0, %v1466_v47  ;;  %v4899_v46 = vpack.c.bf16 %v1363_v44, %v1355_v22  ;;  %v1371_v47 = vld [vmem:[#allocation9 + $0x310] sm:$0xff]  ;;  %v1516_v22 = vld [vmem:[#allocation9 + $0x798] sm:$0xff] }
 0x6dd   :  { %v1379_v0 = vld [vmem:[#allocation9 + $0x350] sm:$0xff] }
 0x6de   :  { %4824 = vmatpush1.bf16.msra.mxu0 %v4823_v40  ;;  %v1473_v40 = vld [vmem:[#allocation9 + $0x640] sm:$0xff]  ;;  %v1467_v48 = vld [vmem:[#allocation9 + $0x610] sm:$0xff] }
 0x6df   :  { %4826 = vmatprep.subr.bf16.mxu0 %v4825_v36  ;;  %v4863_v24 = vpack.c.bf16 %v1473_v40, %v1465_v35  ;;  %v1490_v36 = vld [vmem:[#allocation9 + $0x6c8] sm:$0xff]  ;;  %v1396_v35 = vld [vmem:[#allocation9 + $0x3d8] sm:$0xff]  ;;  %v4903_v40 = vpack.c.bf16 %v1379_v0, %v1371_v47  ;;  %v1483_v51 = vld [vmem:[#allocation9 + $0x690] sm:$0xff] }
 0x6e0   :  { %v4865_v37 = vpack.c.bf16 %v1490_v36, %v1482_v15  ;;  %v1387_v15 = vld [vmem:[#allocation9 + $0x390] sm:$0xff] }
 0x6e1   :  { %v1395_v36 = vld [vmem:[#allocation9 + $0x3d0] sm:$0xff] }
 0x6e2   :  { %4828 = vmatpush1.bf16.msra.mxu0 %v4827_v26  ;;  %v1489_v26 = vld [vmem:[#allocation9 + $0x6c0] sm:$0xff]  ;;  %v1499_v18 = vld [vmem:[#allocation9 + $0x710] sm:$0xff] }
 0x6e3   :  { %4830 = vmatprep.subr.bf16.mxu0 %v4829_v28  ;;  %v4867_v59 = vpack.c.bf16 %v1489_v26, %v1481_v30  ;;  %v1506_v28 = vld [vmem:[#allocation9 + $0x748] sm:$0xff]  ;;  %v1412_v30 = vld [vmem:[#allocation9 + $0x458] sm:$0xff]  ;;  %v4907_v26 = vpack.c.bf16 %v1395_v36, %v1387_v15  ;;  %v1515_v0 = vld [vmem:[#allocation9 + $0x790] sm:$0xff] }
 0x6e4   :  { %v4869_v29 = vpack.c.bf16 %v1506_v28, %v1498_v27  ;;  %v1403_v27 = vld [vmem:[#allocation9 + $0x410] sm:$0xff]  ;;  %v1280_v15 = vld [vmem:[#allocation9 + $0x38] sm:$0xff] }
 0x6e5   :  { %v1411_v28 = vld [vmem:[#allocation9 + $0x450] sm:$0xff]  ;;  %v1288_v36 = vld [vmem:[#allocation9 + $0x78] sm:$0xff] }
 0x6e6   :  { %4832 = vmatpush1.bf16.msra.mxu0 %v4831_v32  ;;  %v1505_v32 = vld [vmem:[#allocation9 + $0x740] sm:$0xff] }
 0x6e7   :  { %4834 = vmatprep.subr.bf16.mxu0 %v4833_v41  ;;  %v4871_v60 = vpack.c.bf16 %v1505_v32, %v1497_v31  ;;  %v1275_v41 = vld [vmem:[#allocation9 + $0x10] sm:$0xff]  ;;  %v1428_v31 = vld [vmem:[#allocation9 + $0x4d8] sm:$0xff]  ;;  %v4911_v32 = vpack.c.bf16 %v1411_v28, %v1403_v27 }
 0x6e8   :  { %v4879_v54 = vpack.c.bf16 %v1283_v50, %v1275_v41  ;;  %v1427_v41 = vld [vmem:[#allocation9 + $0x4d0] sm:$0xff]  ;;  %v1436_v50 = vld [vmem:[#allocation9 + $0x518] sm:$0xff] }
 0x6ea   :  { %4836 = vmatpush1.bf16.msra.mxu0 %v4835_v42  ;;  %v1292_v42 = vld [vmem:[#allocation9 + $0x98] sm:$0xff] }
 0x6eb   :  { %4838 = vmatprep.subr.bf16.mxu0 %v4837_v53 }
 0x6ee   :  { %4840 = vmatpush1.bf16.msra.mxu0 %v4839_v55  ;;  %v4881_v55 = vpack.c.bf16 %v1300_v52, %v1292_v42 }
 0x6ef   :  { %4842 = vmatprep.subr.bf16.mxu0 %v4841_v43  ;;  %v1308_v43 = vld [vmem:[#allocation9 + $0x118] sm:$0xff] }
 0x6f2   :  { %4844 = vmatpush1.bf16.msra.mxu0 %v4843_v1  ;;  %v4885_v1 = vpack.c.bf16 %v1316_v62, %v1308_v43  ;;  %v1459_v43 = vld [vmem:[#allocation9 + $0x5d0] sm:$0xff]  ;;  %v1468_v62 = vld [vmem:[#allocation9 + $0x618] sm:$0xff] }
 0x6f3   :  { %4846 = vmatprep.subr.bf16.mxu0 %v4845_v61  ;;  %v1324_v61 = vld [vmem:[#allocation9 + $0x198] sm:$0xff] }
 0x6f6   :  { %4848 = vmatpush1.bf16.msra.mxu0 %v4847_v8  ;;  %v4889_v8 = vpack.c.bf16 %v1332_v5, %v1324_v61  ;;  %v1475_v61 = vld [vmem:[#allocation9 + $0x650] sm:$0xff]  ;;  %v1484_v5 = vld [vmem:[#allocation9 + $0x698] sm:$0xff] }
 0x6f7   :  { %4850 = vmatprep.subr.bf16.mxu0 %v4849_v11  ;;  %v1340_v11 = vld [vmem:[#allocation9 + $0x218] sm:$0xff] }
 0x6fa   :  { %4852 = vmatpush1.bf16.msra.mxu0 %v4851_v16  ;;  %v4893_v16 = vpack.c.bf16 %v1348_v13, %v1340_v11  ;;  %v1491_v11 = vld [vmem:[#allocation9 + $0x6d0] sm:$0xff]  ;;  %v1500_v13 = vld [vmem:[#allocation9 + $0x718] sm:$0xff] }
 0x6fb   :  { %4854 = vmatprep.subr.bf16.mxu0 %v4853_v20  ;;  %v1356_v20 = vld [vmem:[#allocation9 + $0x298] sm:$0xff] }
 0x6fe   :  { %4856 = vmatpush1.bf16.msra.mxu0 %v4855_v58  ;;  %v4897_v58 = vpack.c.bf16 %v1364_v21, %v1356_v20  ;;  %v1507_v20 = vld [vmem:[#allocation9 + $0x750] sm:$0xff] }
 0x6ff   :  { %4858 = vmatprep.subr.bf16.mxu0 %v4857_v23  ;;  %v1372_v23 = vld [vmem:[#allocation9 + $0x318] sm:$0xff]  ;;  %v4935_v21 = vpack.c.bf16 %v1507_v20, %v1499_v18  ;;  %v1334_v18 = vld [vmem:[#allocation9 + $0x1e8] sm:$0xff] }
 0x700   :  { %v1328_v20 = vld [vmem:[#allocation9 + $0x1b8] sm:$0xff] }
 0x702   :  { %4860 = vmatpush1.bf16.msra.mxu0 %v4859_v25  ;;  %v4901_v25 = vpack.c.bf16 %v1380_v45, %v1372_v23  ;;  %v1524_v23 = vld [vmem:[#allocation9 + $0x7d8] sm:$0xff]  ;;  %v1513_v45 = vld [vmem:[#allocation9 + $0x780] sm:$0xff] }
 0x703   :  { %4862 = vmatprep.subr.bf16.mxu0 %v4861_v33  ;;  %v1388_v33 = vld [vmem:[#allocation9 + $0x398] sm:$0xff] }
 0x706   :  { %4864 = vmatpush1.bf16.msra.mxu0 %v4863_v24  ;;  %v4905_v24 = vpack.c.bf16 %v1396_v35, %v1388_v33  ;;  %v1523_v33 = vld [vmem:[#allocation9 + $0x7d0] sm:$0xff]  ;;  %v1278_v35 = vld [vmem:[#allocation9 + $0x28] sm:$0xff] }
 0x707   :  { %4866 = vmatprep.subr.bf16.mxu0 %v4865_v37  ;;  %v1404_v37 = vld [vmem:[#allocation9 + $0x418] sm:$0xff] }
 0x70a   :  { %4868 = vmatpush1.bf16.msra.mxu0 %v4867_v59  ;;  %v4909_v59 = vpack.c.bf16 %v1412_v30, %v1404_v37  ;;  %v5005_v30 = vpack.c.bf16 %v1288_v36, %v1280_v15  ;;  %v1341_v15 = vld [vmem:[#allocation9 + $0x220] sm:$0xff] }
 0x70b   :  { %4870 = vmatprep.subr.bf16.mxu0 %v4869_v29  ;;  %v1420_v29 = vld [vmem:[#allocation9 + $0x498] sm:$0xff]  ;;  %v1349_v36 = vld [vmem:[#allocation9 + $0x260] sm:$0xff] }
 0x70e   :  { %4872 = vmatpush1.bf16.msra.mxu0 %v4871_v60  ;;  %v4913_v60 = vpack.c.bf16 %v1428_v31, %v1420_v29  ;;  %v1277_v29 = vld [vmem:[#allocation9 + $0x20] sm:$0xff] }
 0x7a8   :  { %v1163_v4 = vpop.f32.mrb[8].mxu0 }
 0x7a9   :  { %v1164_v19 = vadd.f32 %v4696_v49, %v1163_v4  ;;  %v4778_v53 = vpop.f32.mrb[9].mxu0  ;;  %v1419_v49 = vld [vmem:[#allocation9 + $0x490] sm:$0xff]  ;;  %v1444_v4 = vld [vmem:[#allocation9 + $0x558] sm:$0xff] }
 0x7aa   :  { %v4915_v42 = vpack.c.bf16 %v1427_v41, %v1419_v49  ;;  %v4917_v52 = vpack.c.bf16 %v1444_v4, %v1436_v50  ;;  %v1443_v53 = vld [vmem:[#allocation9 + $0x550] sm:$0xff]  ;;  %v1294_v4 = vld [vmem:[#allocation9 + $0xa8] sm:$0xff] }
 0x7ab   :  { %v1167_v38 = vmax.f32 %v1164_v19, 0.0  ;;  %v1435_v19 = vld [vmem:[#allocation9 + $0x510] sm:$0xff] }
 0x7ac   :  { %v1279_v49 = vld [vmem:[#allocation9 + $0x30] sm:$0xff] }
 0x7ad   :  { %4698 = vmatmul.mubr.msk.f32.vlgmr.msra.gmra.mrb[6].mxu1 %vm1196_vm10, %v1167_v38  ;;  %v1460_v38 = vld [vmem:[#allocation9 + $0x5d8] sm:$0xff]  ;;  %v1287_v41 = vld [vmem:[#allocation9 + $0x70] sm:$0xff] }
 0x7ae   :  { %4880 = vmatpush1.bf16.msra.mxu1 %v4879_v54  ;;  %v1452_v54 = vld [vmem:[#allocation9 + $0x598] sm:$0xff] }
 0x7af   :  { %4882 = vmatprep.subr.bf16.mxu1 %v4881_v55  ;;  %v4919_v55 = vpack.c.bf16 %v1443_v53, %v1435_v19  ;;  %v4921_v56 = vpack.c.bf16 %v1460_v38, %v1452_v54  ;;  %v1304_v19 = vld [vmem:[#allocation9 + $0xf8] sm:$0xff]  ;;  %v5007_v38 = vpack.c.bf16 %v1287_v41, %v1279_v49  ;;  %v1357_v49 = vld [vmem:[#allocation9 + $0x2a0] sm:$0xff] }
 0x7b0   :  { %v1365_v41 = vld [vmem:[#allocation9 + $0x2e0] sm:$0xff] }
 0x7b2   :  { %4884 = vmatpush1.bf16.msra.mxu1 %v4883_v63  ;;  %v1476_v63 = vld [vmem:[#allocation9 + $0x658] sm:$0xff] }
 0x7b3   :  { %4886 = vmatprep.subr.bf16.mxu1 %v4885_v1  ;;  %v4923_v1 = vpack.c.bf16 %v1459_v43, %v1451_v39  ;;  %v4925_v34 = vpack.c.bf16 %v1476_v63, %v1468_v62  ;;  %v1295_v43 = vld [vmem:[#allocation9 + $0xb0] sm:$0xff]  ;;  %v1310_v63 = vld [vmem:[#allocation9 + $0x128] sm:$0xff] }
 0x7b4   :  { %v1303_v62 = vld [vmem:[#allocation9 + $0xf0] sm:$0xff] }
 0x7b6   :  { %4888 = vmatpush1.bf16.msra.mxu1 %v4887_v6  ;;  %v1492_v6 = vld [vmem:[#allocation9 + $0x6d8] sm:$0xff] }
 0x7b7   :  { %4890 = vmatprep.subr.bf16.mxu1 %v4889_v8  ;;  %v4927_v8 = vpack.c.bf16 %v1475_v61, %v1467_v48  ;;  %v4929_v10 = vpack.c.bf16 %v1492_v6, %v1484_v5  ;;  %v1318_v48 = vld [vmem:[#allocation9 + $0x168] sm:$0xff]  ;;  %v1312_v61 = vld [vmem:[#allocation9 + $0x138] sm:$0xff] }
 0x7b8   :  { %v1320_v5 = vld [vmem:[#allocation9 + $0x178] sm:$0xff] }
 0x7ba   :  { %4892 = vmatpush1.bf16.msra.mxu1 %v4891_v14  ;;  %v1508_v14 = vld [vmem:[#allocation9 + $0x758] sm:$0xff] }
 0x7bb   :  { %4894 = vmatprep.subr.bf16.mxu1 %v4893_v16  ;;  %v4931_v16 = vpack.c.bf16 %v1491_v11, %v1483_v51  ;;  %v4933_v17 = vpack.c.bf16 %v1508_v14, %v1500_v13  ;;  %v1317_v51 = vld [vmem:[#allocation9 + $0x160] sm:$0xff]  ;;  %v4949_v11 = vpack.c.bf16 %v1318_v48, %v1310_v63  ;;  %v5013_v13 = vpack.c.bf16 %v1320_v5, %v1312_v61  ;;  %v1311_v14 = vld [vmem:[#allocation9 + $0x130] sm:$0xff]  ;;  %v1390_v61 = vld [vmem:[#allocation9 + $0x3a8] sm:$0xff] }
 0x7bc   :  { %v1383_v48 = vld [vmem:[#allocation9 + $0x370] sm:$0xff]  ;;  %v1398_v5 = vld [vmem:[#allocation9 + $0x3e8] sm:$0xff] }
 0x7be   :  { %4896 = vmatpush1.bf16.msra.mxu1 %v4895_v57  ;;  %v1514_v57 = vld [vmem:[#allocation9 + $0x788] sm:$0xff] }
 0x7bf   :  { %4898 = vmatprep.subr.bf16.mxu1 %v4897_v58  ;;  %v1522_v58 = vld [vmem:[#allocation9 + $0x7c8] sm:$0xff] }
 0x7c0   :  { %v4873_v44 = vpack.c.bf16 %v1522_v58, %v1514_v57 }
 0x7c2   :  { %4900 = vmatpush1.bf16.msra.mxu1 %v4899_v46  ;;  %v1521_v46 = vld [vmem:[#allocation9 + $0x7c0] sm:$0xff]  ;;  %4874 = vmatprep.subr.bf16.mxu0 %v4873_v44 }
 0x7c3   :  { %4902 = vmatprep.subr.bf16.mxu1 %v4901_v25  ;;  %v4937_v25 = vpack.c.bf16 %v1524_v23, %v1516_v22  ;;  %v4875_v47 = vpack.c.bf16 %v1521_v46, %v1513_v45  ;;  %v1325_v22 = vld [vmem:[#allocation9 + $0x1a0] sm:$0xff]  ;;  %v1327_v46 = vld [vmem:[#allocation9 + $0x1b0] sm:$0xff] }
 0x7c4   :  { %v1333_v44 = vld [vmem:[#allocation9 + $0x1e0] sm:$0xff] }
 0x7c5   :  { %4876 = vmatpush1.bf16.msra.mxu0 %v4875_v47  ;;  %v1342_v47 = vld [vmem:[#allocation9 + $0x228] sm:$0xff] }
 0x7c6   :  { %4904 = vmatpush1.bf16.msra.mxu1 %v4903_v40  ;;  %v4939_v40 = vpack.c.bf16 %v1523_v33, %v1515_v0  ;;  %v1350_v0 = vld [vmem:[#allocation9 + $0x268] sm:$0xff]  ;;  %v1344_v33 = vld [vmem:[#allocation9 + $0x238] sm:$0xff] }
 0x7c7   :  { %4906 = vmatprep.subr.bf16.mxu1 %v4905_v24  ;;  %v1286_v24 = vld [vmem:[#allocation9 + $0x68] sm:$0xff] }
 0x7c8   :  { %v4941_v37 = vpack.c.bf16 %v1286_v24, %v1278_v35  ;;  %v1352_v35 = vld [vmem:[#allocation9 + $0x278] sm:$0xff] }
 0x7ca   :  { %4908 = vmatpush1.bf16.msra.mxu1 %v4907_v26  ;;  %4942 = vmatprep.subr.bf16.mxu0 %v4941_v37  ;;  %v1184_v26 = vld [vmem:[%s7641_s10] sm:$0x3]  ;;  %v4957_v37 = vpack.c.bf16 %v1350_v0, %v1342_v47  ;;  %v1407_v47 = vld [vmem:[#allocation9 + $0x430] sm:$0xff] }
 0x7cb   :  { %4910 = vmatprep.subr.bf16.mxu1 %v4909_v59  ;;  %v1189_v59 = vrot.slane %v1184_v26, %v6493_v3  ;;  %v1193_v27 = vrot.slane %v1184_v26, %v6503_v7  ;;  %v1343_v26 = vld [vmem:[#allocation9 + $0x230] sm:$0xff] }
 0x7cc   :  { %v1415_v0 = vld [vmem:[#allocation9 + $0x470] sm:$0xff] }
 0x7ce   :  { %4912 = vmatpush1.bf16.msra.mxu1 %v4911_v32 }
 0x7cf   :  { %4914 = vmatprep.subr.bf16.mxu1 %v4913_v60  ;;  %v1285_v60 = vld [vmem:[#allocation9 + $0x60] sm:$0xff] }
 0x7d0   :  { %v4943_v54 = vpack.c.bf16 %v1285_v60, %v1277_v29  ;;  %v1360_v29 = vld [vmem:[#allocation9 + $0x2b8] sm:$0xff] }
 0x7d2   :  { %4916 = vmatpush1.bf16.msra.mxu1 %v4915_v42  ;;  %v1302_v42 = vld [vmem:[#allocation9 + $0xe8] sm:$0xff] }
 0x7d3   :  { %4918 = vmatprep.subr.bf16.mxu1 %v4917_v52  ;;  %v1296_v52 = vld [vmem:[#allocation9 + $0xb8] sm:$0xff] }
 0x7d6   :  { %4920 = vmatpush1.bf16.msra.mxu1 %v4919_v55  ;;  %v1293_v55 = vld [vmem:[#allocation9 + $0xa0] sm:$0xff] }
 0x7d7   :  { %4922 = vmatprep.subr.bf16.mxu1 %v4921_v56  ;;  %v1301_v56 = vld [vmem:[#allocation9 + $0xe0] sm:$0xff] }
 0x7d8   :  { %v4947_v6 = vpack.c.bf16 %v1301_v56, %v1293_v55  ;;  %v4963_v55 = vpack.c.bf16 %v1365_v41, %v1357_v49 }
 0x7da   :  { %4924 = vmatpush1.bf16.msra.mxu1 %v4923_v1  ;;  %v4945_v1 = vpack.c.bf16 %v1302_v42, %v1294_v4  ;;  %v1359_v42 = vld [vmem:[#allocation9 + $0x2b0] sm:$0xff] }
 0x7db   :  { %4926 = vmatprep.subr.bf16.mxu1 %v4925_v34  ;;  %v5009_v34 = vpack.c.bf16 %v1304_v19, %v1296_v52  ;;  %v1367_v52 = vld [vmem:[#allocation9 + $0x2f0] sm:$0xff]  ;;  %v1374_v19 = vld [vmem:[#allocation9 + $0x328] sm:$0xff] }
 0x7dc   :  { %v5027_v56 = vpack.c.bf16 %v1367_v52, %v1359_v42 }
 0x7de   :  { %4928 = vmatpush1.bf16.msra.mxu1 %v4927_v8  ;;  %v5011_v8 = vpack.c.bf16 %v1303_v62, %v1295_v43  ;;  %v1373_v43 = vld [vmem:[#allocation9 + $0x320] sm:$0xff] }
 0x7df   :  { %4930 = vmatprep.subr.bf16.mxu1 %v4929_v10  ;;  %v1309_v10 = vld [vmem:[#allocation9 + $0x120] sm:$0xff] }
 0x7e0   :  { %v4951_v57 = vpack.c.bf16 %v1317_v51, %v1309_v10  ;;  %v1381_v62 = vld [vmem:[#allocation9 + $0x360] sm:$0xff] }
 0x7e1   :  { %v4967_v10 = vpack.c.bf16 %v1381_v62, %v1373_v43 }
 0x7e2   :  { %4932 = vmatpush1.bf16.msra.mxu1 %v4931_v16  ;;  %v1319_v16 = vld [vmem:[#allocation9 + $0x170] sm:$0xff] }
 0x7e3   :  { %4934 = vmatprep.subr.bf16.mxu1 %v4933_v17  ;;  %v1326_v17 = vld [vmem:[#allocation9 + $0x1a8] sm:$0xff]  ;;  %v5015_v58 = vpack.c.bf16 %v1319_v16, %v1311_v14  ;;  %v4969_v14 = vpack.c.bf16 %v1398_v5, %v1390_v61  ;;  %v1455_v61 = vld [vmem:[#allocation9 + $0x5b0] sm:$0xff] }
 0x7e4   :  { %v4953_v23 = vpack.c.bf16 %v1334_v18, %v1326_v17  ;;  %v1391_v17 = vld [vmem:[#allocation9 + $0x3b0] sm:$0xff] }
 0x7e5   :  { %v1399_v18 = vld [vmem:[#allocation9 + $0x3f0] sm:$0xff] }
 0x7e6   :  { %4936 = vmatpush1.bf16.msra.mxu1 %v4935_v21  ;;  %v1336_v21 = vld [vmem:[#allocation9 + $0x1f8] sm:$0xff]  ;;  %v1463_v5 = vld [vmem:[#allocation9 + $0x5f0] sm:$0xff] }
 0x7e7   :  { %4938 = vmatprep.subr.bf16.mxu1 %v4937_v25  ;;  %v5017_v45 = vpack.c.bf16 %v1336_v21, %v1328_v20  ;;  %v1335_v25 = vld [vmem:[#allocation9 + $0x1f0] sm:$0xff]  ;;  %v1406_v20 = vld [vmem:[#allocation9 + $0x428] sm:$0xff] }
 0x7e8   :  { %v5019_v24 = vpack.c.bf16 %v1335_v25, %v1327_v46  ;;  %v1414_v21 = vld [vmem:[#allocation9 + $0x468] sm:$0xff] }
 0x7e9   :  { %v4973_v46 = vpack.c.bf16 %v1414_v21, %v1406_v20  ;;  %v1471_v20 = vld [vmem:[#allocation9 + $0x630] sm:$0xff] }
 0x7ea   :  { %4940 = vmatpush1.bf16.msra.mxu1 %v4939_v40  ;;  %v4955_v40 = vpack.c.bf16 %v1333_v44, %v1325_v22  ;;  %v5035_v44 = vpack.c.bf16 %v1399_v18, %v1391_v17  ;;  %v1479_v21 = vld [vmem:[#allocation9 + $0x670] sm:$0xff] }
 0x7eb   :  { %5006 = vmatprep.subr.bf16.mxu1 %v5005_v30  ;;  %v5021_v30 = vpack.c.bf16 %v1352_v35, %v1344_v33  ;;  %v1422_v33 = vld [vmem:[#allocation9 + $0x4a8] sm:$0xff] }
 0x7ec   :  { %v1430_v35 = vld [vmem:[#allocation9 + $0x4e8] sm:$0xff] }
 0x880   :  { %v1266_v28 = vpop.f32.mrb[6].mxu1 }
 0x881   :  { %v1267_v31 = vadd.f32 %v1266_v28, %v1189_v59  ;;  %v1268_v32 = vpop.f32.mrb[7].mxu1  ;;  %v1351_v59 = vld [vmem:[#allocation9 + $0x270] sm:$0xff]  ;;  %v1366_v28 = vld [vmem:[#allocation9 + $0x2e8] sm:$0xff] }
 0x882   :  { %v1269_v50 = vadd.f32 %v1268_v32, %v1193_v27  ;;  %v1358_v27 = vld [vmem:[#allocation9 + $0x2a8] sm:$0xff]  ;;  %v4959_v32 = vpack.c.bf16 %v1349_v36, %v1341_v15  ;;  %v5023_v60 = vpack.c.bf16 %v1351_v59, %v1343_v26  ;;  %v5039_v36 = vpack.c.bf16 %v1415_v0, %v1407_v47 }
 0x883   :  { %v6717_v39 = vmax.f32 %v1267_v31, 0.0  ;;  %v1368_v31 = vld [vmem:[#allocation9 + $0x2f8] sm:$0xff]  ;;  %v4977_v26 = vpack.c.bf16 %v1430_v35, %v1422_v33  ;;  %v1487_v33 = vld [vmem:[#allocation9 + $0x6b0] sm:$0xff] }
 0x884   :  { %v1272_v53 = vmax.f32 %v1269_v50, 0.0  ;;  %v4961_v50 = vpack.c.bf16 %v1366_v28, %v1358_v27  ;;  %v5025_v4 = vpack.c.bf16 %v1368_v31, %v1360_v29  ;;  %v1423_v27 = vld [vmem:[#allocation9 + $0x4b0] sm:$0xff]  ;;  %v1438_v29 = vld [vmem:[#allocation9 + $0x528] sm:$0xff] }
 0x885   :  { %v1431_v28 = vld [vmem:[#allocation9 + $0x4f0] sm:$0xff]  ;;  %v1446_v31 = vld [vmem:[#allocation9 + $0x568] sm:$0xff] }
 0x886   :  { %1635 = vmatprep.mubr.f32.mxu0 %v1272_v53  ;;  %1706 = vmatprep.mubr.f32.mxu1 %v1272_v53  ;;  %v5043_v41 = vpack.c.bf16 %v1431_v28, %v1423_v27  ;;  %v4981_v42 = vpack.c.bf16 %v1446_v31, %v1438_v29  ;;  %v1495_v35 = vld [vmem:[#allocation9 + $0x6f0] sm:$0xff] }
 0x887   :  { %1636 = vmatmul.mubr.f32.vlgmr.msra.gmra.mrb[10].mxu0 %v6717_v39  ;;  %1707 = vmatmul.mubr.f32.vlgmr.msra.gmra.mrb[8].mxu1 %v6717_v39  ;;  %v1503_v29 = vld [vmem:[#allocation9 + $0x730] sm:$0xff] }
 0x888   :  { %4944 = vmatpush1.bf16.msra.mxu0 %v4943_v54  ;;  %5008 = vmatpush1.bf16.msra.mxu1 %v5007_v38  ;;  %v1376_v54 = vld [vmem:[#allocation9 + $0x338] sm:$0xff]  ;;  %v1511_v31 = vld [vmem:[#allocation9 + $0x770] sm:$0xff] }
 0x889   :  { %1777 = vmatprep.mubr.f32.mxu0 %v1272_v53  ;;  %1848 = vmatprep.mubr.f32.mxu1 %v1272_v53  ;;  %v1382_v53 = vld [vmem:[#allocation9 + $0x368] sm:$0xff]  ;;  %v1384_v38 = vld [vmem:[#allocation9 + $0x378] sm:$0xff] }
 0x88a   :  { %4946 = vmatprep.subr.bf16.mxu0 %v4945_v1  ;;  %5010 = vmatprep.subr.bf16.mxu1 %v5009_v34  ;;  %v4965_v63 = vpack.c.bf16 %v1382_v53, %v1374_v19  ;;  %v5029_v1 = vpack.c.bf16 %v1384_v38, %v1376_v54  ;;  %v1375_v34 = vld [vmem:[#allocation9 + $0x330] sm:$0xff]  ;;  %v1454_v54 = vld [vmem:[#allocation9 + $0x5a8] sm:$0xff] }
 0x88b   :  { %v5031_v51 = vpack.c.bf16 %v1383_v48, %v1375_v34  ;;  %v1439_v19 = vld [vmem:[#allocation9 + $0x530] sm:$0xff]  ;;  %v1462_v38 = vld [vmem:[#allocation9 + $0x5e8] sm:$0xff] }
 0x88c   :  { %4948 = vmatpush1.bf16.msra.mxu0 %v4947_v6  ;;  %5012 = vmatpush1.bf16.msra.mxu1 %v5011_v8  ;;  %v1392_v6 = vld [vmem:[#allocation9 + $0x3b8] sm:$0xff]  ;;  %v1447_v53 = vld [vmem:[#allocation9 + $0x570] sm:$0xff]  ;;  %v4985_v34 = vpack.c.bf16 %v1462_v38, %v1454_v54 }
 0x88d   :  { %4950 = vmatprep.subr.bf16.mxu0 %v4949_v11  ;;  %5014 = vmatprep.subr.bf16.mxu1 %v5013_v13  ;;  %v1400_v8 = vld [vmem:[#allocation9 + $0x3f8] sm:$0xff]  ;;  %v1389_v11 = vld [vmem:[#allocation9 + $0x3a0] sm:$0xff]  ;;  %v5047_v62 = vpack.c.bf16 %v1447_v53, %v1439_v19  ;;  %v1519_v54 = vld [vmem:[#allocation9 + $0x7b0] sm:$0xff] }
 0x88e   :  { %v1397_v13 = vld [vmem:[#allocation9 + $0x3e0] sm:$0xff]  ;;  %v5033_v16 = vpack.c.bf16 %v1400_v8, %v1392_v6  ;;  %v1470_v6 = vld [vmem:[#allocation9 + $0x628] sm:$0xff]  ;;  %v1527_v38 = vld [vmem:[#allocation9 + $0x7f0] sm:$0xff] }
 0x88f   :  { %v4971_v22 = vpack.c.bf16 %v1397_v13, %v1389_v11  ;;  %v1478_v8 = vld [vmem:[#allocation9 + $0x668] sm:$0xff]  ;;  %v5051_v13 = vpack.c.bf16 %v1463_v5, %v1455_v61 }
 0x890   :  { %4952 = vmatpush1.bf16.msra.mxu0 %v4951_v57  ;;  %5016 = vmatpush1.bf16.msra.mxu1 %v5015_v58  ;;  %v1408_v57 = vld [vmem:[#allocation9 + $0x438] sm:$0xff]  ;;  %v4989_v17 = vpack.c.bf16 %v1478_v8, %v1470_v6  ;;  %v1865_v6 = vld [vmem:[#allocation10 + $0x10] sm:$0xff] }
 0x891   :  { %4954 = vmatprep.subr.bf16.mxu0 %v4953_v23  ;;  %5018 = vmatprep.subr.bf16.mxu1 %v5017_v45  ;;  %v1416_v58 = vld [vmem:[#allocation9 + $0x478] sm:$0xff]  ;;  %v1405_v23 = vld [vmem:[#allocation9 + $0x420] sm:$0xff]  ;;  %v1873_v8 = vld [vmem:[#allocation10 + $0x50] sm:$0xff] }
 0x892   :  { %v1413_v45 = vld [vmem:[#allocation9 + $0x460] sm:$0xff]  ;;  %v5037_v25 = vpack.c.bf16 %v1416_v58, %v1408_v57  ;;  %v1486_v57 = vld [vmem:[#allocation9 + $0x6a8] sm:$0xff] }
 0x893   :  { %v4975_v15 = vpack.c.bf16 %v1413_v45, %v1405_v23  ;;  %v1494_v58 = vld [vmem:[#allocation9 + $0x6e8] sm:$0xff]  ;;  %v5055_v45 = vpack.c.bf16 %v1479_v21, %v1471_v20 }
 0x894   :  { %4956 = vmatpush1.bf16.msra.mxu0 %v4955_v40  ;;  %5020 = vmatpush1.bf16.msra.mxu1 %v5019_v24  ;;  %v1424_v40 = vld [vmem:[#allocation9 + $0x4b8] sm:$0xff]  ;;  %v4993_v47 = vpack.c.bf16 %v1494_v58, %v1486_v57  ;;  %v1881_v57 = vld [vmem:[#allocation10 + $0x90] sm:$0xff] }
 0x895   :  { %4958 = vmatprep.subr.bf16.mxu0 %v4957_v37  ;;  %5022 = vmatprep.subr.bf16.mxu1 %v5021_v30  ;;  %v1432_v24 = vld [vmem:[#allocation9 + $0x4f8] sm:$0xff]  ;;  %v1421_v37 = vld [vmem:[#allocation9 + $0x4a0] sm:$0xff]  ;;  %v1889_v58 = vld [vmem:[#allocation10 + $0xd0] sm:$0xff] }
 0x896   :  { %v1429_v30 = vld [vmem:[#allocation9 + $0x4e0] sm:$0xff]  ;;  %v5041_v59 = vpack.c.bf16 %v1432_v24, %v1424_v40  ;;  %v1502_v40 = vld [vmem:[#allocation9 + $0x728] sm:$0xff] }
 0x897   :  { %v4979_v49 = vpack.c.bf16 %v1429_v30, %v1421_v37  ;;  %v1510_v24 = vld [vmem:[#allocation9 + $0x768] sm:$0xff]  ;;  %v5059_v30 = vpack.c.bf16 %v1495_v35, %v1487_v33 }
 0x898   :  { %4960 = vmatpush1.bf16.msra.mxu0 %v4959_v32  ;;  %5024 = vmatpush1.bf16.msra.mxu1 %v5023_v60  ;;  %v1440_v32 = vld [vmem:[#allocation9 + $0x538] sm:$0xff]  ;;  %v4997_v27 = vpack.c.bf16 %v1510_v24, %v1502_v40  ;;  %v1897_v40 = vld [vmem:[#allocation10 + $0x110] sm:$0xff]  ;;  %v1912_v24 = vld [vmem:[#allocation10 + $0x188] sm:$0xff] }
 0x899   :  { %4962 = vmatprep.subr.bf16.mxu0 %v4961_v50  ;;  %5026 = vmatprep.subr.bf16.mxu1 %v5025_v4  ;;  %v1448_v60 = vld [vmem:[#allocation9 + $0x578] sm:$0xff]  ;;  %v1437_v50 = vld [vmem:[#allocation9 + $0x520] sm:$0xff] }
 0x89a   :  { %v1445_v4 = vld [vmem:[#allocation9 + $0x560] sm:$0xff]  ;;  %v5045_v52 = vpack.c.bf16 %v1448_v60, %v1440_v32  ;;  %v1518_v32 = vld [vmem:[#allocation9 + $0x7a8] sm:$0xff] }
 0x89b   :  { %v4983_v43 = vpack.c.bf16 %v1445_v4, %v1437_v50  ;;  %v1526_v60 = vld [vmem:[#allocation9 + $0x7e8] sm:$0xff]  ;;  %v5063_v4 = vpack.c.bf16 %v1511_v31, %v1503_v29  ;;  %v1913_v31 = vld [vmem:[#allocation10 + $0x190] sm:$0xff] }
 0x89c   :  { %4964 = vmatpush1.bf16.msra.mxu0 %v4963_v55  ;;  %5028 = vmatpush1.bf16.msra.mxu1 %v5027_v56  ;;  %v1456_v55 = vld [vmem:[#allocation9 + $0x5b8] sm:$0xff]  ;;  %v5001_v19 = vpack.c.bf16 %v1526_v60, %v1518_v32  ;;  %v1921_v32 = vld [vmem:[#allocation10 + $0x1d0] sm:$0xff]  ;;  %v1928_v60 = vld [vmem:[#allocation10 + $0x208] sm:$0xff] }
 0x89d   :  { %4966 = vmatprep.subr.bf16.mxu0 %v4965_v63  ;;  %5030 = vmatprep.subr.bf16.mxu1 %v5029_v1  ;;  %v1464_v56 = vld [vmem:[#allocation9 + $0x5f8] sm:$0xff]  ;;  %v1453_v63 = vld [vmem:[#allocation9 + $0x5a0] sm:$0xff] }
 0x89e   :  { %v1461_v1 = vld [vmem:[#allocation9 + $0x5e0] sm:$0xff]  ;;  %v5049_v48 = vpack.c.bf16 %v1464_v56, %v1456_v55  ;;  %v1864_v55 = vld [vmem:[#allocation10 + $0x8] sm:$0xff] }
 0x89f   :  { %v4987_v11 = vpack.c.bf16 %v1461_v1, %v1453_v63  ;;  %v1872_v56 = vld [vmem:[#allocation10 + $0x48] sm:$0xff]  ;;  %v5067_v1 = vpack.c.bf16 %v1527_v38, %v1519_v54  ;;  %v1929_v38 = vld [vmem:[#allocation10 + $0x210] sm:$0xff] }
 0x8a0   :  { %4968 = vmatpush1.bf16.msra.mxu0 %v4967_v10  ;;  %5032 = vmatpush1.bf16.msra.mxu1 %v5031_v51  ;;  %v1472_v10 = vld [vmem:[#allocation9 + $0x638] sm:$0xff]  ;;  %v6721_v61 = vpack.c.bf16 %v1872_v56, %v1864_v55  ;;  %v1937_v55 = vld [vmem:[#allocation10 + $0x250] sm:$0xff]  ;;  %v1944_v56 = vld [vmem:[#allocation10 + $0x288] sm:$0xff] }
 0x8a1   :  { %4970 = vmatprep.subr.bf16.mxu0 %v4969_v14  ;;  %5034 = vmatprep.subr.bf16.mxu1 %v5033_v16  ;;  %v1480_v51 = vld [vmem:[#allocation9 + $0x678] sm:$0xff]  ;;  %v1469_v14 = vld [vmem:[#allocation9 + $0x620] sm:$0xff] }
 0x8a2   :  { %v1477_v16 = vld [vmem:[#allocation9 + $0x660] sm:$0xff]  ;;  %v5053_v18 = vpack.c.bf16 %v1480_v51, %v1472_v10  ;;  %v1880_v10 = vld [vmem:[#allocation10 + $0x88] sm:$0xff] }
 0x8a3   :  { %v4991_v23 = vpack.c.bf16 %v1477_v16, %v1469_v14  ;;  %v1888_v51 = vld [vmem:[#allocation10 + $0xc8] sm:$0xff]  ;;  %v6727_v16 = vpack.c.bf16 %v1873_v8, %v1865_v6  ;;  %v1951_v6 = vld [vmem:[#allocation10 + $0x2c0] sm:$0xff] }
 0x8a4   :  { %4972 = vmatpush1.bf16.msra.mxu0 %v4971_v22  ;;  %5036 = vmatpush1.bf16.msra.mxu1 %v5035_v44  ;;  %v1488_v22 = vld [vmem:[#allocation9 + $0x6b8] sm:$0xff]  ;;  %v6731_v20 = vpack.c.bf16 %v1888_v51, %v1880_v10  ;;  %v1945_v51 = vld [vmem:[#allocation10 + $0x290] sm:$0xff] }
 0x8a5   :  { %4974 = vmatprep.subr.bf16.mxu0 %v4973_v46  ;;  %5038 = vmatprep.subr.bf16.mxu1 %v5037_v25  ;;  %v1496_v44 = vld [vmem:[#allocation9 + $0x6f8] sm:$0xff]  ;;  %v1485_v46 = vld [vmem:[#allocation9 + $0x6a0] sm:$0xff] }
 0x8a6   :  { %v1493_v25 = vld [vmem:[#allocation9 + $0x6e0] sm:$0xff]  ;;  %v5057_v0 = vpack.c.bf16 %v1496_v44, %v1488_v22  ;;  %v1896_v22 = vld [vmem:[#allocation10 + $0x108] sm:$0xff] }
 0x8a7   :  { %v4995_v37 = vpack.c.bf16 %v1493_v25, %v1485_v46  ;;  %v1904_v44 = vld [vmem:[#allocation10 + $0x148] sm:$0xff]  ;;  %v6741_v25 = vpack.c.bf16 %v1889_v58, %v1881_v57  ;;  %v1970_v57 = vld [vmem:[#allocation10 + $0x358] sm:$0xff] }
 0x8a8   :  { %4976 = vmatpush1.bf16.msra.mxu0 %v4975_v15  ;;  %5040 = vmatpush1.bf16.msra.mxu1 %v5039_v36  ;;  %v1504_v15 = vld [vmem:[#allocation9 + $0x738] sm:$0xff]  ;;  %v6745_v33 = vpack.c.bf16 %v1904_v44, %v1896_v22  ;;  %v1959_v44 = vld [vmem:[#allocation10 + $0x300] sm:$0xff] }
 0x8a9   :  { %4978 = vmatprep.subr.bf16.mxu0 %v4977_v26  ;;  %5042 = vmatprep.subr.bf16.mxu1 %v5041_v59  ;;  %v1512_v36 = vld [vmem:[#allocation9 + $0x778] sm:$0xff]  ;;  %v1501_v26 = vld [vmem:[#allocation9 + $0x720] sm:$0xff]  ;;  %7751 = vst [vmem:[#allocation21_spill] sm:$0xff] %v6741_v25 }
 0x8aa   :  { %v1509_v59 = vld [vmem:[#allocation9 + $0x760] sm:$0xff]  ;;  %v5061_v28 = vpack.c.bf16 %v1512_v36, %v1504_v15  ;;  %7752 = vst [vmem:[#allocation22_spill] sm:$0xff] %v6745_v33  ;;  %v1920_v15 = vld [vmem:[#allocation10 + $0x1c8] sm:$0xff]  ;;  %v1914_v36 = vld [vmem:[#allocation10 + $0x198] sm:$0xff] }
 0x8ab   :  { %v4999_v50 = vpack.c.bf16 %v1509_v59, %v1501_v26  ;;  %v1911_v59 = vld [vmem:[#allocation10 + $0x180] sm:$0xff] }
 0x8ac   :  { %4980 = vmatpush1.bf16.msra.mxu0 %v4979_v49  ;;  %5044 = vmatpush1.bf16.msra.mxu1 %v5043_v41  ;;  %v1520_v49 = vld [vmem:[#allocation9 + $0x7b8] sm:$0xff] }
 0x8ad   :  { %4982 = vmatprep.subr.bf16.mxu0 %v4981_v42  ;;  %5046 = vmatprep.subr.bf16.mxu1 %v5045_v52  ;;  %v1528_v41 = vld [vmem:[#allocation9 + $0x7f8] sm:$0xff]  ;;  %v1517_v42 = vld [vmem:[#allocation9 + $0x7a0] sm:$0xff] }
 0x8ae   :  { %v1525_v52 = vld [vmem:[#allocation9 + $0x7e0] sm:$0xff]  ;;  %v5065_v53 = vpack.c.bf16 %v1528_v41, %v1520_v49  ;;  %v1936_v49 = vld [vmem:[#allocation10 + $0x248] sm:$0xff]  ;;  %v1930_v41 = vld [vmem:[#allocation10 + $0x218] sm:$0xff] }
 0x8af   :  { %v5003_v63 = vpack.c.bf16 %v1525_v52, %v1517_v42  ;;  %v6767_v42 = vpack.c.bf16 %v1921_v32, %v1913_v31  ;;  %v1927_v52 = vld [vmem:[#allocation10 + $0x200] sm:$0xff] }
 0x8b0   :  { %4984 = vmatpush1.bf16.msra.mxu0 %v4983_v43  ;;  %5048 = vmatpush1.bf16.msra.mxu1 %v5047_v62  ;;  %v1866_v43 = vld [vmem:[#allocation10 + $0x18] sm:$0xff]  ;;  %v1975_v31 = vld [vmem:[#allocation10 + $0x380] sm:$0xff] }
 0x8b1   :  { %4986 = vmatprep.subr.bf16.mxu0 %v4985_v34  ;;  %5050 = vmatprep.subr.bf16.mxu1 %v5049_v48  ;;  %v1874_v62 = vld [vmem:[#allocation10 + $0x58] sm:$0xff]  ;;  %v1863_v34 = vld [vmem:[#allocation10] sm:$0xff]  ;;  %7759 = vst [vmem:[#allocation29_spill] sm:$0xff] %v6767_v42 }
 0x8b2   :  { %v1871_v48 = vld [vmem:[#allocation10 + $0x40] sm:$0xff]  ;;  %v6723_v5 = vpack.c.bf16 %v1874_v62, %v1866_v43  ;;  %v1952_v43 = vld [vmem:[#allocation10 + $0x2c8] sm:$0xff]  ;;  %v1946_v62 = vld [vmem:[#allocation10 + $0x298] sm:$0xff] }
 0x8b3   :  { %v6725_v14 = vpack.c.bf16 %v1871_v48, %v1863_v34  ;;  %v6779_v34 = vpack.c.bf16 %v1937_v55, %v1929_v38  ;;  %v1943_v48 = vld [vmem:[#allocation10 + $0x280] sm:$0xff]  ;;  %v6783_v8 = vpack.c.bf16 %v1952_v43, %v1944_v56  ;;  %v1876_v38 = vld [vmem:[#allocation10 + $0x68] sm:$0xff]  ;;  %v1870_v55 = vld [vmem:[#allocation10 + $0x38] sm:$0xff] }
 0x8b4   :  { %4988 = vmatpush1.bf16.msra.mxu0 %v4987_v11  ;;  %5052 = vmatpush1.bf16.msra.mxu1 %v5051_v13  ;;  %v1882_v11 = vld [vmem:[#allocation10 + $0x98] sm:$0xff]  ;;  %v6789_v58 = vpack.c.bf16 %v1951_v6, %v1943_v48  ;;  %v1983_v32 = vld [vmem:[#allocation10 + $0x3c0] sm:$0xff] }
 0x8b5   :  { %4990 = vmatprep.subr.bf16.mxu0 %v4989_v17  ;;  %5054 = vmatprep.subr.bf16.mxu1 %v5053_v18  ;;  %v1890_v13 = vld [vmem:[#allocation10 + $0xd8] sm:$0xff]  ;;  %v1879_v17 = vld [vmem:[#allocation10 + $0x80] sm:$0xff]  ;;  %7763 = vst [vmem:[#allocation33_spill] sm:$0xff] %v6779_v34  ;;  %7764 = vst [vmem:[#allocation34_spill] sm:$0xff] %v6783_v8 }
 0x8b6   :  { %v1887_v18 = vld [vmem:[#allocation10 + $0xc0] sm:$0xff]  ;;  %v6733_v21 = vpack.c.bf16 %v1890_v13, %v1882_v11  ;;  %v1953_v11 = vld [vmem:[#allocation10 + $0x2d0] sm:$0xff]  ;;  %v1960_v13 = vld [vmem:[#allocation10 + $0x308] sm:$0xff] }
 0x8b7   :  { %v6739_v46 = vpack.c.bf16 %v1887_v18, %v1879_v17  ;;  %v1968_v17 = vld [vmem:[#allocation10 + $0x348] sm:$0xff]  ;;  %v1962_v18 = vld [vmem:[#allocation10 + $0x318] sm:$0xff]  ;;  %v6791_v22 = vpack.c.bf16 %v1953_v11, %v1945_v51  ;;  %v1867_v6 = vld [vmem:[#allocation10 + $0x20] sm:$0xff] }
 0x8b8   :  { %4992 = vmatpush1.bf16.msra.mxu0 %v4991_v23  ;;  %5056 = vmatpush1.bf16.msra.mxu1 %v5055_v45  ;;  %v1898_v23 = vld [vmem:[#allocation10 + $0x118] sm:$0xff]  ;;  %v1875_v51 = vld [vmem:[#allocation10 + $0x60] sm:$0xff]  ;;  %v1869_v11 = vld [vmem:[#allocation10 + $0x30] sm:$0xff] }
 0x8b9   :  { %4994 = vmatprep.subr.bf16.mxu0 %v4993_v47  ;;  %5058 = vmatprep.subr.bf16.mxu1 %v5057_v0  ;;  %v1906_v45 = vld [vmem:[#allocation10 + $0x158] sm:$0xff]  ;;  %v1895_v47 = vld [vmem:[#allocation10 + $0x100] sm:$0xff]  ;;  %7766 = vst [vmem:[#allocation36_spill] sm:$0xff] %v6791_v22 }
 0x8ba   :  { %v1903_v0 = vld [vmem:[#allocation10 + $0x140] sm:$0xff]  ;;  %v6747_v35 = vpack.c.bf16 %v1906_v45, %v1898_v23  ;;  %v6795_v23 = vpack.c.bf16 %v1968_v17, %v1960_v13  ;;  %v6797_v45 = vpack.c.bf16 %v1970_v57, %v1962_v18  ;;  %v1878_v56 = vld [vmem:[#allocation10 + $0x78] sm:$0xff]  ;;  %v1877_v13 = vld [vmem:[#allocation10 + $0x70] sm:$0xff] }
 0x8bb   :  { %v1884_v17 = vld [vmem:[#allocation10 + $0xa8] sm:$0xff] }
 0x8bc   :  { %4996 = vmatpush1.bf16.msra.mxu0 %v4995_v37  ;;  %5060 = vmatpush1.bf16.msra.mxu1 %v5059_v30  ;;  %7753 = vst [vmem:[#allocation23_spill] sm:$0xff] %v6747_v35  ;;  %v1922_v37 = vld [vmem:[#allocation10 + $0x1d8] sm:$0xff]  ;;  %v6753_v30 = vpack.c.bf16 %v1903_v0, %v1895_v47  ;;  %v1967_v47 = vld [vmem:[#allocation10 + $0x340] sm:$0xff]  ;;  %v1961_v0 = vld [vmem:[#allocation10 + $0x310] sm:$0xff] }
 0x8bd   :  { %4998 = vmatprep.subr.bf16.mxu0 %v4997_v27  ;;  %5062 = vmatprep.subr.bf16.mxu1 %v5061_v28  ;;  %v1919_v27 = vld [vmem:[#allocation10 + $0x1c0] sm:$0xff]  ;;  %v6759_v28 = vpack.c.bf16 %v1920_v15, %v1912_v24  ;;  %v6761_v29 = vpack.c.bf16 %v1922_v37, %v1914_v36  ;;  %v1976_v15 = vld [vmem:[#allocation10 + $0x388] sm:$0xff]  ;;  %v1978_v37 = vld [vmem:[#allocation10 + $0x398] sm:$0xff] }
 0x8be   :  { %7754 = vst [vmem:[#allocation24_spill] sm:$0xff] %v6753_v30  ;;  %v1984_v36 = vld [vmem:[#allocation10 + $0x3c8] sm:$0xff] }
 0x8bf   :  { %7756 = vst [vmem:[#allocation26_spill] sm:$0xff] %v6759_v28  ;;  %7757 = vst [vmem:[#allocation27_spill] sm:$0xff] %v6761_v29 }
 0x8c0   :  { %5000 = vmatpush1.bf16.msra.mxu0 %v4999_v50  ;;  %5064 = vmatpush1.bf16.msra.mxu1 %v5063_v4  ;;  %v1938_v50 = vld [vmem:[#allocation10 + $0x258] sm:$0xff]  ;;  %v6765_v4 = vpack.c.bf16 %v1919_v27, %v1911_v59  ;;  %v6807_v59 = vpack.c.bf16 %v1984_v36, %v1976_v15 }
 0x8c1   :  { %5002 = vmatprep.subr.bf16.mxu0 %v5001_v19  ;;  %5066 = vmatprep.subr.bf16.mxu1 %v5065_v53  ;;  %v1935_v19 = vld [vmem:[#allocation10 + $0x240] sm:$0xff]  ;;  %v6771_v53 = vpack.c.bf16 %v1936_v49, %v1928_v60  ;;  %v6773_v54 = vpack.c.bf16 %v1938_v50, %v1930_v41  ;;  %v1986_v27 = vld [vmem:[#allocation10 + $0x3d8] sm:$0xff]  ;;  %v1977_v49 = vld [vmem:[#allocation10 + $0x390] sm:$0xff] }
 0x8c2   :  { %7758 = vst [vmem:[#allocation28_spill] sm:$0xff] %v6765_v4  ;;  %v6809_v60 = vpack.c.bf16 %v1986_v27, %v1978_v37  ;;  %v1985_v41 = vld [vmem:[#allocation10 + $0x3d0] sm:$0xff]  ;;  %v1868_v50 = vld [vmem:[#allocation10 + $0x28] sm:$0xff]  ;;  %v6840_v37 = vpack.c.bf16 %v1875_v51, %v1867_v6  ;;  %v6842_v27 = vpack.c.bf16 %v1877_v13, %v1869_v11  ;;  %v1899_v11 = vld [vmem:[#allocation10 + $0x120] sm:$0xff] }
 0x8c3   :  { %7760 = vst [vmem:[#allocation30_spill] sm:$0xff] %v6771_v53  ;;  %7761 = vst [vmem:[#allocation31_spill] sm:$0xff] %v6773_v54  ;;  %v6819_v43 = vpack.c.bf16 %v1876_v38, %v1868_v50  ;;  %v1885_v38 = vld [vmem:[#allocation10 + $0xb0] sm:$0xff]  ;;  %v1907_v13 = vld [vmem:[#allocation10 + $0x160] sm:$0xff] }
 0x8c4   :  { %5004 = vmatpush1.bf16.msra.mxu0 %v5003_v63  ;;  %5068 = vmatpush1.bf16.msra.mxu1 %v5067_v1  ;;  %v1954_v63 = vld [vmem:[#allocation10 + $0x2d8] sm:$0xff]  ;;  %v6777_v1 = vpack.c.bf16 %v1935_v19, %v1927_v52  ;;  %v6813_v52 = vpack.c.bf16 %v1983_v32, %v1975_v31  ;;  %v6815_v19 = vpack.c.bf16 %v1985_v41, %v1977_v49  ;;  %v1883_v31 = vld [vmem:[#allocation10 + $0xa0] sm:$0xff] }
 0x8c5   :  { %5070 = vmatprep.subr.bf16.mxu0 %v6721_v61  ;;  %5102 = vmatprep.subr.bf16.mxu1 %v6723_v5  ;;  %v6785_v10 = vpack.c.bf16 %v1954_v63, %v1946_v62  ;;  %v6821_v62 = vpack.c.bf16 %v1878_v56, %v1870_v55  ;;  %v6830_v63 = vld [vmem:[%s7643_s12] sm:$0xff]  ;;  %v1893_v55 = vld [vmem:[#allocation10 + $0xf0] sm:$0xff]  ;;  %v1900_v56 = vld [vmem:[#allocation10 + $0x128] sm:$0xff] }
 0x8c6   :  { %7762 = vst [vmem:[#allocation32_spill] sm:$0xff] %v6777_v1  ;;  %v1534_v48 = vrot.slane %v6830_v63, %v6493_v3  ;;  %v1891_v32 = vld [vmem:[#allocation10 + $0xe0] sm:$0xff]  ;;  %v6856_v51 = vpack.c.bf16 %v1893_v55, %v1885_v38  ;;  %v1924_v3 = vld [vmem:[#allocation10 + $0x1e8] sm:$0xff] }
 0x8c7   :  { %1778 = vmatmul.mubr.f32.vlgmr.msra.gmra.mrb[12].mxu0 %v6717_v39  ;;  %1849 = vmatmul.mubr.f32.vlgmr.msra.gmra.mrb[10].mxu1 %v6717_v39  ;;  %v1905_v39 = vld [vmem:[#allocation10 + $0x150] sm:$0xff]  ;;  %7765 = vst [vmem:[#allocation35_spill] sm:$0xff] %v6785_v10  ;;  %v6854_v6 = vpack.c.bf16 %v1891_v32, %v1883_v31  ;;  %v7776_v31 = vmov 0.0   ;;  %v6868_v32 = vpack.c.bf16 %v1907_v13, %v1899_v11  ;;  %v1923_v55 = vld [vmem:[#allocation10 + $0x1e0] sm:$0xff] }
 0x8c8   :  { %5072 = vmatpush1.bf16.msra.mxu0 %v6725_v14  ;;  %5104 = vmatpush1.bf16.msra.mxu1 %v6727_v16  ;;  %v6755_v26 = vpack.c.bf16 %v1905_v39, %v1897_v40  ;;  %v1969_v40 = vld [vmem:[#allocation10 + $0x350] sm:$0xff]  ;;  %v6801_v39 = vpack.c.bf16 %v1967_v47, %v1959_v44  ;;  %v1892_v44 = vld [vmem:[#allocation10 + $0xe8] sm:$0xff]  ;;  %v1886_v47 = vld [vmem:[#allocation10 + $0xb8] sm:$0xff]  ;;  %7773 = vst [vmem:[#allocation43_spill] sm:$0xff] %v6856_v51 }
 0x8c9   :  { %5074 = vmatprep.subr.bf16.mxu0 %v6731_v20  ;;  %5106 = vmatprep.subr.bf16.mxu1 %v6733_v21  ;;  %v6803_v24 = vpack.c.bf16 %v1969_v40, %v1961_v0  ;;  %v1894_v0 = vld [vmem:[#allocation10 + $0xf8] sm:$0xff]  ;;  %v6846_v41 = vpack.c.bf16 %v1892_v44, %v1884_v17  ;;  %7772 = vst [vmem:[#allocation42_spill] sm:$0xff] %v6854_v6  ;;  %7777 = vst [vmem:[#allocation46_spill] sm:$0xff] %v6868_v32 }
 0x8ca   :  { %2097 = vmatprep.mubr.f32.mxu0 %v7647_v9  ;;  %2168 = vmatprep.mubr.f32.mxu1 %v7647_v9  ;;  %7755 = vst [vmem:[#allocation25_spill] sm:$0xff] %v6755_v26  ;;  %v6848_v50 = vpack.c.bf16 %v1894_v0, %v1886_v47  ;;  %v1910_v9 = vld [vmem:[#allocation10 + $0x178] sm:$0xff]  ;;  %v1901_v47 = vld [vmem:[#allocation10 + $0x130] sm:$0xff] }
 0x8cb   :  { %7767 = vst [vmem:[#allocation37_spill] sm:$0xff] %v6803_v24  ;;  %7770 = vst [vmem:[#allocation40_spill] sm:$0xff] %v6846_v41  ;;  %v1909_v0 = vld [vmem:[#allocation10 + $0x170] sm:$0xff] }
 0x8cc   :  { %5076 = vmatpush1.bf16.msra.mxu0 %v6739_v46  ;;  %5108 = vmatpush1.bf16.msra.mxu1 %v6741_v25  ;;  %7771 = vst [vmem:[#allocation41_spill] sm:$0xff] %v6848_v50  ;;  %v6870_v38 = vpack.c.bf16 %v1909_v0, %v1901_v47  ;;  %v1931_v47 = vld [vmem:[#allocation10 + $0x220] sm:$0xff] }
 0x8cd   :  { %5078 = vmatprep.subr.bf16.mxu0 %v6745_v33  ;;  %5110 = vmatprep.subr.bf16.mxu1 %v6747_v35  ;;  %v1939_v0 = vld [vmem:[#allocation10 + $0x260] sm:$0xff] }
 0x8ce   :  { %7778 = vst [vmem:[#allocation47_spill] sm:$0xff] %v6870_v38 }
 0x8d0   :  { %5080 = vmatpush1.bf16.msra.mxu0 %v6753_v30  ;;  %5112 = vmatpush1.bf16.msra.mxu1 %v6755_v26 }
 0x8d1   :  { %5082 = vmatprep.subr.bf16.mxu0 %v6759_v28  ;;  %5114 = vmatprep.subr.bf16.mxu1 %v6761_v29 }
 0x8d4   :  { %5084 = vmatpush1.bf16.msra.mxu0 %v6765_v4  ;;  %5116 = vmatpush1.bf16.msra.mxu1 %v6767_v42 }
 0x8d5   :  { %5086 = vmatprep.subr.bf16.mxu0 %v6771_v53  ;;  %5118 = vmatprep.subr.bf16.mxu1 %v6773_v54 }
 0x8d8   :  { %5088 = vmatpush1.bf16.msra.mxu0 %v6777_v1  ;;  %5120 = vmatpush1.bf16.msra.mxu1 %v6779_v34 }
 0x8d9   :  { %5090 = vmatprep.subr.bf16.mxu0 %v6783_v8  ;;  %5122 = vmatprep.subr.bf16.mxu1 %v6785_v10 }
 0x8dc   :  { %5092 = vmatpush1.bf16.msra.mxu0 %v6789_v58  ;;  %5124 = vmatpush1.bf16.msra.mxu1 %v6791_v22 }
 0x8dd   :  { %5094 = vmatprep.subr.bf16.mxu0 %v6795_v23  ;;  %5126 = vmatprep.subr.bf16.mxu1 %v6797_v45 }
 0x8e0   :  { %5096 = vmatpush1.bf16.msra.mxu0 %v6801_v39  ;;  %5128 = vmatpush1.bf16.msra.mxu1 %v6803_v24 }
 0x8e1   :  { %5098 = vmatprep.subr.bf16.mxu0 %v6807_v59  ;;  %5130 = vmatprep.subr.bf16.mxu1 %v6809_v60 }
 0x8e4   :  { %5100 = vmatpush1.bf16.msra.mxu0 %v6813_v52  ;;  %5132 = vmatpush1.bf16.msra.mxu1 %v6815_v19 }
 0x8e5   :  { %5134 = vmatprep.subr.bf16.mxu0 %v6819_v43  ;;  %5166 = vmatprep.subr.bf16.mxu1 %v6821_v62 }
 0x95a   :  { %v1637_v18 = vpop.f32.mrb[10].mxu0  ;;  %v6834_v57 = vpop.f32.mrb[8].mxu1 }
 0x95b   :  { %7768 = vst [vmem:[#allocation38_spill] sm:$0xff] %v6834_v57  ;;  %v1638_v40 = vadd.f32 %v1637_v18, %v1534_v48  ;;  %v6836_v15 = vpop.f32.mrb[11].mxu0  ;;  %v6838_v36 = vpop.f32.mrb[9].mxu1  ;;  %v1908_v48 = vld [vmem:[#allocation10 + $0x168] sm:$0xff]  ;;  %v1902_v18 = vld [vmem:[#allocation10 + $0x138] sm:$0xff] }
 0x95c   :  { %7769 = vst [vmem:[#allocation39_spill] sm:$0xff] %v6838_v36  ;;  %v6860_v17 = vpack.c.bf16 %v1908_v48, %v1900_v56  ;;  %v6862_v44 = vpack.c.bf16 %v1910_v9, %v1902_v18  ;;  %v1918_v36 = vld [vmem:[#allocation10 + $0x1b8] sm:$0xff]  ;;  %v1915_v9 = vld [vmem:[#allocation10 + $0x1a0] sm:$0xff]  ;;  %v1917_v18 = vld [vmem:[#allocation10 + $0x1b0] sm:$0xff] }
 0x95d   :  { %v6844_v49 = vmax.f32 %v1638_v40, 0.0  ;;  %v1916_v40 = vld [vmem:[#allocation10 + $0x1a8] sm:$0xff]  ;;  %v1926_v57 = vld [vmem:[#allocation10 + $0x1f8] sm:$0xff]  ;;  %v6880_v11 = vpack.c.bf16 %v1923_v55, %v1915_v9  ;;  %v6882_v13 = vpack.c.bf16 %v1925_v12, %v1917_v18  ;;  %v6892_v12 = vpack.c.bf16 %v1939_v0, %v1931_v47  ;;  %v1947_v55 = vld [vmem:[#allocation10 + $0x2a0] sm:$0xff] }
 0x95e   :  { %7774 = vst [vmem:[#allocation44_spill] sm:$0xff] %v6860_v17  ;;  %7775 = vst [vmem:[#allocation45_spill] sm:$0xff] %v6862_v44  ;;  %v6874_v56 = vpack.c.bf16 %v1924_v3, %v1916_v40  ;;  %v6876_v48 = vpack.c.bf16 %v1926_v57, %v1918_v36  ;;  %v1933_v36 = vld [vmem:[#allocation10 + $0x230] sm:$0xff]  ;;  %v1955_v18 = vld [vmem:[#allocation10 + $0x2e0] sm:$0xff] }
 0x95f   :  { %2098 = vmatmul.mubr.f32.vlgmr.msra.gmra.mrb[14].mxu0 %v6844_v49  ;;  %2169 = vmatmul.mubr.f32.vlgmr.msra.gmra.mrb[12].mxu1 %v6844_v49  ;;  %7781 = vst [vmem:[#allocation50_spill] sm:$0xff] %v6880_v11  ;;  %7782 = vst [vmem:[#allocation51_spill] sm:$0xff] %v6882_v13  ;;  %v1941_v40 = vld [vmem:[#allocation10 + $0x270] sm:$0xff]  ;;  %v6904_v47 = vpack.c.bf16 %v1955_v18, %v1947_v55 }
 0x960   :  { %5136 = vmatpush1.bf16.msra.mxu0 %v6840_v37  ;;  %5168 = vmatpush1.bf16.msra.mxu1 %v6842_v27  ;;  %7779 = vst [vmem:[#allocation48_spill] sm:$0xff] %v6874_v56  ;;  %7780 = vst [vmem:[#allocation49_spill] sm:$0xff] %v6876_v48  ;;  %v6894_v9 = vpack.c.bf16 %v1941_v40, %v1933_v36  ;;  %v1963_v36 = vld [vmem:[#allocation10 + $0x320] sm:$0xff] }
 0x961   :  { %5138 = vmatprep.subr.bf16.mxu0 %v6846_v41  ;;  %5170 = vmatprep.subr.bf16.mxu1 %v6848_v50  ;;  %v1932_v50 = vld [vmem:[#allocation10 + $0x228] sm:$0xff]  ;;  %v1934_v41 = vld [vmem:[#allocation10 + $0x238] sm:$0xff]  ;;  %7785 = vst [vmem:[#allocation54_spill] sm:$0xff] %v6892_v12  ;;  %v1971_v40 = vld [vmem:[#allocation10 + $0x360] sm:$0xff] }
 0x962   :  { %2239 = vmatprep.mubr.f32.mxu0 %v7776_v31  ;;  %2310 = vmatprep.mubr.f32.mxu1 %v7776_v31  ;;  %7786 = vst [vmem:[#allocation55_spill] sm:$0xff] %v6894_v9  ;;  %v6916_v55 = vpack.c.bf16 %v1971_v40, %v1963_v36 }
 0x964   :  { %5140 = vmatpush1.bf16.msra.mxu0 %v6854_v6  ;;  %5172 = vmatpush1.bf16.msra.mxu1 %v6856_v51  ;;  %v1940_v6 = vld [vmem:[#allocation10 + $0x268] sm:$0xff]  ;;  %v1942_v51 = vld [vmem:[#allocation10 + $0x278] sm:$0xff] }
 0x965   :  { %5142 = vmatprep.subr.bf16.mxu0 %v6860_v17  ;;  %5174 = vmatprep.subr.bf16.mxu1 %v6862_v44  ;;  %v6886_v3 = vpack.c.bf16 %v1940_v6, %v1932_v50  ;;  %v6888_v57 = vpack.c.bf16 %v1942_v51, %v1934_v41  ;;  %v1948_v44 = vld [vmem:[#allocation10 + $0x2a8] sm:$0xff]  ;;  %v1950_v17 = vld [vmem:[#allocation10 + $0x2b8] sm:$0xff]  ;;  %v1949_v6 = vld [vmem:[#allocation10 + $0x2b0] sm:$0xff] }
 0x966   :  { %v1957_v51 = vld [vmem:[#allocation10 + $0x2f0] sm:$0xff] }
 0x967   :  { %7783 = vst [vmem:[#allocation52_spill] sm:$0xff] %v6886_v3  ;;  %7784 = vst [vmem:[#allocation53_spill] sm:$0xff] %v6888_v57  ;;  %v6906_v0 = vpack.c.bf16 %v1957_v51, %v1949_v6  ;;  %v1979_v6 = vld [vmem:[#allocation10 + $0x3a0] sm:$0xff]  ;;  %v1989_v51 = vld [vmem:[#allocation10 + $0x3f0] sm:$0xff] }
 0x968   :  { %5144 = vmatpush1.bf16.msra.mxu0 %v6868_v32  ;;  %5176 = vmatpush1.bf16.msra.mxu1 %v6870_v38  ;;  %v1956_v32 = vld [vmem:[#allocation10 + $0x2e8] sm:$0xff]  ;;  %v1958_v38 = vld [vmem:[#allocation10 + $0x2f8] sm:$0xff] }
 0x969   :  { %5146 = vmatprep.subr.bf16.mxu0 %v6874_v56  ;;  %5178 = vmatprep.subr.bf16.mxu1 %v6876_v48  ;;  %v6898_v41 = vpack.c.bf16 %v1956_v32, %v1948_v44  ;;  %v6900_v50 = vpack.c.bf16 %v1958_v38, %v1950_v17  ;;  %v1964_v48 = vld [vmem:[#allocation10 + $0x328] sm:$0xff]  ;;  %v1966_v56 = vld [vmem:[#allocation10 + $0x338] sm:$0xff]  ;;  %v1965_v32 = vld [vmem:[#allocation10 + $0x330] sm:$0xff] }
 0x96a   :  { %v1973_v38 = vld [vmem:[#allocation10 + $0x370] sm:$0xff] }
 0x96b   :  { %7787 = vst [vmem:[#allocation56_spill] sm:$0xff] %v6898_v41  ;;  %7788 = vst [vmem:[#allocation57_spill] sm:$0xff] %v6900_v50  ;;  %v6918_v18 = vpack.c.bf16 %v1973_v38, %v1965_v32 }
 0x96c   :  { %5148 = vmatpush1.bf16.msra.mxu0 %v6880_v11  ;;  %5180 = vmatpush1.bf16.msra.mxu1 %v6882_v13  ;;  %v1972_v11 = vld [vmem:[#allocation10 + $0x368] sm:$0xff]  ;;  %v1974_v13 = vld [vmem:[#allocation10 + $0x378] sm:$0xff] }
 0x96d   :  { %5150 = vmatprep.subr.bf16.mxu0 %v6886_v3  ;;  %5182 = vmatprep.subr.bf16.mxu1 %v6888_v57  ;;  %v6910_v17 = vpack.c.bf16 %v1972_v11, %v1964_v48  ;;  %v6912_v44 = vpack.c.bf16 %v1974_v13, %v1966_v56  ;;  %v1980_v57 = vld [vmem:[#allocation10 + $0x3a8] sm:$0xff]  ;;  %v1982_v3 = vld [vmem:[#allocation10 + $0x3b8] sm:$0xff]  ;;  %v1987_v11 = vld [vmem:[#allocation10 + $0x3e0] sm:$0xff] }
 0x96e   :  { %v1981_v13 = vld [vmem:[#allocation10 + $0x3b0] sm:$0xff]  ;;  %v6928_v36 = vpack.c.bf16 %v1987_v11, %v1979_v6 }
 0x96f   :  { %v6930_v40 = vpack.c.bf16 %v1989_v51, %v1981_v13 }
 0x970   :  { %5152 = vmatpush1.bf16.msra.mxu0 %v6892_v12  ;;  %5184 = vmatpush1.bf16.msra.mxu1 %v6894_v9  ;;  %v1988_v12 = vld [vmem:[#allocation10 + $0x3e8] sm:$0xff]  ;;  %v1990_v9 = vld [vmem:[#allocation10 + $0x3f8] sm:$0xff] }
 0x971   :  { %5154 = vmatprep.subr.bf16.mxu0 %v6898_v41  ;;  %5186 = vmatprep.subr.bf16.mxu1 %v6900_v50  ;;  %v6922_v56 = vpack.c.bf16 %v1988_v12, %v1980_v57  ;;  %v6924_v48 = vpack.c.bf16 %v1990_v9, %v1982_v3  ;;  %v7688_v3 = vsub.s32 5, %v6490_v2  ;;  %v7689_v57 = vsub.s32 7, %v6490_v2 }
 0x972   :  { %v1538_v12 = vrot.slane %v6830_v63, %v6503_v7 }
 0x973   :  { %v1554_v32 = vrot.slane %v6830_v63, %v7688_v3  ;;  %v1562_v38 = vrot.slane %v6830_v63, %v7689_v57  ;;  %v7801_v57 = vld [vmem:[#allocation48_spill] sm:$0xff] }
 0x974   :  { %5156 = vmatpush1.bf16.msra.mxu0 %v6904_v47  ;;  %5188 = vmatpush1.bf16.msra.mxu1 %v6906_v0  ;;  %v1640_v6 = vadd.f32 %v6836_v15, %v1538_v12  ;;  %v7793_v12 = vld [vmem:[#allocation40_spill] sm:$0xff] }
 0x975   :  { %5158 = vmatprep.subr.bf16.mxu0 %v6910_v17  ;;  %5190 = vmatprep.subr.bf16.mxu1 %v6912_v44 }
 0x976   :  { %v1856_v15 = vmax.f32 %v1640_v6, 0.0  ;;  %v7799_v6 = vld [vmem:[#allocation46_spill] sm:$0xff] }
 0x978   :  { %5160 = vmatpush1.bf16.msra.mxu0 %v6916_v55  ;;  %5192 = vmatpush1.bf16.msra.mxu1 %v6918_v18 }
 0x979   :  { %5162 = vmatprep.subr.bf16.mxu0 %v6922_v56  ;;  %5194 = vmatprep.subr.bf16.mxu1 %v6924_v48 }
 0x97c   :  { %5164 = vmatpush1.bf16.msra.mxu0 %v6928_v36  ;;  %5196 = vmatpush1.bf16.msra.mxu1 %v6930_v40 }
 0x97d   :  { %5198 = vmatprep.subr.bf16.mxu0 %v6721_v61  ;;  %5230 = vmatprep.subr.bf16.mxu1 %v6723_v5 }
 0x97f   :  { %2240 = vmatmul.mubr.f32.vlgmr.msra.gmra.mrb[16].mxu0 %v6844_v49  ;;  %2311 = vmatmul.mubr.f32.vlgmr.msra.gmra.mrb[14].mxu1 %v6844_v49  ;;  %v7684_v49 = vsub.s32 6, %v6490_v2  ;;  %v7806_v2 = vld [vmem:[#allocation53_spill] sm:$0xff] }
 0x980   :  { %5200 = vmatpush1.bf16.msra.mxu0 %v6725_v14  ;;  %5232 = vmatpush1.bf16.msra.mxu1 %v6727_v16 }
 0x981   :  { %5202 = vmatprep.subr.bf16.mxu0 %v6731_v20  ;;  %5234 = vmatprep.subr.bf16.mxu1 %v6733_v21  ;;  %v1558_v9 = vrot.slane %v6830_v63, %v7684_v49 }
 0x982   :  { %2427 = vmatprep.mubr.f32.mxu0 %v7776_v31  ;;  %2498 = vmatprep.mubr.f32.mxu1 %v7776_v31 }
 0x984   :  { %5204 = vmatpush1.bf16.msra.mxu0 %v6739_v46  ;;  %5236 = vmatpush1.bf16.msra.mxu1 %v6741_v25 }
 0x985   :  { %5206 = vmatprep.subr.bf16.mxu0 %v6745_v33  ;;  %5238 = vmatprep.subr.bf16.mxu1 %v6747_v35 }
 0x988   :  { %5208 = vmatpush1.bf16.msra.mxu0 %v6753_v30  ;;  %5240 = vmatpush1.bf16.msra.mxu1 %v6755_v26 }
 0x989   :  { %5210 = vmatprep.subr.bf16.mxu0 %v6759_v28  ;;  %5242 = vmatprep.subr.bf16.mxu1 %v6761_v29 }
 0x98c   :  { %5212 = vmatpush1.bf16.msra.mxu0 %v6765_v4  ;;  %5244 = vmatpush1.bf16.msra.mxu1 %v6767_v42 }
 0x98d   :  { %5214 = vmatprep.subr.bf16.mxu0 %v6771_v53  ;;  %5246 = vmatprep.subr.bf16.mxu1 %v6773_v54 }
 0x990   :  { %5216 = vmatpush1.bf16.msra.mxu0 %v6777_v1  ;;  %5248 = vmatpush1.bf16.msra.mxu1 %v6779_v34 }
 0x991   :  { %5218 = vmatprep.subr.bf16.mxu0 %v6783_v8  ;;  %5250 = vmatprep.subr.bf16.mxu1 %v6785_v10 }
 0x994   :  { %5220 = vmatpush1.bf16.msra.mxu0 %v6789_v58  ;;  %5252 = vmatpush1.bf16.msra.mxu1 %v6791_v22 }
 0x995   :  { %5222 = vmatprep.subr.bf16.mxu0 %v6795_v23  ;;  %5254 = vmatprep.subr.bf16.mxu1 %v6797_v45 }
 0x998   :  { %5224 = vmatpush1.bf16.msra.mxu0 %v6801_v39  ;;  %5256 = vmatpush1.bf16.msra.mxu1 %v6803_v24 }
 0x999   :  { %5226 = vmatprep.subr.bf16.mxu0 %v6807_v59  ;;  %5258 = vmatprep.subr.bf16.mxu1 %v6809_v60 }
 0x99a   :  { %v6985_v11 = vpop.f32.mrb[12].mxu0  ;;  %v1850_v13 = vpop.f32.mrb[10].mxu1 }
 0x99b   :  { %7789 = vst [vmem:[#allocation58_spill] sm:$0xff] %v6985_v11  ;;  %v6987_v51 = vadd.f32 %v1850_v13, %v1558_v9  ;;  %v1781_v49 = vpop.f32.mrb[13].mxu0  ;;  %v1852_v7 = vpop.f32.mrb[11].mxu1  ;;  %v7796_v9 = vld [vmem:[#allocation43_spill] sm:$0xff]  ;;  %v7805_v11 = vld [vmem:[#allocation52_spill] sm:$0xff] }
 0x99c   :  { %v6989_v24 = vadd.f32 %v1781_v49, %v1554_v32  ;;  %v6991_v3 = vadd.f32 %v1852_v7, %v1562_v38  ;;  %5228 = vmatpush1.bf16.msra.mxu0 %v6813_v52  ;;  %5260 = vmatpush1.bf16.msra.mxu1 %v6815_v19  ;;  %v7794_v49 = vld [vmem:[#allocation41_spill] sm:$0xff]  ;;  %v7795_v7 = vld [vmem:[#allocation42_spill] sm:$0xff]  ;;  %v7797_v32 = vld [vmem:[#allocation44_spill] sm:$0xff] }
 0x99d   :  { %7790 = vst [vmem:[#allocation59_spill] sm:$0xff] %v6987_v51  ;;  %5262 = vmatprep.subr.bf16.mxu0 %v6819_v43  ;;  %5294 = vmatprep.subr.bf16.mxu1 %v6821_v62  ;;  %v7798_v38 = vld [vmem:[#allocation45_spill] sm:$0xff]  ;;  %v7800_v13 = vld [vmem:[#allocation47_spill] sm:$0xff]  ;;  %v7803_v51 = vld [vmem:[#allocation50_spill] sm:$0xff] }
 0x99e   :  { %7791 = vst [vmem:[#allocation60_spill] sm:$0xff] %v6989_v24  ;;  %7792 = vst [vmem:[#allocation61_spill] sm:$0xff] %v6991_v3  ;;  %v7802_v3 = vld [vmem:[#allocation49_spill] sm:$0xff]  ;;  %v7804_v24 = vld [vmem:[#allocation51_spill] sm:$0xff] }
 0x99f   :  { %2428 = vmatmul.mubr.f32.vlgmr.msra.gmra.mrb[18].mxu0 %v1856_v15  ;;  %2499 = vmatmul.mubr.f32.vlgmr.msra.gmra.mrb[16].mxu1 %v1856_v15 }
 0x9a0   :  { %5264 = vmatpush1.bf16.msra.mxu0 %v6840_v37  ;;  %5296 = vmatpush1.bf16.msra.mxu1 %v6842_v27 }
 0x9a1   :  { %5266 = vmatprep.subr.bf16.mxu0 %v7793_v12  ;;  %5298 = vmatprep.subr.bf16.mxu1 %v7794_v49 }
 0x9a2   :  { %2569 = vmatprep.mubr.f32.mxu0 %v7776_v31  ;;  %2640 = vmatprep.mubr.f32.mxu1 %v7776_v31 }
 0x9a4   :  { %5268 = vmatpush1.bf16.msra.mxu0 %v7795_v7  ;;  %5300 = vmatpush1.bf16.msra.mxu1 %v7796_v9  ;;  %v7807_v9 = vld [vmem:[#allocation54_spill] sm:$0xff] }
 0x9a5   :  { %5270 = vmatprep.subr.bf16.mxu0 %v7797_v32  ;;  %5302 = vmatprep.subr.bf16.mxu1 %v7798_v38  ;;  %v7808_v32 = vld [vmem:[#allocation55_spill] sm:$0xff] }
 0x9a8   :  { %5272 = vmatpush1.bf16.msra.mxu0 %v7799_v6  ;;  %5304 = vmatpush1.bf16.msra.mxu1 %v7800_v13 }
 0x9a9   :  { %5274 = vmatprep.subr.bf16.mxu0 %v7801_v57  ;;  %5306 = vmatprep.subr.bf16.mxu1 %v7802_v3 }
 0x9ac   :  { %5276 = vmatpush1.bf16.msra.mxu0 %v7803_v51  ;;  %5308 = vmatpush1.bf16.msra.mxu1 %v7804_v24 }
 0x9ad   :  { %5278 = vmatprep.subr.bf16.mxu0 %v7805_v11  ;;  %5310 = vmatprep.subr.bf16.mxu1 %v7806_v2 }
 0x9b0   :  { %5280 = vmatpush1.bf16.msra.mxu0 %v7807_v9  ;;  %5312 = vmatpush1.bf16.msra.mxu1 %v7808_v32 }
 0x9b1   :  { %5282 = vmatprep.subr.bf16.mxu0 %v6898_v41  ;;  %5314 = vmatprep.subr.bf16.mxu1 %v6900_v50 }
 0x9b4   :  { %5284 = vmatpush1.bf16.msra.mxu0 %v6904_v47  ;;  %5316 = vmatpush1.bf16.msra.mxu1 %v6906_v0 }
 0x9b5   :  { %5286 = vmatprep.subr.bf16.mxu0 %v6910_v17  ;;  %5318 = vmatprep.subr.bf16.mxu1 %v6912_v44 }
 0x9b8   :  { %5288 = vmatpush1.bf16.msra.mxu0 %v6916_v55  ;;  %5320 = vmatpush1.bf16.msra.mxu1 %v6918_v18 }
 0x9b9   :  { %5290 = vmatprep.subr.bf16.mxu0 %v6922_v56  ;;  %5322 = vmatprep.subr.bf16.mxu1 %v6924_v48 }
 0x9bc   :  { %5292 = vmatpush1.bf16.msra.mxu0 %v6928_v36  ;;  %5324 = vmatpush1.bf16.msra.mxu1 %v6930_v40 }
 0x9bd   :  { %5326 = vmatprep.subr.bf16.mxu0 %v6721_v61  ;;  %5358 = vmatprep.subr.bf16.mxu1 %v6723_v5 }
 0x9bf   :  { %2570 = vmatmul.mubr.f32.vlgmr.msra.gmra.mrb[20].mxu0 %v1856_v15  ;;  %2641 = vmatmul.mubr.f32.vlgmr.msra.gmra.mrb[18].mxu1 %v1856_v15  ;;  %v7809_v15 = vld [vmem:[#allocation20_spill] sm:$0xff] }
 0x9c0   :  { %5328 = vmatpush1.bf16.msra.mxu0 %v6725_v14  ;;  %5360 = vmatpush1.bf16.msra.mxu1 %v6727_v16 }
 0x9c1   :  { %5330 = vmatprep.subr.bf16.mxu0 %v6731_v20  ;;  %5362 = vmatprep.subr.bf16.mxu1 %v6733_v21 }
 0x9c2   :  { %2757 = vmatprep.mubr.f32.mxu0 %v7776_v31  ;;  %2828 = vmatprep.mubr.f32.mxu1 %v7776_v31 }
 0x9c4   :  { %5332 = vmatpush1.bf16.msra.mxu0 %v6739_v46  ;;  %5364 = vmatpush1.bf16.msra.mxu1 %v6741_v25 }
 0x9c5   :  { %5334 = vmatprep.subr.bf16.mxu0 %v6745_v33  ;;  %5366 = vmatprep.subr.bf16.mxu1 %v6747_v35 }
 0x9c8   :  { %5336 = vmatpush1.bf16.msra.mxu0 %v6753_v30  ;;  %5368 = vmatpush1.bf16.msra.mxu1 %v6755_v26 }
 0x9c9   :  { %5338 = vmatprep.subr.bf16.mxu0 %v6759_v28  ;;  %5370 = vmatprep.subr.bf16.mxu1 %v6761_v29 }
 0x9cc   :  { %5340 = vmatpush1.bf16.msra.mxu0 %v6765_v4  ;;  %5372 = vmatpush1.bf16.msra.mxu1 %v6767_v42  ;;  %v1542_v4 = vrot.slane %v6830_v63, %v7809_v15 }
 0x9cd   :  { %5342 = vmatprep.subr.bf16.mxu0 %v6771_v53  ;;  %5374 = vmatprep.subr.bf16.mxu1 %v6773_v54 }
 0x9d0   :  { %5344 = vmatpush1.bf16.msra.mxu0 %v6777_v1  ;;  %5376 = vmatpush1.bf16.msra.mxu1 %v6779_v34  ;;  %v7810_v1 = vld [vmem:[#allocation37_spill] sm:$0xff]  ;;  %v7811_v34 = vld [vmem:[#allocation38_spill] sm:$0xff] }
 0x9d1   :  { %5346 = vmatprep.subr.bf16.mxu0 %v6783_v8  ;;  %5378 = vmatprep.subr.bf16.mxu1 %v6785_v10  ;;  %v1709_v54 = vadd.f32 %v7811_v34, %v1542_v4  ;;  %v7812_v4 = vld [vmem:[#allocation43_spill] sm:$0xff]  ;;  %v7814_v34 = vld [vmem:[#allocation28_spill] sm:$0xff] }
 0x9d4   :  { %5348 = vmatpush1.bf16.msra.mxu0 %v6789_v58  ;;  %5380 = vmatpush1.bf16.msra.mxu1 %v6791_v22  ;;  %v1857_v22 = vmax.f32 %v1709_v54, 0.0  ;;  %v7813_v54 = vld [vmem:[#allocation44_spill] sm:$0xff] }
 0x9d5   :  { %5350 = vmatprep.subr.bf16.mxu0 %v6795_v23  ;;  %5382 = vmatprep.subr.bf16.mxu1 %v6797_v45 }
 0x9d8   :  { %5352 = vmatpush1.bf16.msra.mxu0 %v6801_v39  ;;  %5384 = vmatpush1.bf16.msra.mxu1 %v7810_v1 }
 0x9d9   :  { %5354 = vmatprep.subr.bf16.mxu0 %v6807_v59  ;;  %5386 = vmatprep.subr.bf16.mxu1 %v6809_v60 }
 0x9dc   :  { %5356 = vmatpush1.bf16.msra.mxu0 %v6813_v52  ;;  %5388 = vmatpush1.bf16.msra.mxu1 %v6815_v19 }
 0x9dd   :  { %5390 = vmatprep.subr.bf16.mxu0 %v6819_v43  ;;  %5422 = vmatprep.subr.bf16.mxu1 %v6821_v62 }
 0x9df   :  { %2758 = vmatmul.mubr.f32.vlgmr.msra.gmra.mrb[22].mxu0 %v1857_v22  ;;  %2829 = vmatmul.mubr.f32.vlgmr.msra.gmra.mrb[20].mxu1 %v1857_v22 }
 0x9e0   :  { %5392 = vmatpush1.bf16.msra.mxu0 %v6840_v37  ;;  %5424 = vmatpush1.bf16.msra.mxu1 %v6842_v27 }
 0x9e1   :  { %5394 = vmatprep.subr.bf16.mxu0 %v7793_v12  ;;  %5426 = vmatprep.subr.bf16.mxu1 %v7794_v49 }
 0x9e2   :  { %2899 = vmatprep.mubr.f32.mxu0 %v7776_v31  ;;  %2970 = vmatprep.mubr.f32.mxu1 %v7776_v31 }
 0x9e4   :  { %5396 = vmatpush1.bf16.msra.mxu0 %v7795_v7  ;;  %5428 = vmatpush1.bf16.msra.mxu1 %v7812_v4 }
 0x9e5   :  { %5398 = vmatprep.subr.bf16.mxu0 %v7813_v54  ;;  %5430 = vmatprep.subr.bf16.mxu1 %v7798_v38 }
 0x9e8   :  { %5400 = vmatpush1.bf16.msra.mxu0 %v7799_v6  ;;  %5432 = vmatpush1.bf16.msra.mxu1 %v7800_v13 }
 0x9e9   :  { %5402 = vmatprep.subr.bf16.mxu0 %v7801_v57  ;;  %5434 = vmatprep.subr.bf16.mxu1 %v7802_v3 }
 0x9ec   :  { %5404 = vmatpush1.bf16.msra.mxu0 %v7803_v51  ;;  %5436 = vmatpush1.bf16.msra.mxu1 %v7804_v24 }
 0x9ed   :  { %5406 = vmatprep.subr.bf16.mxu0 %v7805_v11  ;;  %5438 = vmatprep.subr.bf16.mxu1 %v7806_v2 }
 0x9f0   :  { %5408 = vmatpush1.bf16.msra.mxu0 %v7807_v9  ;;  %5440 = vmatpush1.bf16.msra.mxu1 %v7808_v32 }
 0x9f1   :  { %5410 = vmatprep.subr.bf16.mxu0 %v6898_v41  ;;  %5442 = vmatprep.subr.bf16.mxu1 %v6900_v50 }
 0x9f4   :  { %5412 = vmatpush1.bf16.msra.mxu0 %v6904_v47  ;;  %5444 = vmatpush1.bf16.msra.mxu1 %v6906_v0 }
 0x9f5   :  { %5414 = vmatprep.subr.bf16.mxu0 %v6910_v17  ;;  %5446 = vmatprep.subr.bf16.mxu1 %v6912_v44 }
 0x9f8   :  { %5416 = vmatpush1.bf16.msra.mxu0 %v6916_v55  ;;  %5448 = vmatpush1.bf16.msra.mxu1 %v6918_v18 }
 0x9f9   :  { %5418 = vmatprep.subr.bf16.mxu0 %v6922_v56  ;;  %5450 = vmatprep.subr.bf16.mxu1 %v6924_v48 }
 0x9fc   :  { %5420 = vmatpush1.bf16.msra.mxu0 %v6928_v36  ;;  %5452 = vmatpush1.bf16.msra.mxu1 %v6930_v40 }
 0x9fd   :  { %5454 = vmatprep.subr.bf16.mxu0 %v6721_v61  ;;  %5486 = vmatprep.subr.bf16.mxu1 %v6723_v5 }
 0x9ff   :  { %2900 = vmatmul.mubr.f32.vlgmr.msra.gmra.mrb[24].mxu0 %v1857_v22  ;;  %2971 = vmatmul.mubr.f32.vlgmr.msra.gmra.mrb[22].mxu1 %v1857_v22  ;;  %v7815_v22 = vld [vmem:[#allocation31_spill] sm:$0xff] }
 0xa00   :  { %5456 = vmatpush1.bf16.msra.mxu0 %v6725_v14  ;;  %5488 = vmatpush1.bf16.msra.mxu1 %v6727_v16 }
 0xa01   :  { %5458 = vmatprep.subr.bf16.mxu0 %v6731_v20  ;;  %5490 = vmatprep.subr.bf16.mxu1 %v6733_v21 }
 0xa02   :  { %3087 = vmatprep.mubr.f32.mxu0 %v7776_v31  ;;  %3158 = vmatprep.mubr.f32.mxu1 %v7776_v31 }
 0xa04   :  { %5460 = vmatpush1.bf16.msra.mxu0 %v6739_v46  ;;  %5492 = vmatpush1.bf16.msra.mxu1 %v6741_v25  ;;  %v7816_v25 = vld [vmem:[#allocation32_spill] sm:$0xff] }
 0xa05   :  { %5462 = vmatprep.subr.bf16.mxu0 %v6745_v33  ;;  %5494 = vmatprep.subr.bf16.mxu1 %v6747_v35  ;;  %v7817_v33 = vld [vmem:[#allocation33_spill] sm:$0xff] }
 0xa06   :  { %v7818_v35 = vld [vmem:[#allocation17_spill] sm:$0xff] }
 0xa08   :  { %5464 = vmatpush1.bf16.msra.mxu0 %v6753_v30  ;;  %5496 = vmatpush1.bf16.msra.mxu1 %v6755_v26  ;;  %v1545_v30 = vsub.s32 3, %v7818_v35 }
 0xa09   :  { %5466 = vmatprep.subr.bf16.mxu0 %v6759_v28  ;;  %5498 = vmatprep.subr.bf16.mxu1 %v6761_v29  ;;  %v7819_v29 = vld [vmem:[#allocation36_spill] sm:$0xff] }
 0xa0c   :  { %5468 = vmatpush1.bf16.msra.mxu0 %v7814_v34  ;;  %5500 = vmatpush1.bf16.msra.mxu1 %v6767_v42  ;;  %v1546_v42 = vrot.slane %v6830_v63, %v1545_v30 }
 0xa0d   :  { %5470 = vmatprep.subr.bf16.mxu0 %v6771_v53  ;;  %5502 = vmatprep.subr.bf16.mxu1 %v7815_v22 }
 0xa10   :  { %5472 = vmatpush1.bf16.msra.mxu0 %v7816_v25  ;;  %5504 = vmatpush1.bf16.msra.mxu1 %v7817_v33  ;;  %v7820_v33 = vld [vmem:[#allocation39_spill] sm:$0xff] }
 0xa11   :  { %5474 = vmatprep.subr.bf16.mxu0 %v6783_v8  ;;  %5506 = vmatprep.subr.bf16.mxu1 %v6785_v10  ;;  %v1711_v25 = vadd.f32 %v7820_v33, %v1546_v42  ;;  %v6304_v33 = vmov 1983009808  }
 0xa12   :  { %v2328_v42 = vunpack.c.l.s4 %v6304_v33  ;;  %v7823_v33 = vld [vmem:[#allocation19_spill] sm:$0xff] }
 0xa14   :  { %5476 = vmatpush1.bf16.msra.mxu0 %v6789_v58  ;;  %5508 = vmatpush1.bf16.msra.mxu1 %v7819_v29  ;;  %v1858_v29 = vmax.f32 %v1711_v25, 0.0  ;;  %v7153_v25 = vld [vmem:[#allocation12] sm:$0xff] }
 0xa15   :  { %5478 = vmatprep.subr.bf16.mxu0 %v6795_v23  ;;  %5510 = vmatprep.subr.bf16.mxu1 %v6797_v45 }
 0xa18   :  { %5480 = vmatpush1.bf16.msra.mxu0 %v6801_v39  ;;  %5512 = vmatpush1.bf16.msra.mxu1 %v7810_v1 }
 0xa19   :  { %5482 = vmatprep.subr.bf16.mxu0 %v6807_v59  ;;  %5514 = vmatprep.subr.bf16.mxu1 %v6809_v60 }
 0xa1c   :  { %5484 = vmatpush1.bf16.msra.mxu0 %v6813_v52  ;;  %5516 = vmatpush1.bf16.msra.mxu1 %v6815_v19 }
 0xa1d   :  { %5518 = vmatprep.subr.bf16.mxu0 %v6819_v43  ;;  %5550 = vmatprep.subr.bf16.mxu1 %v6821_v62 }
 0xa1f   :  { %3088 = vmatmul.mubr.f32.vlgmr.msra.gmra.mrb[26].mxu0 %v1858_v29  ;;  %3159 = vmatmul.mubr.f32.vlgmr.msra.gmra.mrb[24].mxu1 %v1858_v29 }
 0xa20   :  { %5520 = vmatpush1.bf16.msra.mxu0 %v6840_v37  ;;  %5552 = vmatpush1.bf16.msra.mxu1 %v6842_v27 }
 0xa21   :  { %5522 = vmatprep.subr.bf16.mxu0 %v7793_v12  ;;  %5554 = vmatprep.subr.bf16.mxu1 %v7794_v49 }
 0xa22   :  { %3229 = vmatprep.mubr.f32.mxu0 %v7776_v31  ;;  %3300 = vmatprep.mubr.f32.mxu1 %v7776_v31 }
 0xa24   :  { %5524 = vmatpush1.bf16.msra.mxu0 %v7795_v7  ;;  %5556 = vmatpush1.bf16.msra.mxu1 %v7812_v4 }
 0xa25   :  { %5526 = vmatprep.subr.bf16.mxu0 %v7813_v54  ;;  %5558 = vmatprep.subr.bf16.mxu1 %v7798_v38 }
 0xa28   :  { %5528 = vmatpush1.bf16.msra.mxu0 %v7799_v6  ;;  %5560 = vmatpush1.bf16.msra.mxu1 %v7800_v13  ;;  %v7161_v6 = vrot.slane %v7153_v25, %v7809_v15  ;;  %v7822_v13 = vld [vmem:[#allocation18_spill] sm:$0xff] }
 0xa29   :  { %5530 = vmatprep.subr.bf16.mxu0 %v7801_v57  ;;  %5562 = vmatprep.subr.bf16.mxu1 %v7802_v3  ;;  %v7165_v57 = vrot.slane %v7153_v25, %v7822_v13  ;;  %v7168_v3 = vrot.slane %v7153_v25, %v1545_v30 }
 0xa2a   :  { %7821 = vst [vmem:[#allocation40_spill] sm:$0xff] %v7161_v6 }
 0xa2c   :  { %5532 = vmatpush1.bf16.msra.mxu0 %v7803_v51  ;;  %5564 = vmatpush1.bf16.msra.mxu1 %v7804_v24 }
 0xa2d   :  { %5534 = vmatprep.subr.bf16.mxu0 %v7805_v11  ;;  %5566 = vmatprep.subr.bf16.mxu1 %v7806_v2  ;;  %v7174_v11 = vrot.slane %v7153_v25, %v7823_v33  ;;  %v2329_v2 = vunpack.c.0.s8 %v2328_v42 }
 0xa30   :  { %5536 = vmatpush1.bf16.msra.mxu0 %v7807_v9  ;;  %5568 = vmatpush1.bf16.msra.mxu1 %v7808_v32  ;;  %v7182_v32 = vsub.s32 %v2329_v2, %v7818_v35 }
 0xa31   :  { %5538 = vmatprep.subr.bf16.mxu0 %v6898_v41  ;;  %5570 = vmatprep.subr.bf16.mxu1 %v6900_v50 }
 0xa32   :  { %v2099_v15 = vpop.f32.mrb[14].mxu0  ;;  %v2170_v24 = vpop.f32.mrb[12].mxu1 }
 0xa33   :  { %v2100_v13 = vadd.f32 %v2099_v15, %v7165_v57  ;;  %v2171_v30 = vadd.f32 %v2170_v24, %v7161_v6  ;;  %v2101_v51 = vpop.f32.mrb[15].mxu0  ;;  %v2172_v38 = vpop.f32.mrb[13].mxu1 }
 0xa34   :  { %v2102_v9 = vadd.f32 %v2101_v51, %v7174_v11  ;;  %v2173_v33 = vadd.f32 %v2172_v38, %v7168_v3  ;;  %5540 = vmatpush1.bf16.msra.mxu0 %v6904_v47  ;;  %5572 = vmatpush1.bf16.msra.mxu1 %v6906_v0  ;;  %v7824_v51 = vld [vmem:[#allocation21_spill] sm:$0xff]  ;;  %v7826_v38 = vld [vmem:[#allocation23_spill] sm:$0xff] }
 0xa35   :  { %5542 = vmatprep.subr.bf16.mxu0 %v6910_v17  ;;  %5574 = vmatprep.subr.bf16.mxu1 %v6912_v44 }
 0xa36   :  { %v2325_v42 = vcombine.low %v2100_v13, %v2102_v9  ;;  %v2326_v15 = vcombine.low %v2171_v30, %v2173_v33  ;;  %v7825_v9 = vld [vmem:[#allocation22_spill] sm:$0xff]  ;;  %v7829_v13 = vld [vmem:[#allocation29_spill] sm:$0xff]  ;;  %v1549_v30 = vsub.s32 4, %v7818_v35 }
 0xa38   :  { %v2333_v24 = vrot.slane %v2325_v42, %v7182_v32  ;;  %v2340_v6 = vrot.slane %v2326_v15, %v7182_v32  ;;  %5544 = vmatpush1.bf16.msra.mxu0 %v6916_v55  ;;  %5576 = vmatpush1.bf16.msra.mxu1 %v6918_v18  ;;  %v7222_v33 = vrot.slane %v7153_v25, %v1549_v30  ;;  %v7830_v42 = vsub.s32 6, %v7818_v35 }
 0xa39   :  { %5546 = vmatprep.subr.bf16.mxu0 %v6922_v56  ;;  %5578 = vmatprep.subr.bf16.mxu1 %v6924_v48 }
 0xa3a   :  { %v2341_v2 = vcombine.low %v2333_v24, %v2340_v6  ;;  %v7828_v6 = vld [vmem:[#allocation27_spill] sm:$0xff]  ;;  %v7227_v15 = vrot.slane %v7153_v25, %v7830_v42  ;;  %v7832_v24 = vsub.s32 5, %v7818_v35 }
 0xa3c   :  { %2361 = vst [vmem:[%s7646_s15] sm:$0xff] %v2341_v2  ;;  %5548 = vmatpush1.bf16.msra.mxu0 %v6928_v36  ;;  %5580 = vmatpush1.bf16.msra.mxu1 %v6930_v40  ;;  %7831 = vst [vmem:[#allocation41_spill] sm:$0xff] %v7227_v15  ;;  %v7232_v2 = vrot.slane %v7153_v25, %v7832_v24 }
 0xa3d   :  { %5582 = vmatprep.subr.bf16.mxu0 %v6721_v61  ;;  %5614 = vmatprep.subr.bf16.mxu1 %v6723_v5 }
 0xa3f   :  { %3230 = vmatmul.mubr.f32.vlgmr.msra.gmra.mrb[28].mxu0 %v1858_v29  ;;  %3301 = vmatmul.mubr.f32.vlgmr.msra.gmra.mrb[26].mxu1 %v1858_v29  ;;  %v7827_v29 = vld [vmem:[#allocation24_spill] sm:$0xff] }
 0xa40   :  { %5584 = vmatpush1.bf16.msra.mxu0 %v6725_v14  ;;  %5616 = vmatpush1.bf16.msra.mxu1 %v6727_v16 }
 0xa41   :  { %5586 = vmatprep.subr.bf16.mxu0 %v6731_v20  ;;  %5618 = vmatprep.subr.bf16.mxu1 %v6733_v21 }
 0xa42   :  { %3417 = vmatprep.mubr.f32.mxu0 %v7776_v31  ;;  %3488 = vmatprep.mubr.f32.mxu1 %v7776_v31 }
 0xa44   :  { %5588 = vmatpush1.bf16.msra.mxu0 %v6739_v46  ;;  %5620 = vmatpush1.bf16.msra.mxu1 %v7824_v51 }
 0xa45   :  { %5590 = vmatprep.subr.bf16.mxu0 %v7825_v9  ;;  %5622 = vmatprep.subr.bf16.mxu1 %v7826_v38 }
 0xa48   :  { %5592 = vmatpush1.bf16.msra.mxu0 %v7827_v29  ;;  %5624 = vmatpush1.bf16.msra.mxu1 %v6755_v26 }
 0xa49   :  { %5594 = vmatprep.subr.bf16.mxu0 %v6759_v28  ;;  %5626 = vmatprep.subr.bf16.mxu1 %v7828_v6 }
 0xa4c   :  { %5596 = vmatpush1.bf16.msra.mxu0 %v7814_v34  ;;  %5628 = vmatpush1.bf16.msra.mxu1 %v7829_v13  ;;  %v7833_v13 = vsub.s32 7, %v7818_v35 }
 0xa4d   :  { %5598 = vmatprep.subr.bf16.mxu0 %v6771_v53  ;;  %5630 = vmatprep.subr.bf16.mxu1 %v7815_v22  ;;  %v7834_v53 = vld [vmem:[#allocation32_spill] sm:$0xff]  ;;  %v7835_v22 = vld [vmem:[#allocation33_spill] sm:$0xff] }
 0xa4e   :  { %v7237_v34 = vrot.slane %v7153_v25, %v7833_v13  ;;  %v7836_v13 = vld [vmem:[#allocation36_spill] sm:$0xff] }
 0xa50   :  { %5600 = vmatpush1.bf16.msra.mxu0 %v7834_v53  ;;  %5632 = vmatpush1.bf16.msra.mxu1 %v7835_v22 }
 0xa51   :  { %5602 = vmatprep.subr.bf16.mxu0 %v6783_v8  ;;  %5634 = vmatprep.subr.bf16.mxu1 %v6785_v10  ;;  %v1550_v8 = vrot.slane %v6830_v63, %v1549_v30  ;;  %v7840_v30 = vld [vmem:[#allocation47_spill] sm:$0xff] }
 0xa52   :  { %v2241_v42 = vpop.f32.mrb[16].mxu0  ;;  %v2312_v6 = vpop.f32.mrb[14].mxu1 }
 0xa53   :  { %v2242_v28 = vadd.f32 %v2241_v42, %v7222_v33  ;;  %v2313_v24 = vadd.f32 %v2312_v6, %v7227_v15  ;;  %v2243_v26 = vpop.f32.mrb[17].mxu0  ;;  %v2314_v29 = vpop.f32.mrb[15].mxu1 }
 0xa54   :  { %v2244_v35 = vadd.f32 %v2243_v26, %v7232_v2  ;;  %v2315_v25 = vadd.f32 %v2314_v29, %v7237_v34  ;;  %5604 = vmatpush1.bf16.msra.mxu0 %v6789_v58  ;;  %5636 = vmatpush1.bf16.msra.mxu1 %v7836_v13  ;;  %v7837_v26 = vld [vmem:[#allocation58_spill] sm:$0xff] }
 0xa55   :  { %5606 = vmatprep.subr.bf16.mxu0 %v6795_v23  ;;  %5638 = vmatprep.subr.bf16.mxu1 %v6797_v45  ;;  %v1780_v29 = vadd.f32 %v7837_v26, %v1550_v8  ;;  %v7838_v8 = vld [vmem:[#allocation45_spill] sm:$0xff]  ;;  %v7847_v26 = vld [vmem:[#allocation54_spill] sm:$0xff] }
 0xa56   :  { %v2342_v10 = vcombine.low %v2242_v28, %v2244_v35  ;;  %v2343_v42 = vcombine.low %v2313_v24, %v2315_v25  ;;  %v7842_v24 = vld [vmem:[#allocation49_spill] sm:$0xff]  ;;  %v7843_v35 = vld [vmem:[#allocation50_spill] sm:$0xff]  ;;  %v7844_v25 = vld [vmem:[#allocation51_spill] sm:$0xff] }
 0xa57   :  { %v1859_v28 = vmax.f32 %v1780_v29, 0.0  ;;  %v7848_v29 = vld [vmem:[#allocation55_spill] sm:$0xff] }
 0xa58   :  { %v2350_v6 = vrot.slane %v2342_v10, %v7182_v32  ;;  %v2357_v15 = vrot.slane %v2343_v42, %v7182_v32  ;;  %5608 = vmatpush1.bf16.msra.mxu0 %v6801_v39  ;;  %5640 = vmatpush1.bf16.msra.mxu1 %v7810_v1  ;;  %v7839_v10 = vld [vmem:[#allocation46_spill] sm:$0xff]  ;;  %v7845_v42 = vld [vmem:[#allocation52_spill] sm:$0xff] }
 0xa59   :  { %5610 = vmatprep.subr.bf16.mxu0 %v6807_v59  ;;  %5642 = vmatprep.subr.bf16.mxu1 %v6809_v60 }
 0xa5a   :  { %v2358_v63 = vcombine.low %v2350_v6, %v2357_v15  ;;  %v7841_v15 = vld [vmem:[#allocation48_spill] sm:$0xff]  ;;  %v7846_v6 = vld [vmem:[#allocation53_spill] sm:$0xff] }
 0xa5c   :  { %2362 = vst [vmem:[%s7646_s15 + $0x8] sm:$0xff] %v2358_v63  ;;  %5612 = vmatpush1.bf16.msra.mxu0 %v6813_v52  ;;  %5644 = vmatpush1.bf16.msra.mxu1 %v6815_v19 }
 0xa5d   :  { %5646 = vmatprep.subr.bf16.mxu0 %v6819_v43  ;;  %5678 = vmatprep.subr.bf16.mxu1 %v6821_v62 }
 0xa5f   :  { %3418 = vmatmul.mubr.f32.vlgmr.msra.gmra.mrb[30].mxu0 %v1859_v28  ;;  %3489 = vmatmul.mubr.f32.vlgmr.msra.gmra.mrb[28].mxu1 %v1859_v28 }
 0xa60   :  { %5648 = vmatpush1.bf16.msra.mxu0 %v6840_v37  ;;  %5680 = vmatpush1.bf16.msra.mxu1 %v6842_v27 }
 0xa61   :  { %5650 = vmatprep.subr.bf16.mxu0 %v7793_v12  ;;  %5682 = vmatprep.subr.bf16.mxu1 %v7794_v49 }
 0xa62   :  { %3559 = vmatprep.mubr.f32.mxu0 %v7776_v31  ;;  %3630 = vmatprep.mubr.f32.mxu1 %v7776_v31 }
 0xa64   :  { %5652 = vmatpush1.bf16.msra.mxu0 %v7795_v7  ;;  %5684 = vmatpush1.bf16.msra.mxu1 %v7812_v4 }
 0xa65   :  { %5654 = vmatprep.subr.bf16.mxu0 %v7813_v54  ;;  %5686 = vmatprep.subr.bf16.mxu1 %v7838_v8 }
 0xa68   :  { %5656 = vmatpush1.bf16.msra.mxu0 %v7839_v10  ;;  %5688 = vmatpush1.bf16.msra.mxu1 %v7840_v30  ;;  %v7849_v30 = vld [vmem:[#allocation40_spill] sm:$0xff] }
 0xa69   :  { %5658 = vmatprep.subr.bf16.mxu0 %v7841_v15  ;;  %5690 = vmatprep.subr.bf16.mxu1 %v7842_v24 }
 0xa6c   :  { %5660 = vmatpush1.bf16.msra.mxu0 %v7843_v35  ;;  %5692 = vmatpush1.bf16.msra.mxu1 %v7844_v25 }
 0xa6d   :  { %5662 = vmatprep.subr.bf16.mxu0 %v7845_v42  ;;  %5694 = vmatprep.subr.bf16.mxu1 %v7846_v6 }
 0xa70   :  { %5664 = vmatpush1.bf16.msra.mxu0 %v7847_v26  ;;  %5696 = vmatpush1.bf16.msra.mxu1 %v7848_v29 }
 0xa71   :  { %5666 = vmatprep.subr.bf16.mxu0 %v6898_v41  ;;  %5698 = vmatprep.subr.bf16.mxu1 %v6900_v50 }
 0xa72   :  { %v2429_v63 = vpop.f32.mrb[18].mxu0  ;;  %v2500_v15 = vpop.f32.mrb[16].mxu1 }
 0xa73   :  { %v2430_v24 = vadd.f32 %v2429_v63, %v7165_v57  ;;  %v2501_v35 = vadd.f32 %v2500_v15, %v7849_v30  ;;  %v2431_v10 = vpop.f32.mrb[19].mxu0  ;;  %v2502_v25 = vpop.f32.mrb[17].mxu1 }
 0xa74   :  { %v2432_v42 = vadd.f32 %v2431_v10, %v7174_v11  ;;  %v2503_v6 = vadd.f32 %v2502_v25, %v7168_v3  ;;  %5668 = vmatpush1.bf16.msra.mxu0 %v6904_v47  ;;  %5700 = vmatpush1.bf16.msra.mxu1 %v6906_v0  ;;  %v7855_v25 = vld [vmem:[#allocation29_spill] sm:$0xff] }
 0xa75   :  { %5670 = vmatprep.subr.bf16.mxu0 %v6910_v17  ;;  %5702 = vmatprep.subr.bf16.mxu1 %v6912_v44 }
 0xa76   :  { %v2655_v50 = vcombine.low %v2430_v24, %v2432_v42  ;;  %v2656_v41 = vcombine.low %v2501_v35, %v2503_v6  ;;  %v7853_v24 = vld [vmem:[#allocation27_spill] sm:$0xff]  ;;  %v7854_v35 = vld [vmem:[#allocation28_spill] sm:$0xff]  ;;  %v7856_v42 = vld [vmem:[#allocation30_spill] sm:$0xff] }
 0xa77   :  { %v7857_v6 = vld [vmem:[#allocation31_spill] sm:$0xff] }
 0xa78   :  { %v2663_v63 = vrot.slane %v2655_v50, %v7182_v32  ;;  %v2670_v15 = vrot.slane %v2656_v41, %v7182_v32  ;;  %5672 = vmatpush1.bf16.msra.mxu0 %v6916_v55  ;;  %5704 = vmatpush1.bf16.msra.mxu1 %v6918_v18  ;;  %v7850_v41 = vld [vmem:[#allocation24_spill] sm:$0xff]  ;;  %v7851_v50 = vld [vmem:[#allocation25_spill] sm:$0xff] }
 0xa79   :  { %5674 = vmatprep.subr.bf16.mxu0 %v6922_v56  ;;  %5706 = vmatprep.subr.bf16.mxu1 %v6924_v48 }
 0xa7a   :  { %v2671_v10 = vcombine.low %v2663_v63, %v2670_v15  ;;  %v7858_v63 = vld [vmem:[#allocation34_spill] sm:$0xff]  ;;  %v7859_v15 = vld [vmem:[#allocation35_spill] sm:$0xff] }
 0xa7c   :  { %2691 = vst [vmem:[%s7646_s15 + $0x10] sm:$0xff] %v2671_v10  ;;  %5676 = vmatpush1.bf16.msra.mxu0 %v6928_v36  ;;  %5708 = vmatpush1.bf16.msra.mxu1 %v6930_v40 }
 0xa7d   :  { %5710 = vmatprep.subr.bf16.mxu0 %v6721_v61  ;;  %5742 = vmatprep.subr.bf16.mxu1 %v6723_v5 }
 0xa7f   :  { %3560 = vmatmul.mubr.f32.vlgmr.msra.gmra.mrb[32].mxu0 %v1859_v28  ;;  %3631 = vmatmul.mubr.f32.vlgmr.msra.gmra.mrb[30].mxu1 %v1859_v28  ;;  %v7852_v28 = vld [vmem:[#allocation26_spill] sm:$0xff] }
 0xa80   :  { %5712 = vmatpush1.bf16.msra.mxu0 %v6725_v14  ;;  %5744 = vmatpush1.bf16.msra.mxu1 %v6727_v16 }
 0xa81   :  { %5714 = vmatprep.subr.bf16.mxu0 %v6731_v20  ;;  %5746 = vmatprep.subr.bf16.mxu1 %v6733_v21 }
 0xa82   :  { %3747 = vmatprep.mubr.f32.mxu0 %v7776_v31  ;;  %3818 = vmatprep.mubr.f32.mxu1 %v7776_v31 }
 0xa84   :  { %5716 = vmatpush1.bf16.msra.mxu0 %v6739_v46  ;;  %5748 = vmatpush1.bf16.msra.mxu1 %v7824_v51 }
 0xa85   :  { %5718 = vmatprep.subr.bf16.mxu0 %v7825_v9  ;;  %5750 = vmatprep.subr.bf16.mxu1 %v7826_v38 }
 0xa88   :  { %5720 = vmatpush1.bf16.msra.mxu0 %v7850_v41  ;;  %5752 = vmatpush1.bf16.msra.mxu1 %v7851_v50  ;;  %v7860_v50 = vld [vmem:[#allocation41_spill] sm:$0xff] }
 0xa89   :  { %5722 = vmatprep.subr.bf16.mxu0 %v7852_v28  ;;  %5754 = vmatprep.subr.bf16.mxu1 %v7853_v24 }
 0xa8c   :  { %5724 = vmatpush1.bf16.msra.mxu0 %v7854_v35  ;;  %5756 = vmatpush1.bf16.msra.mxu1 %v7855_v25 }
 0xa8d   :  { %5726 = vmatprep.subr.bf16.mxu0 %v7856_v42  ;;  %5758 = vmatprep.subr.bf16.mxu1 %v7857_v6 }
 0xa90   :  { %5728 = vmatpush1.bf16.msra.mxu0 %v7834_v53  ;;  %5760 = vmatpush1.bf16.msra.mxu1 %v7835_v22 }
 0xa91   :  { %5730 = vmatprep.subr.bf16.mxu0 %v7858_v63  ;;  %5762 = vmatprep.subr.bf16.mxu1 %v7859_v15 }
 0xa92   :  { %v2571_v10 = vpop.f32.mrb[20].mxu0  ;;  %v2642_v28 = vpop.f32.mrb[18].mxu1 }
 0xa93   :  { %v2572_v24 = vadd.f32 %v2571_v10, %v7222_v33  ;;  %v2643_v35 = vadd.f32 %v2642_v28, %v7860_v50  ;;  %v2573_v41 = vpop.f32.mrb[21].mxu0  ;;  %v2644_v25 = vpop.f32.mrb[19].mxu1 }
 0xa94   :  { %v2574_v42 = vadd.f32 %v2573_v41, %v7232_v2  ;;  %v2645_v6 = vadd.f32 %v2644_v25, %v7237_v34  ;;  %5732 = vmatpush1.bf16.msra.mxu0 %v6789_v58  ;;  %5764 = vmatpush1.bf16.msra.mxu1 %v7836_v13  ;;  %v7862_v25 = vld [vmem:[#allocation46_spill] sm:$0xff] }
 0xa95   :  { %5734 = vmatprep.subr.bf16.mxu0 %v6795_v23  ;;  %5766 = vmatprep.subr.bf16.mxu1 %v6797_v45 }
 0xa96   :  { %v2672_v15 = vcombine.low %v2572_v24, %v2574_v42  ;;  %v2673_v63 = vcombine.low %v2643_v35, %v2645_v6  ;;  %v7861_v24 = vld [vmem:[#allocation60_spill] sm:$0xff]  ;;  %v7863_v42 = vld [vmem:[#allocation47_spill] sm:$0xff] }
 0xa97   :  { %v1860_v35 = vmax.f32 %v7861_v24, 0.0  ;;  %v7864_v6 = vld [vmem:[#allocation48_spill] sm:$0xff] }
 0xa98   :  { %v2680_v10 = vrot.slane %v2672_v15, %v7182_v32  ;;  %v2687_v28 = vrot.slane %v2673_v63, %v7182_v32  ;;  %5736 = vmatpush1.bf16.msra.mxu0 %v6801_v39  ;;  %5768 = vmatpush1.bf16.msra.mxu1 %v7810_v1  ;;  %v7865_v63 = vld [vmem:[#allocation49_spill] sm:$0xff]  ;;  %v7866_v15 = vld [vmem:[#allocation50_spill] sm:$0xff]  ;;  %v7870_v24 = vld [vmem:[#allocation56_spill] sm:$0xff] }
 0xa99   :  { %5738 = vmatprep.subr.bf16.mxu0 %v6807_v59  ;;  %5770 = vmatprep.subr.bf16.mxu1 %v6809_v60 }
 0xa9a   :  { %v2688_v41 = vcombine.low %v2680_v10, %v2687_v28  ;;  %v7867_v10 = vld [vmem:[#allocation51_spill] sm:$0xff]  ;;  %v7868_v28 = vld [vmem:[#allocation52_spill] sm:$0xff] }
 0xa9c   :  { %2692 = vst [vmem:[%s7646_s15 + $0x18] sm:$0xff] %v2688_v41  ;;  %5740 = vmatpush1.bf16.msra.mxu0 %v6813_v52  ;;  %5772 = vmatpush1.bf16.msra.mxu1 %v6815_v19  ;;  %v7869_v41 = vld [vmem:[#allocation53_spill] sm:$0xff] }
 0xa9d   :  { %5774 = vmatprep.subr.bf16.mxu0 %v6819_v43  ;;  %5806 = vmatprep.subr.bf16.mxu1 %v6821_v62 }
 0xa9f   :  { %3748 = vmatmul.mubr.f32.vlgmr.msra.gmra.mrb[34].mxu0 %v1860_v35  ;;  %3819 = vmatmul.mubr.f32.vlgmr.msra.gmra.mrb[32].mxu1 %v1860_v35 }
 0xaa0   :  { %5776 = vmatpush1.bf16.msra.mxu0 %v6840_v37  ;;  %5808 = vmatpush1.bf16.msra.mxu1 %v6842_v27 }
 0xaa1   :  { %5778 = vmatprep.subr.bf16.mxu0 %v7793_v12  ;;  %5810 = vmatprep.subr.bf16.mxu1 %v7794_v49 }
 0xaa2   :  { %3889 = vmatprep.mubr.f32.mxu0 %v7776_v31  ;;  %3960 = vmatprep.mubr.f32.mxu1 %v7776_v31 }
 0xaa4   :  { %5780 = vmatpush1.bf16.msra.mxu0 %v7795_v7  ;;  %5812 = vmatpush1.bf16.msra.mxu1 %v7812_v4 }
 0xaa5   :  { %5782 = vmatprep.subr.bf16.mxu0 %v7813_v54  ;;  %5814 = vmatprep.subr.bf16.mxu1 %v7838_v8 }
 0xaa8   :  { %5784 = vmatpush1.bf16.msra.mxu0 %v7862_v25  ;;  %5816 = vmatpush1.bf16.msra.mxu1 %v7863_v42  ;;  %v7871_v25 = vld [vmem:[#allocation57_spill] sm:$0xff] }
 0xaa9   :  { %5786 = vmatprep.subr.bf16.mxu0 %v7864_v6  ;;  %5818 = vmatprep.subr.bf16.mxu1 %v7865_v63 }
 0xaac   :  { %5788 = vmatpush1.bf16.msra.mxu0 %v7866_v15  ;;  %5820 = vmatpush1.bf16.msra.mxu1 %v7867_v10 }
 0xaad   :  { %5790 = vmatprep.subr.bf16.mxu0 %v7868_v28  ;;  %5822 = vmatprep.subr.bf16.mxu1 %v7869_v41 }
 0xab0   :  { %5792 = vmatpush1.bf16.msra.mxu0 %v7847_v26  ;;  %5824 = vmatpush1.bf16.msra.mxu1 %v7848_v29 }
 0xab1   :  { %5794 = vmatprep.subr.bf16.mxu0 %v7870_v24  ;;  %5826 = vmatprep.subr.bf16.mxu1 %v7871_v25 }
 0xab2   :  { %v2759_v42 = vpop.f32.mrb[22].mxu0  ;;  %v2830_v6 = vpop.f32.mrb[20].mxu1 }
 0xab3   :  { %v2760_v63 = vadd.f32 %v2759_v42, %v7165_v57  ;;  %v2831_v15 = vadd.f32 %v2830_v6, %v7849_v30  ;;  %v2761_v8 = vpop.f32.mrb[23].mxu0  ;;  %v2832_v10 = vpop.f32.mrb[21].mxu1 }
 0xab4   :  { %v2762_v28 = vadd.f32 %v2761_v8, %v7174_v11  ;;  %v2833_v41 = vadd.f32 %v2832_v10, %v7168_v3  ;;  %5796 = vmatpush1.bf16.msra.mxu0 %v6904_v47  ;;  %5828 = vmatpush1.bf16.msra.mxu1 %v6906_v0  ;;  %v7876_v10 = vld [vmem:[#allocation28_spill] sm:$0xff] }
 0xab5   :  { %5798 = vmatprep.subr.bf16.mxu0 %v6910_v17  ;;  %5830 = vmatprep.subr.bf16.mxu1 %v6912_v44 }
 0xab6   :  { %v2985_v25 = vcombine.low %v2760_v63, %v2762_v28  ;;  %v2986_v24 = vcombine.low %v2831_v15, %v2833_v41  ;;  %v7874_v63 = vld [vmem:[#allocation26_spill] sm:$0xff]  ;;  %v7875_v15 = vld [vmem:[#allocation27_spill] sm:$0xff]  ;;  %v7877_v28 = vld [vmem:[#allocation29_spill] sm:$0xff] }
 0xab7   :  { %v7878_v41 = vld [vmem:[#allocation30_spill] sm:$0xff] }
 0xab8   :  { %v2993_v42 = vrot.slane %v2985_v25, %v7182_v32  ;;  %v3000_v6 = vrot.slane %v2986_v24, %v7182_v32  ;;  %5800 = vmatpush1.bf16.msra.mxu0 %v6916_v55  ;;  %5832 = vmatpush1.bf16.msra.mxu1 %v6918_v18  ;;  %v7873_v25 = vld [vmem:[#allocation25_spill] sm:$0xff]  ;;  %v7879_v24 = vld [vmem:[#allocation31_spill] sm:$0xff] }
 0xab9   :  { %5802 = vmatprep.subr.bf16.mxu0 %v6922_v56  ;;  %5834 = vmatprep.subr.bf16.mxu1 %v6924_v48 }
 0xaba   :  { %v3001_v8 = vcombine.low %v2993_v42, %v3000_v6  ;;  %v7880_v42 = vld [vmem:[#allocation34_spill] sm:$0xff]  ;;  %v7881_v6 = vld [vmem:[#allocation35_spill] sm:$0xff] }
 0xabc   :  { %3021 = vst [vmem:[%s7646_s15 + $0x20] sm:$0xff] %v3001_v8  ;;  %5804 = vmatpush1.bf16.msra.mxu0 %v6928_v36  ;;  %5836 = vmatpush1.bf16.msra.mxu1 %v6930_v40 }
 0xabd   :  { %5838 = vmatprep.subr.bf16.mxu0 %v6721_v61  ;;  %5870 = vmatprep.subr.bf16.mxu1 %v6723_v5 }
 0xabf   :  { %3890 = vmatmul.mubr.f32.vlgmr.msra.gmra.mrb[36].mxu0 %v1860_v35  ;;  %3961 = vmatmul.mubr.f32.vlgmr.msra.gmra.mrb[34].mxu1 %v1860_v35  ;;  %v7872_v35 = vld [vmem:[#allocation24_spill] sm:$0xff] }
 0xac0   :  { %5840 = vmatpush1.bf16.msra.mxu0 %v6725_v14  ;;  %5872 = vmatpush1.bf16.msra.mxu1 %v6727_v16 }
 0xac1   :  { %5842 = vmatprep.subr.bf16.mxu0 %v6731_v20  ;;  %5874 = vmatprep.subr.bf16.mxu1 %v6733_v21 }
 0xac2   :  { %4077 = vmatprep.mubr.f32.mxu0 %v7776_v31  ;;  %4148 = vmatprep.mubr.f32.mxu1 %v7776_v31 }
 0xac4   :  { %5844 = vmatpush1.bf16.msra.mxu0 %v6739_v46  ;;  %5876 = vmatpush1.bf16.msra.mxu1 %v7824_v51 }
 0xac5   :  { %5846 = vmatprep.subr.bf16.mxu0 %v7825_v9  ;;  %5878 = vmatprep.subr.bf16.mxu1 %v7826_v38 }
 0xac8   :  { %5848 = vmatpush1.bf16.msra.mxu0 %v7872_v35  ;;  %5880 = vmatpush1.bf16.msra.mxu1 %v7873_v25 }
 0xac9   :  { %5850 = vmatprep.subr.bf16.mxu0 %v7874_v63  ;;  %5882 = vmatprep.subr.bf16.mxu1 %v7875_v15 }
 0xacc   :  { %5852 = vmatpush1.bf16.msra.mxu0 %v7876_v10  ;;  %5884 = vmatpush1.bf16.msra.mxu1 %v7877_v28 }
 0xacd   :  { %5854 = vmatprep.subr.bf16.mxu0 %v7878_v41  ;;  %5886 = vmatprep.subr.bf16.mxu1 %v7879_v24 }
 0xad0   :  { %5856 = vmatpush1.bf16.msra.mxu0 %v7834_v53  ;;  %5888 = vmatpush1.bf16.msra.mxu1 %v7835_v22 }
 0xad1   :  { %5858 = vmatprep.subr.bf16.mxu0 %v7880_v42  ;;  %5890 = vmatprep.subr.bf16.mxu1 %v7881_v6 }
 0xad2   :  { %v2901_v8 = vpop.f32.mrb[24].mxu0  ;;  %v2972_v63 = vpop.f32.mrb[22].mxu1 }
 0xad3   :  { %v2902_v15 = vadd.f32 %v2901_v8, %v7222_v33  ;;  %v2973_v10 = vadd.f32 %v2972_v63, %v7860_v50  ;;  %v2903_v25 = vpop.f32.mrb[25].mxu0  ;;  %v2974_v28 = vpop.f32.mrb[23].mxu1 }
 0xad4   :  { %v2904_v41 = vadd.f32 %v2903_v25, %v7232_v2  ;;  %v2975_v24 = vadd.f32 %v2974_v28, %v7237_v34  ;;  %5860 = vmatpush1.bf16.msra.mxu0 %v6789_v58  ;;  %5892 = vmatpush1.bf16.msra.mxu1 %v7836_v13  ;;  %v7883_v28 = vld [vmem:[#allocation45_spill] sm:$0xff] }
 0xad5   :  { %5862 = vmatprep.subr.bf16.mxu0 %v6795_v23  ;;  %5894 = vmatprep.subr.bf16.mxu1 %v6797_v45 }
 0xad6   :  { %v3002_v6 = vcombine.low %v2902_v15, %v2904_v41  ;;  %v3003_v42 = vcombine.low %v2973_v10, %v2975_v24  ;;  %v7882_v15 = vld [vmem:[#allocation59_spill] sm:$0xff]  ;;  %v7884_v41 = vld [vmem:[#allocation46_spill] sm:$0xff] }
 0xad7   :  { %v1861_v10 = vmax.f32 %v7882_v15, 0.0  ;;  %v7885_v24 = vld [vmem:[#allocation47_spill] sm:$0xff]  ;;  %v7891_v15 = vld [vmem:[#allocation53_spill] sm:$0xff] }
 0xad8   :  { %v3010_v8 = vrot.slane %v3002_v6, %v7182_v32  ;;  %v3017_v63 = vrot.slane %v3003_v42, %v7182_v32  ;;  %5864 = vmatpush1.bf16.msra.mxu0 %v6801_v39  ;;  %5896 = vmatpush1.bf16.msra.mxu1 %v7810_v1  ;;  %v7886_v42 = vld [vmem:[#allocation48_spill] sm:$0xff]  ;;  %v7887_v6 = vld [vmem:[#allocation49_spill] sm:$0xff] }
 0xad9   :  { %5866 = vmatprep.subr.bf16.mxu0 %v6807_v59  ;;  %5898 = vmatprep.subr.bf16.mxu1 %v6809_v60 }
 0xada   :  { %v3018_v25 = vcombine.low %v3010_v8, %v3017_v63  ;;  %v7888_v8 = vld [vmem:[#allocation50_spill] sm:$0xff]  ;;  %v7889_v63 = vld [vmem:[#allocation51_spill] sm:$0xff] }
 0xadc   :  { %3022 = vst [vmem:[%s7646_s15 + $0x28] sm:$0xff] %v3018_v25  ;;  %5868 = vmatpush1.bf16.msra.mxu0 %v6813_v52  ;;  %5900 = vmatpush1.bf16.msra.mxu1 %v6815_v19  ;;  %v7890_v25 = vld [vmem:[#allocation52_spill] sm:$0xff] }
 0xadd   :  { %5902 = vmatprep.subr.bf16.mxu0 %v6819_v43  ;;  %5934 = vmatprep.subr.bf16.mxu1 %v6821_v62 }
 0xadf   :  { %4078 = vmatmul.mubr.f32.vlgmr.msra.gmra.mrb[38].mxu0 %v1861_v10  ;;  %4149 = vmatmul.mubr.f32.vlgmr.msra.gmra.mrb[36].mxu1 %v1861_v10 }
 0xae0   :  { %5904 = vmatpush1.bf16.msra.mxu0 %v6840_v37  ;;  %5936 = vmatpush1.bf16.msra.mxu1 %v6842_v27 }
 0xae1   :  { %5906 = vmatprep.subr.bf16.mxu0 %v7793_v12  ;;  %5938 = vmatprep.subr.bf16.mxu1 %v7794_v49 }
 0xae2   :  { %4219 = vmatprep.mubr.f32.mxu0 %v7776_v31  ;;  %4290 = vmatprep.mubr.f32.mxu1 %v7776_v31 }
 0xae4   :  { %5908 = vmatpush1.bf16.msra.mxu0 %v7795_v7  ;;  %5940 = vmatpush1.bf16.msra.mxu1 %v7812_v4 }
 0xae5   :  { %5910 = vmatprep.subr.bf16.mxu0 %v7813_v54  ;;  %5942 = vmatprep.subr.bf16.mxu1 %v7883_v28  ;;  %v7892_v28 = vld [vmem:[#allocation56_spill] sm:$0xff] }
 0xae8   :  { %5912 = vmatpush1.bf16.msra.mxu0 %v7884_v41  ;;  %5944 = vmatpush1.bf16.msra.mxu1 %v7885_v24  ;;  %v7893_v41 = vld [vmem:[#allocation57_spill] sm:$0xff] }
 0xae9   :  { %5914 = vmatprep.subr.bf16.mxu0 %v7886_v42  ;;  %5946 = vmatprep.subr.bf16.mxu1 %v7887_v6 }
 0xaec   :  { %5916 = vmatpush1.bf16.msra.mxu0 %v7888_v8  ;;  %5948 = vmatpush1.bf16.msra.mxu1 %v7889_v63 }
 0xaed   :  { %5918 = vmatprep.subr.bf16.mxu0 %v7890_v25  ;;  %5950 = vmatprep.subr.bf16.mxu1 %v7891_v15 }
 0xaf0   :  { %5920 = vmatpush1.bf16.msra.mxu0 %v7847_v26  ;;  %5952 = vmatpush1.bf16.msra.mxu1 %v7848_v29 }
 0xaf1   :  { %5922 = vmatprep.subr.bf16.mxu0 %v7892_v28  ;;  %5954 = vmatprep.subr.bf16.mxu1 %v7893_v41 }
 0xaf2   :  { %v3089_v24 = vpop.f32.mrb[26].mxu0  ;;  %v3160_v42 = vpop.f32.mrb[24].mxu1 }
 0xaf3   :  { %v3090_v6 = vadd.f32 %v3089_v24, %v7165_v57  ;;  %v3161_v8 = vadd.f32 %v3160_v42, %v7849_v30  ;;  %v3091_v54 = vpop.f32.mrb[27].mxu0  ;;  %v3162_v63 = vpop.f32.mrb[25].mxu1 }
 0xaf4   :  { %v3092_v25 = vadd.f32 %v3091_v54, %v7174_v11  ;;  %v3163_v15 = vadd.f32 %v3162_v63, %v7168_v3  ;;  %5924 = vmatpush1.bf16.msra.mxu0 %v6904_v47  ;;  %5956 = vmatpush1.bf16.msra.mxu1 %v6906_v0 }
 0xaf5   :  { %5926 = vmatprep.subr.bf16.mxu0 %v6910_v17  ;;  %5958 = vmatprep.subr.bf16.mxu1 %v6912_v44 }
 0xaf6   :  { %v3315_v41 = vcombine.low %v3090_v6, %v3092_v25  ;;  %v3316_v28 = vcombine.low %v3161_v8, %v3163_v15 }
 0xaf8   :  { %v3323_v24 = vrot.slane %v3315_v41, %v7182_v32  ;;  %v3330_v42 = vrot.slane %v3316_v28, %v7182_v32  ;;  %5928 = vmatpush1.bf16.msra.mxu0 %v6916_v55  ;;  %5960 = vmatpush1.bf16.msra.mxu1 %v6918_v18 }
 0xaf9   :  { %5930 = vmatprep.subr.bf16.mxu0 %v6922_v56  ;;  %5962 = vmatprep.subr.bf16.mxu1 %v6924_v48 }
 0xafa   :  { %v3331_v54 = vcombine.low %v3323_v24, %v3330_v42 }
 0xafc   :  { %3351 = vst [vmem:[%s7646_s15 + $0x30] sm:$0xff] %v3331_v54  ;;  %5932 = vmatpush1.bf16.msra.mxu0 %v6928_v36  ;;  %5964 = vmatpush1.bf16.msra.mxu1 %v6930_v40 }
 0xafd   :  { %5966 = vmatprep.subr.bf16.mxu0 %v6721_v61  ;;  %5998 = vmatprep.subr.bf16.mxu1 %v6723_v5  ;;  %v7894_v61 = vld [vmem:[#allocation25_spill] sm:$0xff]  ;;  %v7895_v5 = vld [vmem:[#allocation26_spill] sm:$0xff] }
 0xaff   :  { %4220 = vmatmul.mubr.f32.vlgmr.msra.gmra.mrb[40].mxu0 %v1861_v10  ;;  %4291 = vmatmul.mubr.f32.vlgmr.msra.gmra.mrb[38].mxu1 %v1861_v10 }
 0xb00   :  { %5968 = vmatpush1.bf16.msra.mxu0 %v6725_v14  ;;  %6000 = vmatpush1.bf16.msra.mxu1 %v6727_v16  ;;  %v7896_v14 = vld [vmem:[#allocation27_spill] sm:$0xff]  ;;  %v7897_v16 = vld [vmem:[#allocation28_spill] sm:$0xff] }
 0xb01   :  { %5970 = vmatprep.subr.bf16.mxu0 %v6731_v20  ;;  %6002 = vmatprep.subr.bf16.mxu1 %v6733_v21  ;;  %v7898_v20 = vld [vmem:[#allocation29_spill] sm:$0xff]  ;;  %v7899_v21 = vld [vmem:[#allocation30_spill] sm:$0xff] }
 0xb02   :  { %4407 = vmatprep.mubr.f32.mxu0 %v7776_v31  ;;  %4478 = vmatprep.mubr.f32.mxu1 %v7776_v31 }
 0xb04   :  { %5972 = vmatpush1.bf16.msra.mxu0 %v6739_v46  ;;  %6004 = vmatpush1.bf16.msra.mxu1 %v7824_v51  ;;  %v7900_v46 = vld [vmem:[#allocation31_spill] sm:$0xff]  ;;  %v7901_v51 = vld [vmem:[#allocation34_spill] sm:$0xff] }
 0xb05   :  { %5974 = vmatprep.subr.bf16.mxu0 %v7825_v9  ;;  %6006 = vmatprep.subr.bf16.mxu1 %v7826_v38  ;;  %v7902_v9 = vld [vmem:[#allocation35_spill] sm:$0xff] }
 0xb08   :  { %5976 = vmatpush1.bf16.msra.mxu0 %v7872_v35  ;;  %6008 = vmatpush1.bf16.msra.mxu1 %v7894_v61 }
 0xb09   :  { %5978 = vmatprep.subr.bf16.mxu0 %v7895_v5  ;;  %6010 = vmatprep.subr.bf16.mxu1 %v7896_v14 }
 0xb0c   :  { %5980 = vmatpush1.bf16.msra.mxu0 %v7897_v16  ;;  %6012 = vmatpush1.bf16.msra.mxu1 %v7898_v20 }
 0xb0d   :  { %5982 = vmatprep.subr.bf16.mxu0 %v7899_v21  ;;  %6014 = vmatprep.subr.bf16.mxu1 %v7900_v46 }
 0xb10   :  { %5984 = vmatpush1.bf16.msra.mxu0 %v7834_v53  ;;  %6016 = vmatpush1.bf16.msra.mxu1 %v7835_v22 }
 0xb11   :  { %5986 = vmatprep.subr.bf16.mxu0 %v7901_v51  ;;  %6018 = vmatprep.subr.bf16.mxu1 %v7902_v9 }
 0xb12   :  { %v3231_v38 = vpop.f32.mrb[28].mxu0  ;;  %v3302_v35 = vpop.f32.mrb[26].mxu1 }
 0xb13   :  { %v3232_v10 = vadd.f32 %v3231_v38, %v7222_v33  ;;  %v3303_v28 = vadd.f32 %v3302_v35, %v7860_v50  ;;  %v3233_v41 = vpop.f32.mrb[29].mxu0  ;;  %v3304_v6 = vpop.f32.mrb[27].mxu1 }
 0xb14   :  { %v3234_v8 = vadd.f32 %v3233_v41, %v7232_v2  ;;  %v3305_v63 = vadd.f32 %v3304_v6, %v7237_v34  ;;  %5988 = vmatpush1.bf16.msra.mxu0 %v6789_v58  ;;  %6020 = vmatpush1.bf16.msra.mxu1 %v7836_v13 }
 0xb15   :  { %5990 = vmatprep.subr.bf16.mxu0 %v6795_v23  ;;  %6022 = vmatprep.subr.bf16.mxu1 %v6797_v45  ;;  %v7903_v23 = vld [vmem:[#allocation61_spill] sm:$0xff] }
 0xb16   :  { %v3332_v53 = vcombine.low %v3232_v10, %v3234_v8  ;;  %v3333_v22 = vcombine.low %v3303_v28, %v3305_v63  ;;  %v1862_v45 = vmax.f32 %v7903_v23, 0.0 }
 0xb18   :  { %v3340_v25 = vrot.slane %v3332_v53, %v7182_v32  ;;  %v3347_v15 = vrot.slane %v3333_v22, %v7182_v32  ;;  %5992 = vmatpush1.bf16.msra.mxu0 %v6801_v39  ;;  %6024 = vmatpush1.bf16.msra.mxu1 %v7810_v1  ;;  %v7904_v1 = vld [vmem:[#allocation44_spill] sm:$0xff]  ;;  %v7905_v39 = vld [vmem:[#allocation45_spill] sm:$0xff] }
 0xb19   :  { %5994 = vmatprep.subr.bf16.mxu0 %v6807_v59  ;;  %6026 = vmatprep.subr.bf16.mxu1 %v6809_v60  ;;  %v7906_v59 = vld [vmem:[#allocation46_spill] sm:$0xff]  ;;  %v7907_v60 = vld [vmem:[#allocation47_spill] sm:$0xff] }
 0xb1a   :  { %v3348_v58 = vcombine.low %v3340_v25, %v3347_v15 }
 0xb1c   :  { %3352 = vst [vmem:[%s7646_s15 + $0x38] sm:$0xff] %v3348_v58  ;;  %5996 = vmatpush1.bf16.msra.mxu0 %v6813_v52  ;;  %6028 = vmatpush1.bf16.msra.mxu1 %v6815_v19  ;;  %v7908_v52 = vld [vmem:[#allocation48_spill] sm:$0xff]  ;;  %v7909_v19 = vld [vmem:[#allocation49_spill] sm:$0xff] }
 0xb1d   :  { %6030 = vmatprep.subr.bf16.mxu0 %v6819_v43  ;;  %6062 = vmatprep.subr.bf16.mxu1 %v6821_v62  ;;  %v7910_v43 = vld [vmem:[#allocation50_spill] sm:$0xff]  ;;  %v7911_v62 = vld [vmem:[#allocation51_spill] sm:$0xff] }
 0xb1f   :  { %4408 = vmatmul.mubr.f32.vlgmr.msra.gmra.mrb[42].mxu0 %v1862_v45  ;;  %4479 = vmatmul.mubr.f32.vlgmr.msra.gmra.mrb[40].mxu1 %v1862_v45 }
 0xb20   :  { %6032 = vmatpush1.bf16.msra.mxu0 %v6840_v37  ;;  %6064 = vmatpush1.bf16.msra.mxu1 %v6842_v27  ;;  %v7912_v37 = vld [vmem:[#allocation52_spill] sm:$0xff]  ;;  %v7913_v27 = vld [vmem:[#allocation53_spill] sm:$0xff] }
 0xb21   :  { %6034 = vmatprep.subr.bf16.mxu0 %v7793_v12  ;;  %6066 = vmatprep.subr.bf16.mxu1 %v7794_v49  ;;  %v7915_v12 = vld [vmem:[#allocation57_spill] sm:$0xff] }
 0xb22   :  { %4549 = vmatprep.mubr.f32.mxu0 %v7776_v31  ;;  %4620 = vmatprep.mubr.f32.mxu1 %v7776_v31  ;;  %v7914_v31 = vld [vmem:[#allocation56_spill] sm:$0xff] }
 0xb24   :  { %6036 = vmatpush1.bf16.msra.mxu0 %v7795_v7  ;;  %6068 = vmatpush1.bf16.msra.mxu1 %v7812_v4 }
 0xb25   :  { %6038 = vmatprep.subr.bf16.mxu0 %v7904_v1  ;;  %6070 = vmatprep.subr.bf16.mxu1 %v7905_v39 }
 0xb28   :  { %6040 = vmatpush1.bf16.msra.mxu0 %v7906_v59  ;;  %6072 = vmatpush1.bf16.msra.mxu1 %v7907_v60 }
 0xb29   :  { %6042 = vmatprep.subr.bf16.mxu0 %v7908_v52  ;;  %6074 = vmatprep.subr.bf16.mxu1 %v7909_v19 }
 0xb2c   :  { %6044 = vmatpush1.bf16.msra.mxu0 %v7910_v43  ;;  %6076 = vmatpush1.bf16.msra.mxu1 %v7911_v62 }
 0xb2d   :  { %6046 = vmatprep.subr.bf16.mxu0 %v7912_v37  ;;  %6078 = vmatprep.subr.bf16.mxu1 %v7913_v27 }
 0xb30   :  { %6048 = vmatpush1.bf16.msra.mxu0 %v7847_v26  ;;  %6080 = vmatpush1.bf16.msra.mxu1 %v7848_v29 }
 0xb31   :  { %6050 = vmatprep.subr.bf16.mxu0 %v7914_v31  ;;  %6082 = vmatprep.subr.bf16.mxu1 %v7915_v12 }
 0xb32   :  { %v3419_v49 = vpop.f32.mrb[30].mxu0  ;;  %v3490_v7 = vpop.f32.mrb[28].mxu1 }
 0xb33   :  { %v3420_v4 = vadd.f32 %v3419_v49, %v7165_v57  ;;  %v3491_v13 = vadd.f32 %v3490_v7, %v7849_v30  ;;  %v3421_v24 = vpop.f32.mrb[31].mxu0  ;;  %v3492_v42 = vpop.f32.mrb[29].mxu1 }
 0xb34   :  { %v3422_v54 = vadd.f32 %v3421_v24, %v7174_v11  ;;  %v3493_v61 = vadd.f32 %v3492_v42, %v7168_v3  ;;  %6052 = vmatpush1.bf16.msra.mxu0 %v6904_v47  ;;  %6084 = vmatpush1.bf16.msra.mxu1 %v6906_v0 }
 0xb35   :  { %6054 = vmatprep.subr.bf16.mxu0 %v6910_v17  ;;  %6086 = vmatprep.subr.bf16.mxu1 %v6912_v44 }
 0xb36   :  { %v3645_v26 = vcombine.low %v3420_v4, %v3422_v54  ;;  %v3646_v29 = vcombine.low %v3491_v13, %v3493_v61 }
 0xb38   :  { %v3653_v5 = vrot.slane %v3645_v26, %v7182_v32  ;;  %v3660_v14 = vrot.slane %v3646_v29, %v7182_v32  ;;  %6056 = vmatpush1.bf16.msra.mxu0 %v6916_v55  ;;  %6088 = vmatpush1.bf16.msra.mxu1 %v6918_v18 }
 0xb39   :  { %6058 = vmatprep.subr.bf16.mxu0 %v6922_v56  ;;  %6090 = vmatprep.subr.bf16.mxu1 %v6924_v48 }
 0xb3a   :  { %v3661_v47 = vcombine.low %v3653_v5, %v3660_v14 }
 0xb3c   :  { %3681 = vst [vmem:[%s7646_s15 + $0x40] sm:$0xff] %v3661_v47  ;;  %6060 = vmatpush1.bf16.msra.mxu0 %v6928_v36  ;;  %6092 = vmatpush1.bf16.msra.mxu1 %v6930_v40 }
 0xb3f   :  { %4550 = vmatmul.mubr.f32.vlgmr.msra.gmra.mrb[44].mxu0 %v1862_v45  ;;  %4621 = vmatmul.mubr.f32.vlgmr.msra.gmra.mrb[42].mxu1 %v1862_v45 }
 0xb52   :  { %v3561_v0 = vpop.f32.mrb[32].mxu0  ;;  %v3632_v17 = vpop.f32.mrb[30].mxu1 }
 0xb53   :  { %v3562_v44 = vadd.f32 %v3561_v0, %v7222_v33  ;;  %v3633_v55 = vadd.f32 %v3632_v17, %v7860_v50  ;;  %v3563_v18 = vpop.f32.mrb[33].mxu0  ;;  %v3634_v56 = vpop.f32.mrb[31].mxu1 }
 0xb54   :  { %v3564_v48 = vadd.f32 %v3563_v18, %v7232_v2  ;;  %v3635_v16 = vadd.f32 %v3634_v56, %v7237_v34 }
 0xb56   :  { %v3662_v20 = vcombine.low %v3562_v44, %v3564_v48  ;;  %v3663_v21 = vcombine.low %v3633_v55, %v3635_v16 }
 0xb58   :  { %v3670_v36 = vrot.slane %v3662_v20, %v7182_v32  ;;  %v3677_v40 = vrot.slane %v3663_v21, %v7182_v32 }
 0xb5a   :  { %v3678_v46 = vcombine.low %v3670_v36, %v3677_v40 }
 0xb5c   :  { %3682 = vst [vmem:[%s7646_s15 + $0x48] sm:$0xff] %v3678_v46 }
 0xb72   :  { %v3749_v51 = vpop.f32.mrb[34].mxu0  ;;  %v3820_v9 = vpop.f32.mrb[32].mxu1 }
 0xb73   :  { %v3750_v38 = vadd.f32 %v3749_v51, %v7165_v57  ;;  %v3821_v35 = vadd.f32 %v3820_v9, %v7849_v30  ;;  %v3751_v10 = vpop.f32.mrb[35].mxu0  ;;  %v3822_v28 = vpop.f32.mrb[33].mxu1 }
 0xb74   :  { %v3752_v41 = vadd.f32 %v3751_v10, %v7174_v11  ;;  %v3823_v6 = vadd.f32 %v3822_v28, %v7168_v3 }
 0xb76   :  { %v3975_v8 = vcombine.low %v3750_v38, %v3752_v41  ;;  %v3976_v63 = vcombine.low %v3821_v35, %v3823_v6 }
 0xb78   :  { %v3983_v53 = vrot.slane %v3975_v8, %v7182_v32  ;;  %v3990_v22 = vrot.slane %v3976_v63, %v7182_v32 }
 0xb7a   :  { %v3991_v25 = vcombine.low %v3983_v53, %v3990_v22 }
 0xb7c   :  { %4011 = vst [vmem:[%s7646_s15 + $0x50] sm:$0xff] %v3991_v25 }
 0xb92   :  { %v3891_v15 = vpop.f32.mrb[36].mxu0  ;;  %v3962_v58 = vpop.f32.mrb[34].mxu1 }
 0xb93   :  { %v3892_v23 = vadd.f32 %v3891_v15, %v7222_v33  ;;  %v3963_v45 = vadd.f32 %v3962_v58, %v7860_v50  ;;  %v3893_v1 = vpop.f32.mrb[37].mxu0  ;;  %v3964_v39 = vpop.f32.mrb[35].mxu1 }
 0xb94   :  { %v3894_v59 = vadd.f32 %v3893_v1, %v7232_v2  ;;  %v3965_v60 = vadd.f32 %v3964_v39, %v7237_v34 }
 0xb96   :  { %v3992_v52 = vcombine.low %v3892_v23, %v3894_v59  ;;  %v3993_v19 = vcombine.low %v3963_v45, %v3965_v60 }
 0xb98   :  { %v4000_v43 = vrot.slane %v3992_v52, %v7182_v32  ;;  %v4007_v62 = vrot.slane %v3993_v19, %v7182_v32 }
 0xb9a   :  { %v4008_v37 = vcombine.low %v4000_v43, %v4007_v62 }
 0xb9c   :  { %4012 = vst [vmem:[%s7646_s15 + $0x58] sm:$0xff] %v4008_v37 }
 0xbb2   :  { %v4079_v27 = vpop.f32.mrb[38].mxu0  ;;  %v4150_v31 = vpop.f32.mrb[36].mxu1 }
 0xbb3   :  { %v4080_v12 = vadd.f32 %v4079_v27, %v7165_v57  ;;  %v4151_v49 = vadd.f32 %v4150_v31, %v7849_v30  ;;  %v4081_v7 = vpop.f32.mrb[39].mxu0  ;;  %v4152_v4 = vpop.f32.mrb[37].mxu1 }
 0xbb4   :  { %v4082_v13 = vadd.f32 %v4081_v7, %v7174_v11  ;;  %v4153_v24 = vadd.f32 %v4152_v4, %v7168_v3 }
 0xbb6   :  { %v4305_v42 = vcombine.low %v4080_v12, %v4082_v13  ;;  %v4306_v54 = vcombine.low %v4151_v49, %v4153_v24 }
 0xbb8   :  { %v4313_v61 = vrot.slane %v4305_v42, %v7182_v32  ;;  %v4320_v26 = vrot.slane %v4306_v54, %v7182_v32 }
 0xbba   :  { %v4321_v29 = vcombine.low %v4313_v61, %v4320_v26 }
 0xbbc   :  { %4341 = vst [vmem:[%s7646_s15 + $0x60] sm:$0xff] %v4321_v29 }
 0xbd2   :  { %v4221_v5 = vpop.f32.mrb[40].mxu0  ;;  %v4292_v14 = vpop.f32.mrb[38].mxu1 }
 0xbd3   :  { %v4222_v47 = vadd.f32 %v4221_v5, %v7222_v33  ;;  %v4293_v0 = vadd.f32 %v4292_v14, %v7860_v50  ;;  %v4223_v17 = vpop.f32.mrb[41].mxu0  ;;  %v4294_v44 = vpop.f32.mrb[39].mxu1 }
 0xbd4   :  { %v4224_v55 = vadd.f32 %v4223_v17, %v7232_v2  ;;  %v4295_v18 = vadd.f32 %v4294_v44, %v7237_v34 }
 0xbd6   :  { %v4322_v56 = vcombine.low %v4222_v47, %v4224_v55  ;;  %v4323_v48 = vcombine.low %v4293_v0, %v4295_v18 }
 0xbd8   :  { %v4330_v16 = vrot.slane %v4322_v56, %v7182_v32  ;;  %v4337_v20 = vrot.slane %v4323_v48, %v7182_v32 }
 0xbda   :  { %v4338_v21 = vcombine.low %v4330_v16, %v4337_v20 }
 0xbdc   :  { %4342 = vst [vmem:[%s7646_s15 + $0x68] sm:$0xff] %v4338_v21 }
 0xbf2   :  { %v4409_v36 = vpop.f32.mrb[42].mxu0  ;;  %v4480_v40 = vpop.f32.mrb[40].mxu1 }
 0xbf3   :  { %v4410_v46 = vadd.f32 %v4409_v36, %v7165_v57  ;;  %v4481_v51 = vadd.f32 %v4480_v40, %v7849_v30  ;;  %v4411_v9 = vpop.f32.mrb[43].mxu0  ;;  %v4482_v38 = vpop.f32.mrb[41].mxu1 }
 0xbf4   :  { %v4412_v35 = vadd.f32 %v4411_v9, %v7174_v11  ;;  %v4483_v10 = vadd.f32 %v4482_v38, %v7168_v3 }
 0xbf6   :  { %v4635_v28 = vcombine.low %v4410_v46, %v4412_v35  ;;  %v4636_v41 = vcombine.low %v4481_v51, %v4483_v10 }
 0xbf8   :  { %v4643_v6 = vrot.slane %v4635_v28, %v7182_v32  ;;  %v4650_v8 = vrot.slane %v4636_v41, %v7182_v32 }
 0xbfa   :  { %v4651_v63 = vcombine.low %v4643_v6, %v4650_v8 }
 0xbfc   :  { %4671 = vst [vmem:[%s7646_s15 + $0x70] sm:$0xff] %v4651_v63 }
 0xc12   :  { %v4551_v57 = vpop.f32.mrb[44].mxu0  ;;  %v4622_v53 = vpop.f32.mrb[42].mxu1 }
 0xc13   :  { %v4552_v30 = vadd.f32 %v4551_v57, %v7222_v33  ;;  %v4623_v22 = vadd.f32 %v4622_v53, %v7860_v50  ;;  %v4553_v11 = vpop.f32.mrb[45].mxu0  ;;  %v4624_v25 = vpop.f32.mrb[43].mxu1 }
 0xc14   :  { %v4554_v3 = vadd.f32 %v4553_v11, %v7232_v2  ;;  %v4625_v15 = vadd.f32 %v4624_v25, %v7237_v34 }
 0xc16   :  { %v4652_v58 = vcombine.low %v4552_v30, %v4554_v3  ;;  %v4653_v23 = vcombine.low %v4623_v22, %v4625_v15 }
 0xc18   :  { %v4660_v45 = vrot.slane %v4652_v58, %v7182_v32  ;;  %v4667_v1 = vrot.slane %v4653_v23, %v7182_v32 }
 0xc1a   :  { %v4668_v39 = vcombine.low %v4660_v45, %v4667_v1 }
 0xc1c   :  { %4672 = vst [vmem:[%s7646_s15 + $0x78] sm:$0xff] %v4668_v39 }
 0xc1d   :  { %4677 = vsyncpa [#allocation3], 1 }
 0xc1e   :  { %4678 = vsyncpa [#allocation5], 1 }
 0xc1f   :  { %4679 = vsyncpa [#allocation8], 1 }
 0xc20   :  { %4680 = vsyncpa [#allocation11], 1 }

</bundles_post_ra>
